<compile_context>
chip_gen: v6e
topology: v6e:2x2x1
jax: 0.10.0
libtpu: 0.0.40
codegen_flags: <defaults>
</compile_context>

<pallas_src>
import functools

import jax
import jax.numpy as jnp
from jax.experimental import pallas as pl
from jax.experimental.pallas import tpu as pltpu


# ---------------------------------------------------------------------------
# Helpers
# ---------------------------------------------------------------------------
def _round_up(x, m):
    return (x + m - 1) // m * m


@functools.lru_cache(maxsize=1)
def _vmem_limit():
    """Generation-dependent VMEM budget (v7x: 64 MiB phys, v5e/v6e: 128 MiB)."""
    try:
        cap = int(pltpu.get_tpu_info().vmem_capacity_bytes)
    except Exception:
        cap = 64 * 1024 * 1024
    return min(max(cap - 16 * 1024 * 1024, 32 * 1024 * 1024), 100 * 1024 * 1024)


def _pick_m_tile(M, max_tm=512):
    """M tile (multiple of 8).  Prefer >=2 grid steps (megacore) and a tile
    that divides M exactly (no row padding) when possible."""
    Mp = _round_up(max(M, 8), 8)
    if Mp <= max_tm:
        tm = _round_up((Mp + 1) // 2, 8) if Mp >= 16 else Mp
        return tm, _round_up(Mp, tm)
    for tm in range(max_tm, max_tm // 2, -8):      # prefer an exact divisor
        if Mp % tm == 0:
            return tm, Mp
    return max_tm, _round_up(Mp, max_tm)


# ---------------------------------------------------------------------------
# Kernel 1: conv-as-matmul, fully fused  y = relu(patches @ w + b)
#   patches: (tm, K) bf16   w: (K, out_c) bf16   b: (1, out_c) f32
# Grid is 1-D over M (parallel) — weights stay resident in VMEM.
# ---------------------------------------------------------------------------
def _conv_mm_relu_kernel(a_ref, w_ref, b_ref, o_ref):
    acc = jnp.dot(a_ref[...], w_ref[...], preferred_element_type=jnp.float32)
    acc = acc + b_ref[...]
    o_ref[...] = jnp.maximum(acc, 0.0).astype(o_ref.dtype)


def _conv_matmul(a, w_mat, b_row):
    M, K = a.shape
    out_c = w_mat.shape[1]
    tm, Mp = _pick_m_tile(M)
    if Mp > M:
        a = jnp.pad(a, ((0, Mp - M), (0, 0)))

    y = pl.pallas_call(
        _conv_mm_relu_kernel,
        out_shape=jax.ShapeDtypeStruct((Mp, out_c), jnp.bfloat16),
        grid_spec=pltpu.PrefetchScalarGridSpec(
            num_scalar_prefetch=0,
            grid=(Mp // tm,),
            in_specs=[
                pl.BlockSpec((tm, K), lambda i: (i, 0)),
                pl.BlockSpec((K, out_c), lambda i: (0, 0)),
                pl.BlockSpec((1, out_c), lambda i: (0, 0)),
            ],
            out_specs=pl.BlockSpec((tm, out_c), lambda i: (i, 0)),
        ),
        compiler_params=pltpu.CompilerParams(
            dimension_semantics=("parallel",),
            vmem_limit_bytes=_vmem_limit(),
        ),
    )(a, w_mat, b_row)
    return y[:M] if Mp > M else y


# ---------------------------------------------------------------------------
# Kernel 2: fused fc(3136->512) + LeakyReLU(0.01) + head(512->A)
# Full-K blocks: the (tm, 512) hidden activation never leaves VMEM and the
# head matmul rides in the same kernel invocation (no extra launch / HBM trip).
# ---------------------------------------------------------------------------
def _fc_head_kernel(x_ref, wfc_ref, bfc_ref, wh_ref, bh_ref, q_ref):
    h = jnp.dot(x_ref[...], wfc_ref[...], preferred_element_type=jnp.float32)
    h = h + bfc_ref[...]
    h = jnp.where(h >= 0.0, h, 0.01 * h)            # LeakyReLU(0.01)
    q = jnp.dot(h.astype(wh_ref.dtype), wh_ref[...],
                preferred_element_type=jnp.float32)
    q_ref[...] = (q + bh_ref[...]).astype(q_ref.dtype)


def fc_head(x, wfc, bfc, wh, bh):
    M, K = x.shape
    Kw, H = wfc.shape
    assert K == Kw and wh.shape[0] == H, (K, Kw, H, wh.shape)
    Ap = wh.shape[1]

    tm, Mp = _pick_m_tile(M)
    if Mp > M:
        x = jnp.pad(x, ((0, Mp - M), (0, 0)))

    q = pl.pallas_call(
        _fc_head_kernel,
        out_shape=jax.ShapeDtypeStruct((Mp, Ap), jnp.float32),
        grid_spec=pltpu.PrefetchScalarGridSpec(
            num_scalar_prefetch=0,
            grid=(Mp // tm,),
            in_specs=[
                pl.BlockSpec((tm, K), lambda i: (i, 0)),
                pl.BlockSpec((K, H), lambda i: (0, 0)),
                pl.BlockSpec((1, H), lambda i: (0, 0)),
                pl.BlockSpec((H, Ap), lambda i: (0, 0)),
                pl.BlockSpec((1, Ap), lambda i: (0, 0)),
            ],
            out_specs=pl.BlockSpec((tm, Ap), lambda i: (i, 0)),
        ),
        compiler_params=pltpu.CompilerParams(
            dimension_semantics=("parallel",),
            vmem_limit_bytes=_vmem_limit(),
        ),
    )(x, wfc, bfc, wh, bh)
    return q[:M]


# ---------------------------------------------------------------------------
# JAX glue: channels-last im2col (no transposes) + conv wrapper
# ---------------------------------------------------------------------------
def _im2col_nhwc(x, kh, kw, stride):
    # x: (B, H, W, C) -> (B*oh*ow, kh*kw*C), column order (di, dj, c)
    B, H, W, C = x.shape
    oh = (H - kh) // stride + 1
    ow = (W - kw) // stride + 1
    slabs = []
    for di in range(kh):
        for dj in range(kw):
            slabs.append(x[:, di:di + stride * oh:stride,
                           dj:dj + stride * ow:stride, :])
    patches = jnp.concatenate(slabs, axis=-1)          # (B, oh, ow, kh*kw*C)
    return patches.reshape(B * oh * ow, kh * kw * C), oh, ow


def conv2d_relu(x, w_mat, b_row, kh, kw, stride):
    # x: (B, H, W, C) bf16 channels-last; w_mat: (kh*kw*C, out_c) bf16
    B = x.shape[0]
    a, oh, ow = _im2col_nhwc(x, kh, kw, stride)        # (M, K) bf16
    y = _conv_matmul(a, w_mat, b_row)                  # (M, out_c) bf16
    return y.reshape(B, oh, ow, w_mat.shape[1])        # stay channels-last


# ---------------------------------------------------------------------------
# DQN forward (matches torch: relu(conv1..3) -> flatten -> lrelu(fc) -> head)
# ---------------------------------------------------------------------------
def dqn_forward(params, x, *, num_actions):
    # One-time NCHW -> NHWC + bf16 cast; everything downstream stays
    # channels-last, so there are no per-layer layout round-trips.
    x = jnp.transpose(x, (0, 2, 3, 1)).astype(jnp.bfloat16)
    x = conv2d_relu(x, params["w1"], params["b1"], 8, 8, 4)   # (B,20,20,32)
    x = conv2d_relu(x, params["w2"], params["b2"], 4, 4, 2)   # (B, 9, 9,64)
    x = conv2d_relu(x, params["w3"], params["b3"], 3, 3, 1)   # (B, 7, 7,64)
    B = x.shape[0]
    x = x.reshape(B, -1)            # (B, 3136) in (h, w, c) order; wfc rows
                                    # were permuted once to match this order.
    q = fc_head(x, params["wfc"], params["bfc"],
                params["whead"], params["bhead"])              # (B, 128)
    return q[:, :num_actions]


# ---------------------------------------------------------------------------
# Params: torch-layout init + one-time conversion to kernel-friendly layout
# ---------------------------------------------------------------------------
def init_params(key, channels, num_actions):
    ks = jax.random.split(key, 10)

    def u(k, shape, fan_in):
        bound = 1.0 / jnp.sqrt(float(fan_in))
        return jax.random.uniform(k, shape, jnp.float32, -bound, bound)

    return {
        "w1": u(ks[0], (32, channels, 8, 8), channels * 8 * 8),
        "b1": u(ks[1], (32,), channels * 8 * 8),
        "w2": u(ks[2], (64, 32, 4, 4), 32 * 4 * 4),
        "b2": u(ks[3], (64,), 32 * 4 * 4),
        "w3": u(ks[4], (64, 64, 3, 3), 64 * 3 * 3),
        "b3": u(ks[5], (64,), 64 * 3 * 3),
        # fc / head stored as (in_features, out_features)
        "wfc": u(ks[6], (3136, 512), 3136),
        "bfc": u(ks[7], (512,), 3136),
        "whead": u(ks[8], (512, num_actions), 512),
        "bhead": u(ks[9], (num_actions,), 512),
    }


def prepare_params(p):
    """One-time layout conversion: conv weights (kh*kw*C, out_c) bf16 matching
    the channels-last patch column order, wfc rows permuted from the torch
    (c,h,w) flatten order to our (h,w,c) order, head weight padded to 128
    lanes.  No per-forward reshapes/pads/casts of weights remain."""
    def conv_w(w):
        O, C, kh, kw = w.shape
        return jnp.transpose(w, (2, 3, 1, 0)).reshape(kh * kw * C, O).astype(jnp.bfloat16)

    def row_bias(b):
        return b.reshape(1, -1).astype(jnp.float32)

    A = p["whead"].shape[1]
    Ap = _round_up(A, 128)
    # torch flatten of NCHW conv3 output is (c, h, w); our flatten is (h, w, c).
    wfc = p["wfc"].reshape(64, 7, 7, 512).transpose(1, 2, 0, 3).reshape(3136, 512)

    return {
        "w1": conv_w(p["w1"]), "b1": row_bias(p["b1"]),
        "w2": conv_w(p["w2"]), "b2": row_bias(p["b2"]),
        "w3": conv_w(p["w3"]), "b3": row_bias(p["b3"]),
        "wfc": wfc.astype(jnp.bfloat16),
        "bfc": row_bias(p["bfc"]),
        "whead": jnp.pad(p["whead"], ((0, 0), (0, Ap - A))).astype(jnp.bfloat16),
        "bhead": jnp.pad(row_bias(p["bhead"]), ((0, 0), (0, Ap - A))),
    }


# ---------------------------------------------------------------------------
# Pure-JAX f32 reference (for a loose correctness check)
# ---------------------------------------------------------------------------
def dqn_reference(p, x):
    def conv(x, w, b, stride):
        y = jax.lax.conv_general_dilated(
            x, w, window_strides=(stride, stride), padding="VALID",
            dimension_numbers=("NCHW", "OIHW", "NCHW"))
        return jnp.maximum(y + b.reshape(1, -1, 1, 1), 0.0)

    x = conv(x, p["w1"], p["b1"], 4)
    x = conv(x, p["w2"], p["b2"], 2)
    x = conv(x, p["w3"], p["b3"], 1)
    B = x.shape[0]
    h = x.reshape(B, -1) @ p["wfc"] + p["bfc"]
    h = jnp.where(h >= 0.0, h, 0.01 * h)
    return h @ p["whead"] + p["bhead"]


if __name__ == "__main__":
    # fc hard-codes 3136 = 64*7*7 input features -> 84x84 input (Atari DQN).
    B, channels, H, W = 2, 4, 84, 84
    num_actions = 4

    key = jax.random.PRNGKey(0)
    kx, kp = jax.random.split(key)
    x = jax.random.normal(kx, (B, channels, H, W), dtype=jnp.float32)
    params = init_params(kp, channels, num_actions)
    kparams = prepare_params(params)

    fwd = jax.jit(functools.partial(dqn_forward, num_actions=num_actions))
    q = jax.block_until_ready(fwd(kparams, x))

    assert q.shape == (B, num_actions), q.shape
    assert bool(jnp.all(jnp.isfinite(q)))

    # Loose check vs f32 reference (kernels use bf16 operands, f32 accumulate).
    q_ref = dqn_reference(params, x)
    err = float(jnp.max(jnp.abs(q - q_ref)))
    scale = float(jnp.max(jnp.abs(q_ref)))
    assert err <= 0.05 * scale + 0.05, (err, scale)

    print("KERNEL_OK")
</pallas_src>

<mosaic_0001>
module attributes {stable_mosaic.version = 11 : i64} {
  func.func @_conv_mm_relu_kernel(%arg0: i32, %arg1: memref<400x256xbf16, #tpu.memory_space<vmem>>, %arg2: memref<256x32xbf16, #tpu.memory_space<vmem>>, %arg3: memref<1x32xf32, #tpu.memory_space<vmem>>, %arg4: memref<400x32xbf16, #tpu.memory_space<vmem>>) attributes {dimension_semantics = [#tpu.dimension_semantics<parallel>], iteration_bounds = array<i64: 2>, scalar_prefetch = 0 : i64, scratch_operands = 0 : i64, tpu.core_type = #tpu.core_type<tc>, window_params = [{transform_indices = @transform_0, window_bounds = array<i64: 400, 256>}, {pipeline_mode = #tpu.pipeline_mode<synchronous>, transform_indices = @transform_1, window_bounds = array<i64: 256, 32>}, {pipeline_mode = #tpu.pipeline_mode<synchronous>, transform_indices = @transform_2, window_bounds = array<i64: 1, 32>}, {transform_indices = @transform_3, window_bounds = array<i64: 400, 32>}]} {
    %c0 = arith.constant 0 : index
    %c0_0 = arith.constant 0 : index
    %0 = vector.load %arg1[%c0, %c0_0] : memref<400x256xbf16, #tpu.memory_space<vmem>>, vector<400x256xbf16>
    %c0_1 = arith.constant 0 : index
    %c0_2 = arith.constant 0 : index
    %1 = vector.load %arg2[%c0_1, %c0_2] : memref<256x32xbf16, #tpu.memory_space<vmem>>, vector<256x32xbf16>
    %cst = arith.constant dense<0.000000e+00> : vector<400x32xf32>
    %2 = tpu.matmul %0, %1, %cst {dimension_numbers = #tpu.dot_dimension_numbers<[1], [0], [0], [1], [0, 0, 1, 1], [], []>} : vector<400x256xbf16>, vector<256x32xbf16>, vector<400x32xf32> -> vector<400x32xf32>
    %c0_3 = arith.constant 0 : index
    %c0_4 = arith.constant 0 : index
    %3 = vector.load %arg3[%c0_3, %c0_4] : memref<1x32xf32, #tpu.memory_space<vmem>>, vector<1x32xf32>
    %4 = vector.broadcast %3 : vector<1x32xf32> to vector<400x32xf32>
    %5 = arith.addf %2, %4 : vector<400x32xf32>
    %cst_5 = arith.constant 0.000000e+00 : f32
    %6 = vector.broadcast %cst_5 : f32 to vector<400x32xf32>
    %7 = arith.maximumf %5, %6 : vector<400x32xf32>
    %8 = arith.truncf %7 : vector<400x32xf32> to vector<400x32xbf16>
    %c0_6 = arith.constant 0 : index
    %c0_7 = arith.constant 0 : index
    %9 = vector.load %arg4[%c0_6, %c0_7] : memref<400x32xbf16, #tpu.memory_space<vmem>>, vector<400x32xbf16>
    tpu.vector_store %arg4[%c0_6, %c0_7], %8 {strides = array<i32>} : memref<400x32xbf16, #tpu.memory_space<vmem>>, vector<400x32xbf16>,
    return
  }
  func.func @transform_0(%arg0: i32) -> (i32, i32) {
    %c0_i32 = arith.constant 0 : i32
    %c0_i32_0 = arith.constant 0 : i32
    return %arg0, %c0_i32 : i32, i32
  }
  func.func @transform_1(%arg0: i32) -> (i32, i32) {
    %c0_i32 = arith.constant 0 : i32
    %c0_i32_0 = arith.constant 0 : i32
    %c0_i32_1 = arith.constant 0 : i32
    return %c0_i32, %c0_i32_0 : i32, i32
  }
  func.func @transform_2(%arg0: i32) -> (i32, i32) {
    %c0_i32 = arith.constant 0 : i32
    %c0_i32_0 = arith.constant 0 : i32
    %c0_i32_1 = arith.constant 0 : i32
    return %c0_i32, %c0_i32_0 : i32, i32
  }
  func.func @transform_3(%arg0: i32) -> (i32, i32) {
    %c0_i32 = arith.constant 0 : i32
    %c0_i32_0 = arith.constant 0 : i32
    return %arg0, %c0_i32 : i32, i32
  }
}

module attributes {stable_mosaic.version = 11 : i64} {
  func.func @_conv_mm_relu_kernel(%arg0: i32, %arg1: memref<88x512xbf16, #tpu.memory_space<vmem>>, %arg2: memref<512x64xbf16, #tpu.memory_space<vmem>>, %arg3: memref<1x64xf32, #tpu.memory_space<vmem>>, %arg4: memref<88x64xbf16, #tpu.memory_space<vmem>>) attributes {dimension_semantics = [#tpu.dimension_semantics<parallel>], iteration_bounds = array<i64: 2>, scalar_prefetch = 0 : i64, scratch_operands = 0 : i64, tpu.core_type = #tpu.core_type<tc>, window_params = [{transform_indices = @transform_0, window_bounds = array<i64: 88, 512>}, {pipeline_mode = #tpu.pipeline_mode<synchronous>, transform_indices = @transform_1, window_bounds = array<i64: 512, 64>}, {pipeline_mode = #tpu.pipeline_mode<synchronous>, transform_indices = @transform_2, window_bounds = array<i64: 1, 64>}, {transform_indices = @transform_3, window_bounds = array<i64: 88, 64>}]} {
    %c0 = arith.constant 0 : index
    %c0_0 = arith.constant 0 : index
    %0 = vector.load %arg1[%c0, %c0_0] : memref<88x512xbf16, #tpu.memory_space<vmem>>, vector<88x512xbf16>
    %c0_1 = arith.constant 0 : index
    %c0_2 = arith.constant 0 : index
    %1 = vector.load %arg2[%c0_1, %c0_2] : memref<512x64xbf16, #tpu.memory_space<vmem>>, vector<512x64xbf16>
    %cst = arith.constant dense<0.000000e+00> : vector<88x64xf32>
    %2 = tpu.matmul %0, %1, %cst {dimension_numbers = #tpu.dot_dimension_numbers<[1], [0], [0], [1], [0, 0, 1, 1], [], []>} : vector<88x512xbf16>, vector<512x64xbf16>, vector<88x64xf32> -> vector<88x64xf32>
    %c0_3 = arith.constant 0 : index
    %c0_4 = arith.constant 0 : index
    %3 = vector.load %arg3[%c0_3, %c0_4] : memref<1x64xf32, #tpu.memory_space<vmem>>, vector<1x64xf32>
    %4 = vector.broadcast %3 : vector<1x64xf32> to vector<88x64xf32>
    %5 = arith.addf %2, %4 : vector<88x64xf32>
    %cst_5 = arith.constant 0.000000e+00 : f32
    %6 = vector.broadcast %cst_5 : f32 to vector<88x64xf32>
    %7 = arith.maximumf %5, %6 : vector<88x64xf32>
    %8 = arith.truncf %7 : vector<88x64xf32> to vector<88x64xbf16>
    %c0_6 = arith.constant 0 : index
    %c0_7 = arith.constant 0 : index
    %9 = vector.load %arg4[%c0_6, %c0_7] : memref<88x64xbf16, #tpu.memory_space<vmem>>, vector<88x64xbf16>
    tpu.vector_store %arg4[%c0_6, %c0_7], %8 {strides = array<i32>} : memref<88x64xbf16, #tpu.memory_space<vmem>>, vector<88x64xbf16>,
    return
  }
  func.func @transform_0(%arg0: i32) -> (i32, i32) {
    %c0_i32 = arith.constant 0 : i32
    %c0_i32_0 = arith.constant 0 : i32
    return %arg0, %c0_i32 : i32, i32
  }
  func.func @transform_1(%arg0: i32) -> (i32, i32) {
    %c0_i32 = arith.constant 0 : i32
    %c0_i32_0 = arith.constant 0 : i32
    %c0_i32_1 = arith.constant 0 : i32
    return %c0_i32, %c0_i32_0 : i32, i32
  }
  func.func @transform_2(%arg0: i32) -> (i32, i32) {
    %c0_i32 = arith.constant 0 : i32
    %c0_i32_0 = arith.constant 0 : i32
    %c0_i32_1 = arith.constant 0 : i32
    return %c0_i32, %c0_i32_0 : i32, i32
  }
  func.func @transform_3(%arg0: i32) -> (i32, i32) {
    %c0_i32 = arith.constant 0 : i32
    %c0_i32_0 = arith.constant 0 : i32
    return %arg0, %c0_i32 : i32, i32
  }
}

module attributes {stable_mosaic.version = 11 : i64} {
  func.func @_conv_mm_relu_kernel(%arg0: i32, %arg1: memref<56x576xbf16, #tpu.memory_space<vmem>>, %arg2: memref<576x64xbf16, #tpu.memory_space<vmem>>, %arg3: memref<1x64xf32, #tpu.memory_space<vmem>>, %arg4: memref<56x64xbf16, #tpu.memory_space<vmem>>) attributes {dimension_semantics = [#tpu.dimension_semantics<parallel>], iteration_bounds = array<i64: 2>, scalar_prefetch = 0 : i64, scratch_operands = 0 : i64, tpu.core_type = #tpu.core_type<tc>, window_params = [{transform_indices = @transform_0, window_bounds = array<i64: 56, 576>}, {pipeline_mode = #tpu.pipeline_mode<synchronous>, transform_indices = @transform_1, window_bounds = array<i64: 576, 64>}, {pipeline_mode = #tpu.pipeline_mode<synchronous>, transform_indices = @transform_2, window_bounds = array<i64: 1, 64>}, {transform_indices = @transform_3, window_bounds = array<i64: 56, 64>}]} {
    %c0 = arith.constant 0 : index
    %c0_0 = arith.constant 0 : index
    %0 = vector.load %arg1[%c0, %c0_0] : memref<56x576xbf16, #tpu.memory_space<vmem>>, vector<56x576xbf16>
    %c0_1 = arith.constant 0 : index
    %c0_2 = arith.constant 0 : index
    %1 = vector.load %arg2[%c0_1, %c0_2] : memref<576x64xbf16, #tpu.memory_space<vmem>>, vector<576x64xbf16>
    %cst = arith.constant dense<0.000000e+00> : vector<56x64xf32>
    %2 = tpu.matmul %0, %1, %cst {dimension_numbers = #tpu.dot_dimension_numbers<[1], [0], [0], [1], [0, 0, 1, 1], [], []>} : vector<56x576xbf16>, vector<576x64xbf16>, vector<56x64xf32> -> vector<56x64xf32>
    %c0_3 = arith.constant 0 : index
    %c0_4 = arith.constant 0 : index
    %3 = vector.load %arg3[%c0_3, %c0_4] : memref<1x64xf32, #tpu.memory_space<vmem>>, vector<1x64xf32>
    %4 = vector.broadcast %3 : vector<1x64xf32> to vector<56x64xf32>
    %5 = arith.addf %2, %4 : vector<56x64xf32>
    %cst_5 = arith.constant 0.000000e+00 : f32
    %6 = vector.broadcast %cst_5 : f32 to vector<56x64xf32>
    %7 = arith.maximumf %5, %6 : vector<56x64xf32>
    %8 = arith.truncf %7 : vector<56x64xf32> to vector<56x64xbf16>
    %c0_6 = arith.constant 0 : index
    %c0_7 = arith.constant 0 : index
    %9 = vector.load %arg4[%c0_6, %c0_7] : memref<56x64xbf16, #tpu.memory_space<vmem>>, vector<56x64xbf16>
    tpu.vector_store %arg4[%c0_6, %c0_7], %8 {strides = array<i32>} : memref<56x64xbf16, #tpu.memory_space<vmem>>, vector<56x64xbf16>,
    return
  }
  func.func @transform_0(%arg0: i32) -> (i32, i32) {
    %c0_i32 = arith.constant 0 : i32
    %c0_i32_0 = arith.constant 0 : i32
    return %arg0, %c0_i32 : i32, i32
  }
  func.func @transform_1(%arg0: i32) -> (i32, i32) {
    %c0_i32 = arith.constant 0 : i32
    %c0_i32_0 = arith.constant 0 : i32
    %c0_i32_1 = arith.constant 0 : i32
    return %c0_i32, %c0_i32_0 : i32, i32
  }
  func.func @transform_2(%arg0: i32) -> (i32, i32) {
    %c0_i32 = arith.constant 0 : i32
    %c0_i32_0 = arith.constant 0 : i32
    %c0_i32_1 = arith.constant 0 : i32
    return %c0_i32, %c0_i32_0 : i32, i32
  }
  func.func @transform_3(%arg0: i32) -> (i32, i32) {
    %c0_i32 = arith.constant 0 : i32
    %c0_i32_0 = arith.constant 0 : i32
    return %arg0, %c0_i32 : i32, i32
  }
}

module attributes {stable_mosaic.version = 11 : i64} {
  func.func @_fc_head_kernel(%arg0: i32, %arg1: memref<8x3136xbf16, #tpu.memory_space<vmem>>, %arg2: memref<3136x512xbf16, #tpu.memory_space<vmem>>, %arg3: memref<1x512xf32, #tpu.memory_space<vmem>>, %arg4: memref<512x128xbf16, #tpu.memory_space<vmem>>, %arg5: memref<1x128xf32, #tpu.memory_space<vmem>>, %arg6: memref<8x128xf32, #tpu.memory_space<vmem>>) attributes {dimension_semantics = [#tpu.dimension_semantics<parallel>], iteration_bounds = array<i64: 1>, scalar_prefetch = 0 : i64, scratch_operands = 0 : i64, tpu.core_type = #tpu.core_type<tc>, window_params = [{transform_indices = @transform_0, window_bounds = array<i64: 8, 3136>}, {pipeline_mode = #tpu.pipeline_mode<synchronous>, transform_indices = @transform_1, window_bounds = array<i64: 3136, 512>}, {pipeline_mode = #tpu.pipeline_mode<synchronous>, transform_indices = @transform_2, window_bounds = array<i64: 1, 512>}, {pipeline_mode = #tpu.pipeline_mode<synchronous>, transform_indices = @transform_3, window_bounds = array<i64: 512, 128>}, {pipeline_mode = #tpu.pipeline_mode<synchronous>, transform_indices = @transform_4, window_bounds = array<i64: 1, 128>}, {transform_indices = @transform_5, window_bounds = array<i64: 8, 128>}]} {
    %c0 = arith.constant 0 : index
    %c0_0 = arith.constant 0 : index
    %0 = vector.load %arg1[%c0, %c0_0] : memref<8x3136xbf16, #tpu.memory_space<vmem>>, vector<8x3136xbf16>
    %c0_1 = arith.constant 0 : index
    %c0_2 = arith.constant 0 : index
    %1 = vector.load %arg2[%c0_1, %c0_2] : memref<3136x512xbf16, #tpu.memory_space<vmem>>, vector<3136x512xbf16>
    %cst = arith.constant dense<0.000000e+00> : vector<8x512xf32>
    %2 = tpu.matmul %0, %1, %cst {dimension_numbers = #tpu.dot_dimension_numbers<[1], [0], [0], [1], [0, 0, 1, 1], [], []>} : vector<8x3136xbf16>, vector<3136x512xbf16>, vector<8x512xf32> -> vector<8x512xf32>
    %c0_3 = arith.constant 0 : index
    %c0_4 = arith.constant 0 : index
    %3 = vector.load %arg3[%c0_3, %c0_4] : memref<1x512xf32, #tpu.memory_space<vmem>>, vector<1x512xf32>
    %4 = vector.broadcast %3 : vector<1x512xf32> to vector<8x512xf32>
    %5 = arith.addf %2, %4 : vector<8x512xf32>
    %cst_5 = arith.constant 0.000000e+00 : f32
    %6 = vector.broadcast %cst_5 : f32 to vector<8x512xf32>
    %7 = arith.cmpf oge, %5, %6 : vector<8x512xf32>
    %cst_6 = arith.constant 0.00999999977 : f32
    %8 = vector.broadcast %cst_6 : f32 to vector<8x512xf32>
    %9 = arith.mulf %8, %5 : vector<8x512xf32>
    %10 = arith.select %7, %5, %9 : vector<8x512xi1>, vector<8x512xf32>
    %11 = arith.truncf %10 : vector<8x512xf32> to vector<8x512xbf16>
    %c0_7 = arith.constant 0 : index
    %c0_8 = arith.constant 0 : index
    %12 = vector.load %arg4[%c0_7, %c0_8] : memref<512x128xbf16, #tpu.memory_space<vmem>>, vector<512x128xbf16>
    %cst_9 = arith.constant dense<0.000000e+00> : vector<8x128xf32>
    %13 = tpu.matmul %11, %12, %cst_9 {dimension_numbers = #tpu.dot_dimension_numbers<[1], [0], [0], [1], [0, 0, 1, 1], [], []>} : vector<8x512xbf16>, vector<512x128xbf16>, vector<8x128xf32> -> vector<8x128xf32>
    %c0_10 = arith.constant 0 : index
    %c0_11 = arith.constant 0 : index
    %14 = vector.load %arg5[%c0_10, %c0_11] : memref<1x128xf32, #tpu.memory_space<vmem>>, vector<1x128xf32>
    %15 = vector.broadcast %14 : vector<1x128xf32> to vector<8x128xf32>
    %16 = arith.addf %13, %15 : vector<8x128xf32>
    %c0_12 = arith.constant 0 : index
    %c0_13 = arith.constant 0 : index
    %17 = vector.load %arg6[%c0_12, %c0_13] : memref<8x128xf32, #tpu.memory_space<vmem>>, vector<8x128xf32>
    tpu.vector_store %arg6[%c0_12, %c0_13], %16 {strides = array<i32>} : memref<8x128xf32, #tpu.memory_space<vmem>>, vector<8x128xf32>,
    return
  }
  func.func @transform_0(%arg0: i32) -> (i32, i32) {
    %c0_i32 = arith.constant 0 : i32
    %c0_i32_0 = arith.constant 0 : i32
    return %arg0, %c0_i32 : i32, i32
  }
  func.func @transform_1(%arg0: i32) -> (i32, i32) {
    %c0_i32 = arith.constant 0 : i32
    %c0_i32_0 = arith.constant 0 : i32
    %c0_i32_1 = arith.constant 0 : i32
    return %c0_i32, %c0_i32_0 : i32, i32
  }
  func.func @transform_2(%arg0: i32) -> (i32, i32) {
    %c0_i32 = arith.constant 0 : i32
    %c0_i32_0 = arith.constant 0 : i32
    %c0_i32_1 = arith.constant 0 : i32
    return %c0_i32, %c0_i32_0 : i32, i32
  }
  func.func @transform_3(%arg0: i32) -> (i32, i32) {
    %c0_i32 = arith.constant 0 : i32
    %c0_i32_0 = arith.constant 0 : i32
    %c0_i32_1 = arith.constant 0 : i32
    return %c0_i32, %c0_i32_0 : i32, i32
  }
  func.func @transform_4(%arg0: i32) -> (i32, i32) {
    %c0_i32 = arith.constant 0 : i32
    %c0_i32_0 = arith.constant 0 : i32
    %c0_i32_1 = arith.constant 0 : i32
    return %c0_i32, %c0_i32_0 : i32, i32
  }
  func.func @transform_5(%arg0: i32) -> (i32, i32) {
    %c0_i32 = arith.constant 0 : i32
    %c0_i32_0 = arith.constant 0 : i32
    return %arg0, %c0_i32 : i32, i32
  }
}

</mosaic_0001>

<bundles_post_ra>
// kernel: dqn_forward.4
= control target key start
LH: loop header
LB: loop body
LE: loop exit
PB: predicated region body
PF: predicated region fallthrough
CT: control target
= control target key end

     0   :  { %s1542_s12 = smov 0   ;;  %s1852_s0 = inlined_call_operand.vmem [shape: bf16[800,256], index: 0, kind: input, shape index: {}]   ;;  %s1853_s1 = inlined_call_operand.vmem [shape: bf16[256,32], index: 1, kind: input, shape index: {}]   ;;  %s1854_s2 = inlined_call_operand.vmem [shape: f32[1,32], index: 2, kind: input, shape index: {}]   ;;  %s1855_s3 = inlined_call_operand.vmem [shape: bf16[800,32], index: 3, kind: output, shape index: {}]  }
   0x1 LB: > { %s1203_s13 = sadd.s32 4294967295, %s1519_s12   ;;  %p1207_p0 = scmp.ge.s32.totalorder %s1519_s12, 1  ;;  %s1519_s12 = sphi %s1542_s12, %s13_s12  }
   0x2   : > { %p139_p1 = scmp.lt.s32.totalorder %s1519_s12, 3 }
   0x4   : > { %p140_p2 = pnand %p1207_p0, %p139_p1 }
   0x5   : > { %s164_s16 = smul.u32 (!%p140_p2), 50, %s1203_s13 }
   0x6   : > { %143 = sbr.rel (%p140_p2) target bundleno = 376 (0x178), region = 32 }
   0x7   : > { %p165_p3 = scmp.lt.s32.totalorder (!%p140_p2), %s164_s16, 99 }
   0xb   : > { %v1422_v0 = vld [vmem:[%s1853_s1 + $0x38] sm:$0xff]   ;;  %v1521_v1 = vmov 0   ;;  %v1423_v2 = vld [vmem:[%s1853_s1 + $0x30] sm:$0xff]   ;;  %v1424_v3 = vld [vmem:[%s1853_s1 + $0x28] sm:$0xff]   ;;  %s1857_s16 = smov (!%p165_p3, %s164_s16), 99  ;;  %vm1096_vm0 = vcmask 257024  }
   0xc   : > { %613 = vmatprep.subr.bf16.mxu0 %v1521_v1  ;;  %1381 = vmatprep.subr.bf16.mxu1 %v1521_v1  ;;  %v1425_v4 = vld [vmem:[%s1853_s1 + $0x20] sm:$0xff]   ;;  %s1330_s23 = sshll.u32 %s1857_s16, 3  ;;  %v1426_v5 = vld [vmem:[%s1853_s1 + $0x18] sm:$0xff]   ;;  %v1427_v7 = vld [vmem:[%s1853_s1 + $0x10] sm:$0xff]   ;;  %s1210_s29 = sshll.u32 %s1857_s16, 2 }
   0xd   : > { %614 = vmatpush1.bf16.msra.mxu0 %v1422_v0  ;;  %1397 = vmatpush1.bf16.msra.mxu1 %v1422_v0  ;;  %s1579_s28 = scalar_lea.vmem %s1852_s0, %s1330_s23  ;;  %v1428_v9 = vld [vmem:[%s1853_s1 + $0x8] sm:$0xff]   ;;  %v1429_v10 = vld [vmem:[%s1853_s1] sm:$0xff]   ;;  %v1430_v11 = vld [vmem:[%s1853_s1 + $0x78] sm:$0xff]  }
   0xe   : > { %615 = vmatprep.subr.bf16.mxu0 %v1521_v1  ;;  %1382 = vmatprep.subr.bf16.mxu1 %v1521_v1  ;;  %v1440_v6 = vld [vmem:[%s1579_s28 + $0x4] ss:$8 sps:$4 sm:$0xff]   ;;  %v1443_v8 = vld [vmem:[%s1579_s28 + $0xd4] ss:$8 sps:$4 sm:$0xff]   ;;  %v1438_v19 = vld [vmem:[%s1579_s28] ss:$8 sps:$4 sm:$0xff]  }
   0xf   : > { %645 = vmatprep.mubr.bf16.mxu0 %v1440_v6  ;;  %749 = vmatprep.mubr.bf16.mxu1 %v1443_v8  ;;  %v1431_v12 = vld [vmem:[%s1853_s1 + $0x70] sm:$0xff]   ;;  %v1432_v13 = vld [vmem:[%s1853_s1 + $0x68] sm:$0xff]   ;;  %v1433_v14 = vld [vmem:[%s1853_s1 + $0x60] sm:$0xff]  }
  0x10   : > { %v1434_v15 = vld [vmem:[%s1853_s1 + $0x58] sm:$0xff]   ;;  %v1435_v16 = vld [vmem:[%s1853_s1 + $0x50] sm:$0xff]   ;;  %v1436_v17 = vld [vmem:[%s1853_s1 + $0x48] sm:$0xff]  }
  0x11   : > { %616 = vmatpush1.bf16.msra.mxu0 %v1423_v2  ;;  %1398 = vmatpush1.bf16.msra.mxu1 %v1423_v2  ;;  %v1437_v18 = vld [vmem:[%s1853_s1 + $0x40] sm:$0xff]   ;;  %v1441_v20 = vld [vmem:[%s1579_s28 + $0xd0] ss:$8 sps:$4 sm:$0xff]   ;;  %v1444_v21 = vld [vmem:[%s1579_s28 + $0x14] ss:$8 sps:$4 sm:$0xff]  }
  0x12   : > { %617 = vmatprep.subr.bf16.mxu0 %v1521_v1  ;;  %1383 = vmatprep.subr.bf16.mxu1 %v1521_v1  ;;  %v1447_v22 = vld [vmem:[%s1579_s28 + $0xe4] ss:$8 sps:$4 sm:$0xff]   ;;  %v1446_v23 = vld [vmem:[%s1579_s28 + $0x10] ss:$8 sps:$4 sm:$0xff]   ;;  %v1449_v24 = vld [vmem:[%s1579_s28 + $0xe0] ss:$8 sps:$4 sm:$0xff]  }
  0x13   : > { %v1450_v25 = vld [vmem:[%s1579_s28 + $0x24] ss:$8 sps:$4 sm:$0xff]   ;;  %v1453_v26 = vld [vmem:[%s1579_s28 + $0xf4] ss:$8 sps:$4 sm:$0xff]   ;;  %v1452_v27 = vld [vmem:[%s1579_s28 + $0x20] ss:$8 sps:$4 sm:$0xff]  }
  0x14   : > { %v1455_v28 = vld [vmem:[%s1579_s28 + $0xf0] ss:$8 sps:$4 sm:$0xff]   ;;  %v1456_v29 = vld [vmem:[%s1579_s28 + $0x34] ss:$8 sps:$4 sm:$0xff]   ;;  %v1459_v30 = vld [vmem:[%s1579_s28 + $0x104] ss:$8 sps:$4 sm:$0xff]  }
  0x15   : > { %618 = vmatpush1.bf16.msra.mxu0 %v1424_v3  ;;  %1399 = vmatpush1.bf16.msra.mxu1 %v1424_v3  ;;  %v1458_v31 = vld [vmem:[%s1579_s28 + $0x30] ss:$8 sps:$4 sm:$0xff]   ;;  %v1461_v32 = vld [vmem:[%s1579_s28 + $0x100] ss:$8 sps:$4 sm:$0xff]   ;;  %v1462_v33 = vld [vmem:[%s1579_s28 + $0x44] ss:$8 sps:$4 sm:$0xff]  }
  0x16   : > { %619 = vmatprep.subr.bf16.mxu0 %v1521_v1  ;;  %1384 = vmatprep.subr.bf16.mxu1 %v1521_v1  ;;  %v1465_v34 = vld [vmem:[%s1579_s28 + $0x114] ss:$8 sps:$4 sm:$0xff]   ;;  %v1464_v35 = vld [vmem:[%s1579_s28 + $0x40] ss:$8 sps:$4 sm:$0xff]   ;;  %v1467_v36 = vld [vmem:[%s1579_s28 + $0x110] ss:$8 sps:$4 sm:$0xff]  }
  0x17   : > { %v1468_v37 = vld [vmem:[%s1579_s28 + $0x54] ss:$8 sps:$4 sm:$0xff]   ;;  %v1471_v38 = vld [vmem:[%s1579_s28 + $0x124] ss:$8 sps:$4 sm:$0xff]   ;;  %v1470_v39 = vld [vmem:[%s1579_s28 + $0x50] ss:$8 sps:$4 sm:$0xff]  }
  0x18   : > { %v1473_v40 = vld [vmem:[%s1579_s28 + $0x120] ss:$8 sps:$4 sm:$0xff]   ;;  %v1474_v41 = vld [vmem:[%s1579_s28 + $0x64] ss:$8 sps:$4 sm:$0xff]   ;;  %v1477_v42 = vld [vmem:[%s1579_s28 + $0x134] ss:$8 sps:$4 sm:$0xff]  }
  0x19   : > { %620 = vmatpush1.bf16.msra.mxu0 %v1425_v4  ;;  %1400 = vmatpush1.bf16.msra.mxu1 %v1425_v4  ;;  %v1476_v43 = vld [vmem:[%s1579_s28 + $0x60] ss:$8 sps:$4 sm:$0xff]   ;;  %v1479_v44 = vld [vmem:[%s1579_s28 + $0x130] ss:$8 sps:$4 sm:$0xff]   ;;  %v1480_v45 = vld [vmem:[%s1579_s28 + $0x74] ss:$8 sps:$4 sm:$0xff]  }
  0x1a   : > { %621 = vmatprep.subr.bf16.mxu0 %v1521_v1  ;;  %1385 = vmatprep.subr.bf16.mxu1 %v1521_v1  ;;  %v1483_v46 = vld [vmem:[%s1579_s28 + $0x144] ss:$8 sps:$4 sm:$0xff]   ;;  %v1482_v47 = vld [vmem:[%s1579_s28 + $0x70] ss:$8 sps:$4 sm:$0xff]   ;;  %v1485_v48 = vld [vmem:[%s1579_s28 + $0x140] ss:$8 sps:$4 sm:$0xff]  }
  0x1b   : > { %v1486_v49 = vld [vmem:[%s1579_s28 + $0x84] ss:$8 sps:$4 sm:$0xff]   ;;  %v1489_v50 = vld [vmem:[%s1579_s28 + $0x154] ss:$8 sps:$4 sm:$0xff]   ;;  %v1488_v51 = vld [vmem:[%s1579_s28 + $0x80] ss:$8 sps:$4 sm:$0xff]  }
  0x1c   : > { %v1491_v52 = vld [vmem:[%s1579_s28 + $0x150] ss:$8 sps:$4 sm:$0xff]   ;;  %v1492_v53 = vld [vmem:[%s1579_s28 + $0x94] ss:$8 sps:$4 sm:$0xff]   ;;  %v1495_v54 = vld [vmem:[%s1579_s28 + $0x164] ss:$8 sps:$4 sm:$0xff]  }
  0x1d   : > { %622 = vmatpush1.bf16.msra.mxu0 %v1426_v5  ;;  %1401 = vmatpush1.bf16.msra.mxu1 %v1426_v5  ;;  %v1494_v55 = vld [vmem:[%s1579_s28 + $0x90] ss:$8 sps:$4 sm:$0xff]   ;;  %v1497_v56 = vld [vmem:[%s1579_s28 + $0x160] ss:$8 sps:$4 sm:$0xff]   ;;  %v1498_v57 = vld [vmem:[%s1579_s28 + $0xa4] ss:$8 sps:$4 sm:$0xff]  }
  0x1e   : > { %623 = vmatprep.subr.bf16.mxu0 %v1521_v1  ;;  %1386 = vmatprep.subr.bf16.mxu1 %v1521_v1  ;;  %v1501_v58 = vld [vmem:[%s1579_s28 + $0x174] ss:$8 sps:$4 sm:$0xff]   ;;  %v1500_v59 = vld [vmem:[%s1579_s28 + $0xa0] ss:$8 sps:$4 sm:$0xff]   ;;  %v1503_v60 = vld [vmem:[%s1579_s28 + $0x170] ss:$8 sps:$4 sm:$0xff]  }
  0x1f   : > { %v1504_v61 = vld [vmem:[%s1579_s28 + $0xb4] ss:$8 sps:$4 sm:$0xff]   ;;  %v1507_v62 = vld [vmem:[%s1579_s28 + $0x184] ss:$8 sps:$4 sm:$0xff]   ;;  %v1506_v63 = vld [vmem:[%s1579_s28 + $0xb0] ss:$8 sps:$4 sm:$0xff]  }
  0x20   : > { %v1509_v0 = vld [vmem:[%s1579_s28 + $0x180] ss:$8 sps:$4 sm:$0xff]  }
  0x21   : > { %624 = vmatpush1.bf16.msra.mxu0 %v1427_v7  ;;  %1402 = vmatpush1.bf16.msra.mxu1 %v1427_v7  ;;  %v1512_v2 = vld [vmem:[%s1579_s28 + $0xc0] ss:$8 sps:$4 sm:$0xff]  }
  0x22   : > { %625 = vmatprep.subr.bf16.mxu0 %v1521_v1  ;;  %1387 = vmatprep.subr.bf16.mxu1 %v1521_v1  ;;  %v1691_v3 = vld [vmem:[%s1854_s2] ss:$0 sm:$0xff] }
  0x25   : > { %626 = vmatpush1.bf16.msra.mxu0 %v1428_v9  ;;  %1403 = vmatpush1.bf16.msra.mxu1 %v1428_v9 }
  0x26   : > { %627 = vmatprep.subr.bf16.mxu0 %v1521_v1  ;;  %1388 = vmatprep.subr.bf16.mxu1 %v1521_v1 }
  0x29   : > { %628 = vmatpush1.bf16.msra.mxu0 %v1429_v10  ;;  %1404 = vmatpush1.bf16.msra.mxu1 %v1429_v10 }
  0x2a   : > { %629 = vmatprep.subr.bf16.mxu0 %v1521_v1  ;;  %1389 = vmatprep.subr.bf16.mxu1 %v1521_v1 }
  0x2d   : > { %630 = vmatpush2.bf16.msra.mxu0 %v1430_v11  ;;  %1405 = vmatpush2.bf16.msra.mxu1 %v1430_v11 }
  0x2e   : > { %631 = vmatprep.subr.bf16.mxu0 %v1521_v1  ;;  %1390 = vmatprep.subr.bf16.mxu1 %v1521_v1 }
  0x31   : > { %632 = vmatpush2.bf16.msra.mxu0 %v1431_v12  ;;  %1406 = vmatpush2.bf16.msra.mxu1 %v1431_v12 }
  0x32   : > { %633 = vmatprep.subr.bf16.mxu0 %v1521_v1  ;;  %1391 = vmatprep.subr.bf16.mxu1 %v1521_v1 }
  0x35   : > { %634 = vmatpush2.bf16.msra.mxu0 %v1432_v13  ;;  %1407 = vmatpush2.bf16.msra.mxu1 %v1432_v13 }
  0x36   : > { %635 = vmatprep.subr.bf16.mxu0 %v1521_v1  ;;  %1392 = vmatprep.subr.bf16.mxu1 %v1521_v1 }
  0x39   : > { %636 = vmatpush2.bf16.msra.mxu0 %v1433_v14  ;;  %1408 = vmatpush2.bf16.msra.mxu1 %v1433_v14 }
  0x3a   : > { %637 = vmatprep.subr.bf16.mxu0 %v1521_v1  ;;  %1393 = vmatprep.subr.bf16.mxu1 %v1521_v1 }
  0x3d   : > { %638 = vmatpush2.bf16.msra.mxu0 %v1434_v15  ;;  %1409 = vmatpush2.bf16.msra.mxu1 %v1434_v15 }
  0x3e   : > { %639 = vmatprep.subr.bf16.mxu0 %v1521_v1  ;;  %1394 = vmatprep.subr.bf16.mxu1 %v1521_v1 }
  0x41   : > { %640 = vmatpush2.bf16.msra.mxu0 %v1435_v16  ;;  %1410 = vmatpush2.bf16.msra.mxu1 %v1435_v16 }
  0x42   : > { %641 = vmatprep.subr.bf16.mxu0 %v1521_v1  ;;  %1395 = vmatprep.subr.bf16.mxu1 %v1521_v1 }
  0x45   : > { %642 = vmatpush2.bf16.msra.mxu0 %v1436_v17  ;;  %1411 = vmatpush2.bf16.msra.mxu1 %v1436_v17 }
  0x46   : > { %643 = vmatprep.subr.bf16.mxu0 %v1521_v1  ;;  %1396 = vmatprep.subr.bf16.mxu1 %v1521_v1  ;;  %v1510_v1 = vld [vmem:[%s1579_s28 + $0xc4] ss:$8 sps:$4 sm:$0xff]   ;;  %s1699_s28 = scalar_lea.vmem %s1855_s3, %s1210_s29 }
  0x49   : > { %644 = vmatpush2.bf16.msra.mxu0 %v1437_v18  ;;  %1412 = vmatpush2.bf16.msra.mxu1 %v1437_v18 }
  0x4c   : > { %646 = vmatmul.mubr.bf16.vlgmr.msra.gmra.mxu0 %v1438_v19  ;;  %750 = vmatmul.mubr.bf16.vlgmr.msra.gmra.mxu1 %v1441_v20 }
  0x4d   : > { %653 = vmatprep.mubr.bf16.mxu0 %v1444_v21  ;;  %757 = vmatprep.mubr.bf16.mxu1 %v1447_v22 }
  0x54   : > { %654 = vmatmul.mubr.bf16.gmra.mxu0 %v1446_v23  ;;  %758 = vmatmul.mubr.bf16.gmra.mxu1 %v1449_v24 }
  0x55   : > { %661 = vmatprep.mubr.bf16.mxu0 %v1450_v25  ;;  %765 = vmatprep.mubr.bf16.mxu1 %v1453_v26 }
  0x5c   : > { %662 = vmatmul.mubr.bf16.gmra.mxu0 %v1452_v27  ;;  %766 = vmatmul.mubr.bf16.gmra.mxu1 %v1455_v28 }
  0x5d   : > { %669 = vmatprep.mubr.bf16.mxu0 %v1456_v29  ;;  %773 = vmatprep.mubr.bf16.mxu1 %v1459_v30 }
  0x64   : > { %670 = vmatmul.mubr.bf16.gmra.mxu0 %v1458_v31  ;;  %774 = vmatmul.mubr.bf16.gmra.mxu1 %v1461_v32 }
  0x65   : > { %677 = vmatprep.mubr.bf16.mxu0 %v1462_v33  ;;  %781 = vmatprep.mubr.bf16.mxu1 %v1465_v34 }
  0x6c   : > { %678 = vmatmul.mubr.bf16.gmra.mxu0 %v1464_v35  ;;  %782 = vmatmul.mubr.bf16.gmra.mxu1 %v1467_v36 }
  0x6d   : > { %685 = vmatprep.mubr.bf16.mxu0 %v1468_v37  ;;  %789 = vmatprep.mubr.bf16.mxu1 %v1471_v38 }
  0x74   : > { %686 = vmatmul.mubr.bf16.gmra.mxu0 %v1470_v39  ;;  %790 = vmatmul.mubr.bf16.gmra.mxu1 %v1473_v40 }
  0x75   : > { %693 = vmatprep.mubr.bf16.mxu0 %v1474_v41  ;;  %797 = vmatprep.mubr.bf16.mxu1 %v1477_v42 }
  0x7c   : > { %694 = vmatmul.mubr.bf16.gmra.mxu0 %v1476_v43  ;;  %798 = vmatmul.mubr.bf16.gmra.mxu1 %v1479_v44 }
  0x7d   : > { %701 = vmatprep.mubr.bf16.mxu0 %v1480_v45  ;;  %805 = vmatprep.mubr.bf16.mxu1 %v1483_v46 }
  0x84   : > { %702 = vmatmul.mubr.bf16.gmra.mxu0 %v1482_v47  ;;  %806 = vmatmul.mubr.bf16.gmra.mxu1 %v1485_v48 }
  0x85   : > { %709 = vmatprep.mubr.bf16.mxu0 %v1486_v49  ;;  %813 = vmatprep.mubr.bf16.mxu1 %v1489_v50 }
  0x8c   : > { %710 = vmatmul.mubr.bf16.gmra.mxu0 %v1488_v51  ;;  %814 = vmatmul.mubr.bf16.gmra.mxu1 %v1491_v52 }
  0x8d   : > { %717 = vmatprep.mubr.bf16.mxu0 %v1492_v53  ;;  %821 = vmatprep.mubr.bf16.mxu1 %v1495_v54 }
  0x94   : > { %718 = vmatmul.mubr.bf16.gmra.mxu0 %v1494_v55  ;;  %822 = vmatmul.mubr.bf16.gmra.mxu1 %v1497_v56 }
  0x95   : > { %725 = vmatprep.mubr.bf16.mxu0 %v1498_v57  ;;  %829 = vmatprep.mubr.bf16.mxu1 %v1501_v58 }
  0x9c   : > { %726 = vmatmul.mubr.bf16.gmra.mxu0 %v1500_v59  ;;  %830 = vmatmul.mubr.bf16.gmra.mxu1 %v1503_v60 }
  0x9d   : > { %733 = vmatprep.mubr.bf16.mxu0 %v1504_v61  ;;  %837 = vmatprep.mubr.bf16.mxu1 %v1507_v62 }
  0xa4   : > { %734 = vmatmul.mubr.bf16.gmra.mxu0 %v1506_v63  ;;  %838 = vmatmul.mubr.bf16.gmra.mxu1 %v1509_v0 }
  0xa5   : > { %741 = vmatprep.mubr.bf16.mxu0 %v1510_v1 }
  0xac   : > { %742 = vmatmul.mubr.bf16.gmra.mxu0 %v1512_v2 }
 0x10c   : > { %v647_v4 = vpop.f32.mrf.mxu0  ;;  %v751_v5 = vpop.f32.mrf.mxu1 }
 0x10d   : > { %v648_v6 = vadd.f32 %v1691_v3, %v647_v4  ;;  %v752_v7 = vadd.f32 %v1691_v3, %v751_v5 }
 0x10e   : > { %v649_v8 = vpop.f32.mrf.mxu0  ;;  %v753_v9 = vpop.f32.mrf.mxu1 }
 0x10f   : > { %v846_v10 = vmax.f32 %v648_v6, 0.0  ;;  %v872_v11 = vmax.f32 %v752_v7, 0.0 }
 0x110   : > { %v650_v12 = vpop.f32.mrf.mxu0  ;;  %v754_v13 = vpop.f32.mrf.mxu1 }
 0x111   : > { %v1331_v14 = vpack.c.bf16 %v846_v10, %v846_v10  ;;  %v1357_v15 = vpack.c.bf16 %v872_v11, %v872_v11  ;;  %v651_v16 = vadd.f32 %v1691_v3, %v650_v12  ;;  %v755_v17 = vadd.f32 %v1691_v3, %v754_v13 }
 0x112   : > { %v652_v18 = vpop.f32.mrf.mxu0  ;;  %v756_v19 = vpop.f32.mrf.mxu1 }
 0x113   : > { %1097 = vst.msk [vmem:[%s1699_s28] sm:$0xf] %vm1096_vm0, %v1331_v14  ;;  %1123 = vst.msk [vmem:[%s1699_s28 + $0x68] sm:$0xf] %vm1096_vm0, %v1357_v15  ;;  %v847_v20 = vmax.f32 %v651_v16, 0.0  ;;  %v873_v21 = vmax.f32 %v755_v17, 0.0 }
 0x114   : > { %v655_v22 = vpop.f32.mrf.mxu0  ;;  %v759_v23 = vpop.f32.mrf.mxu1 }
 0x115   : > { %v1332_v24 = vpack.c.bf16 %v847_v20, %v847_v20  ;;  %v1358_v25 = vpack.c.bf16 %v873_v21, %v873_v21  ;;  %v656_v26 = vadd.f32 %v1691_v3, %v655_v22  ;;  %v760_v27 = vadd.f32 %v1691_v3, %v759_v23 }
 0x116   : > { %v657_v28 = vpop.f32.mrf.mxu0  ;;  %v761_v29 = vpop.f32.mrf.mxu1 }
 0x117   : > { %1098 = vst.msk [vmem:[%s1699_s28 + $0x4] sm:$0xf] %vm1096_vm0, %v1332_v24  ;;  %1124 = vst.msk [vmem:[%s1699_s28 + $0x6c] sm:$0xf] %vm1096_vm0, %v1358_v25  ;;  %v848_v30 = vmax.f32 %v656_v26, 0.0  ;;  %v874_v31 = vmax.f32 %v760_v27, 0.0 }
 0x118   : > { %v658_v32 = vpop.f32.mrf.mxu0  ;;  %v762_v33 = vpop.f32.mrf.mxu1 }
 0x119   : > { %v1333_v34 = vpack.c.bf16 %v848_v30, %v848_v30  ;;  %v1359_v35 = vpack.c.bf16 %v874_v31, %v874_v31  ;;  %v659_v36 = vadd.f32 %v1691_v3, %v658_v32  ;;  %v763_v37 = vadd.f32 %v1691_v3, %v762_v33 }
 0x11a   : > { %v660_v38 = vpop.f32.mrf.mxu0  ;;  %v764_v39 = vpop.f32.mrf.mxu1 }
 0x11b   : > { %1099 = vst.msk [vmem:[%s1699_s28 + $0x8] sm:$0xf] %vm1096_vm0, %v1333_v34  ;;  %1125 = vst.msk [vmem:[%s1699_s28 + $0x70] sm:$0xf] %vm1096_vm0, %v1359_v35  ;;  %v849_v40 = vmax.f32 %v659_v36, 0.0  ;;  %v875_v41 = vmax.f32 %v763_v37, 0.0 }
 0x11c   : > { %v663_v42 = vpop.f32.mrf.mxu0  ;;  %v767_v43 = vpop.f32.mrf.mxu1 }
 0x11d   : > { %v1334_v44 = vpack.c.bf16 %v849_v40, %v849_v40  ;;  %v1360_v45 = vpack.c.bf16 %v875_v41, %v875_v41  ;;  %v664_v46 = vadd.f32 %v1691_v3, %v663_v42  ;;  %v768_v47 = vadd.f32 %v1691_v3, %v767_v43 }
 0x11e   : > { %v665_v48 = vpop.f32.mrf.mxu0  ;;  %v769_v49 = vpop.f32.mrf.mxu1 }
 0x11f   : > { %1100 = vst.msk [vmem:[%s1699_s28 + $0xc] sm:$0xf] %vm1096_vm0, %v1334_v44  ;;  %1126 = vst.msk [vmem:[%s1699_s28 + $0x74] sm:$0xf] %vm1096_vm0, %v1360_v45  ;;  %v850_v50 = vmax.f32 %v664_v46, 0.0  ;;  %v876_v51 = vmax.f32 %v768_v47, 0.0 }
 0x120   : > { %v666_v52 = vpop.f32.mrf.mxu0  ;;  %v770_v53 = vpop.f32.mrf.mxu1 }
 0x121   : > { %v1335_v54 = vpack.c.bf16 %v850_v50, %v850_v50  ;;  %v1361_v55 = vpack.c.bf16 %v876_v51, %v876_v51  ;;  %v667_v56 = vadd.f32 %v1691_v3, %v666_v52  ;;  %v771_v57 = vadd.f32 %v1691_v3, %v770_v53 }
 0x122   : > { %v668_v58 = vpop.f32.mrf.mxu0  ;;  %v772_v59 = vpop.f32.mrf.mxu1 }
 0x123   : > { %1101 = vst.msk [vmem:[%s1699_s28 + $0x10] sm:$0xf] %vm1096_vm0, %v1335_v54  ;;  %1127 = vst.msk [vmem:[%s1699_s28 + $0x78] sm:$0xf] %vm1096_vm0, %v1361_v55  ;;  %v851_v60 = vmax.f32 %v667_v56, 0.0  ;;  %v877_v61 = vmax.f32 %v771_v57, 0.0 }
 0x124   : > { %v671_v62 = vpop.f32.mrf.mxu0  ;;  %v775_v63 = vpop.f32.mrf.mxu1 }
 0x125   : > { %v1336_v0 = vpack.c.bf16 %v851_v60, %v851_v60  ;;  %v1362_v1 = vpack.c.bf16 %v877_v61, %v877_v61  ;;  %v672_v2 = vadd.f32 %v1691_v3, %v671_v62  ;;  %v776_v4 = vadd.f32 %v1691_v3, %v775_v63 }
 0x126   : > { %v673_v5 = vpop.f32.mrf.mxu0  ;;  %v777_v6 = vpop.f32.mrf.mxu1 }
 0x127   : > { %1102 = vst.msk [vmem:[%s1699_s28 + $0x14] sm:$0xf] %vm1096_vm0, %v1336_v0  ;;  %1128 = vst.msk [vmem:[%s1699_s28 + $0x7c] sm:$0xf] %vm1096_vm0, %v1362_v1  ;;  %v852_v7 = vmax.f32 %v672_v2, 0.0  ;;  %v878_v8 = vmax.f32 %v776_v4, 0.0 }
 0x128   : > { %v674_v9 = vpop.f32.mrf.mxu0  ;;  %v778_v10 = vpop.f32.mrf.mxu1 }
 0x129   : > { %v1337_v11 = vpack.c.bf16 %v852_v7, %v852_v7  ;;  %v1363_v12 = vpack.c.bf16 %v878_v8, %v878_v8  ;;  %v675_v13 = vadd.f32 %v1691_v3, %v674_v9  ;;  %v779_v14 = vadd.f32 %v1691_v3, %v778_v10 }
 0x12a   : > { %v676_v15 = vpop.f32.mrf.mxu0  ;;  %v780_v16 = vpop.f32.mrf.mxu1 }
 0x12b   : > { %1103 = vst.msk [vmem:[%s1699_s28 + $0x18] sm:$0xf] %vm1096_vm0, %v1337_v11  ;;  %1129 = vst.msk [vmem:[%s1699_s28 + $0x80] sm:$0xf] %vm1096_vm0, %v1363_v12  ;;  %v853_v17 = vmax.f32 %v675_v13, 0.0  ;;  %v879_v18 = vmax.f32 %v779_v14, 0.0 }
 0x12c   : > { %v679_v19 = vpop.f32.mrf.mxu0  ;;  %v783_v20 = vpop.f32.mrf.mxu1 }
 0x12d   : > { %v1338_v21 = vpack.c.bf16 %v853_v17, %v853_v17  ;;  %v1364_v22 = vpack.c.bf16 %v879_v18, %v879_v18  ;;  %v680_v23 = vadd.f32 %v1691_v3, %v679_v19  ;;  %v784_v24 = vadd.f32 %v1691_v3, %v783_v20 }
 0x12e   : > { %v681_v25 = vpop.f32.mrf.mxu0  ;;  %v785_v26 = vpop.f32.mrf.mxu1 }
 0x12f   : > { %1104 = vst.msk [vmem:[%s1699_s28 + $0x1c] sm:$0xf] %vm1096_vm0, %v1338_v21  ;;  %1130 = vst.msk [vmem:[%s1699_s28 + $0x84] sm:$0xf] %vm1096_vm0, %v1364_v22  ;;  %v854_v27 = vmax.f32 %v680_v23, 0.0  ;;  %v880_v28 = vmax.f32 %v784_v24, 0.0 }
 0x130   : > { %v682_v29 = vpop.f32.mrf.mxu0  ;;  %v786_v30 = vpop.f32.mrf.mxu1 }
 0x131   : > { %v1339_v31 = vpack.c.bf16 %v854_v27, %v854_v27  ;;  %v1365_v32 = vpack.c.bf16 %v880_v28, %v880_v28  ;;  %v683_v33 = vadd.f32 %v1691_v3, %v682_v29  ;;  %v787_v34 = vadd.f32 %v1691_v3, %v786_v30 }
 0x132   : > { %v684_v35 = vpop.f32.mrf.mxu0  ;;  %v788_v36 = vpop.f32.mrf.mxu1 }
 0x133   : > { %1105 = vst.msk [vmem:[%s1699_s28 + $0x20] sm:$0xf] %vm1096_vm0, %v1339_v31  ;;  %1131 = vst.msk [vmem:[%s1699_s28 + $0x88] sm:$0xf] %vm1096_vm0, %v1365_v32  ;;  %v855_v37 = vmax.f32 %v683_v33, 0.0  ;;  %v881_v38 = vmax.f32 %v787_v34, 0.0 }
 0x134   : > { %v687_v39 = vpop.f32.mrf.mxu0  ;;  %v791_v40 = vpop.f32.mrf.mxu1 }
 0x135   : > { %v1340_v41 = vpack.c.bf16 %v855_v37, %v855_v37  ;;  %v1366_v42 = vpack.c.bf16 %v881_v38, %v881_v38  ;;  %v688_v43 = vadd.f32 %v1691_v3, %v687_v39  ;;  %v792_v44 = vadd.f32 %v1691_v3, %v791_v40 }
 0x136   : > { %v689_v45 = vpop.f32.mrf.mxu0  ;;  %v793_v46 = vpop.f32.mrf.mxu1 }
 0x137   : > { %1106 = vst.msk [vmem:[%s1699_s28 + $0x24] sm:$0xf] %vm1096_vm0, %v1340_v41  ;;  %1132 = vst.msk [vmem:[%s1699_s28 + $0x8c] sm:$0xf] %vm1096_vm0, %v1366_v42  ;;  %v856_v47 = vmax.f32 %v688_v43, 0.0  ;;  %v882_v48 = vmax.f32 %v792_v44, 0.0 }
 0x138   : > { %v690_v49 = vpop.f32.mrf.mxu0  ;;  %v794_v50 = vpop.f32.mrf.mxu1 }
 0x139   : > { %v1341_v51 = vpack.c.bf16 %v856_v47, %v856_v47  ;;  %v1367_v52 = vpack.c.bf16 %v882_v48, %v882_v48  ;;  %v691_v53 = vadd.f32 %v1691_v3, %v690_v49  ;;  %v795_v54 = vadd.f32 %v1691_v3, %v794_v50 }
 0x13a   : > { %v692_v55 = vpop.f32.mrf.mxu0  ;;  %v796_v56 = vpop.f32.mrf.mxu1 }
 0x13b   : > { %1107 = vst.msk [vmem:[%s1699_s28 + $0x28] sm:$0xf] %vm1096_vm0, %v1341_v51  ;;  %1133 = vst.msk [vmem:[%s1699_s28 + $0x90] sm:$0xf] %vm1096_vm0, %v1367_v52  ;;  %v857_v57 = vmax.f32 %v691_v53, 0.0  ;;  %v883_v58 = vmax.f32 %v795_v54, 0.0 }
 0x13c   : > { %v695_v59 = vpop.f32.mrf.mxu0  ;;  %v799_v60 = vpop.f32.mrf.mxu1 }
 0x13d   : > { %v1342_v61 = vpack.c.bf16 %v857_v57, %v857_v57  ;;  %v1368_v62 = vpack.c.bf16 %v883_v58, %v883_v58  ;;  %v696_v63 = vadd.f32 %v1691_v3, %v695_v59  ;;  %v800_v0 = vadd.f32 %v1691_v3, %v799_v60 }
 0x13e   : > { %v697_v1 = vpop.f32.mrf.mxu0  ;;  %v801_v2 = vpop.f32.mrf.mxu1 }
 0x13f   : > { %1108 = vst.msk [vmem:[%s1699_s28 + $0x2c] sm:$0xf] %vm1096_vm0, %v1342_v61  ;;  %1134 = vst.msk [vmem:[%s1699_s28 + $0x94] sm:$0xf] %vm1096_vm0, %v1368_v62  ;;  %v858_v4 = vmax.f32 %v696_v63, 0.0  ;;  %v884_v5 = vmax.f32 %v800_v0, 0.0 }
 0x140   : > { %v698_v6 = vpop.f32.mrf.mxu0  ;;  %v802_v7 = vpop.f32.mrf.mxu1 }
 0x141   : > { %v1343_v8 = vpack.c.bf16 %v858_v4, %v858_v4  ;;  %v1369_v9 = vpack.c.bf16 %v884_v5, %v884_v5  ;;  %v699_v10 = vadd.f32 %v1691_v3, %v698_v6  ;;  %v803_v11 = vadd.f32 %v1691_v3, %v802_v7 }
 0x142   : > { %v700_v12 = vpop.f32.mrf.mxu0  ;;  %v804_v13 = vpop.f32.mrf.mxu1 }
 0x143   : > { %1109 = vst.msk [vmem:[%s1699_s28 + $0x30] sm:$0xf] %vm1096_vm0, %v1343_v8  ;;  %1135 = vst.msk [vmem:[%s1699_s28 + $0x98] sm:$0xf] %vm1096_vm0, %v1369_v9  ;;  %v859_v14 = vmax.f32 %v699_v10, 0.0  ;;  %v885_v15 = vmax.f32 %v803_v11, 0.0 }
 0x144   : > { %v703_v16 = vpop.f32.mrf.mxu0  ;;  %v807_v17 = vpop.f32.mrf.mxu1 }
 0x145   : > { %v1344_v18 = vpack.c.bf16 %v859_v14, %v859_v14  ;;  %v1370_v19 = vpack.c.bf16 %v885_v15, %v885_v15  ;;  %v704_v20 = vadd.f32 %v1691_v3, %v703_v16  ;;  %v808_v21 = vadd.f32 %v1691_v3, %v807_v17 }
 0x146   : > { %v705_v22 = vpop.f32.mrf.mxu0  ;;  %v809_v23 = vpop.f32.mrf.mxu1 }
 0x147   : > { %1110 = vst.msk [vmem:[%s1699_s28 + $0x34] sm:$0xf] %vm1096_vm0, %v1344_v18  ;;  %1136 = vst.msk [vmem:[%s1699_s28 + $0x9c] sm:$0xf] %vm1096_vm0, %v1370_v19  ;;  %v860_v24 = vmax.f32 %v704_v20, 0.0  ;;  %v886_v25 = vmax.f32 %v808_v21, 0.0 }
 0x148   : > { %v706_v26 = vpop.f32.mrf.mxu0  ;;  %v810_v27 = vpop.f32.mrf.mxu1 }
 0x149   : > { %v1345_v28 = vpack.c.bf16 %v860_v24, %v860_v24  ;;  %v1371_v29 = vpack.c.bf16 %v886_v25, %v886_v25  ;;  %v707_v30 = vadd.f32 %v1691_v3, %v706_v26  ;;  %v811_v31 = vadd.f32 %v1691_v3, %v810_v27 }
 0x14a   : > { %v708_v32 = vpop.f32.mrf.mxu0  ;;  %v812_v33 = vpop.f32.mrf.mxu1 }
 0x14b   : > { %1111 = vst.msk [vmem:[%s1699_s28 + $0x38] sm:$0xf] %vm1096_vm0, %v1345_v28  ;;  %1137 = vst.msk [vmem:[%s1699_s28 + $0xa0] sm:$0xf] %vm1096_vm0, %v1371_v29  ;;  %v861_v34 = vmax.f32 %v707_v30, 0.0  ;;  %v887_v35 = vmax.f32 %v811_v31, 0.0 }
 0x14c   : > { %v711_v36 = vpop.f32.mrf.mxu0  ;;  %v815_v37 = vpop.f32.mrf.mxu1 }
 0x14d   : > { %v1346_v38 = vpack.c.bf16 %v861_v34, %v861_v34  ;;  %v1372_v39 = vpack.c.bf16 %v887_v35, %v887_v35  ;;  %v712_v40 = vadd.f32 %v1691_v3, %v711_v36  ;;  %v816_v41 = vadd.f32 %v1691_v3, %v815_v37 }
 0x14e   : > { %v713_v42 = vpop.f32.mrf.mxu0  ;;  %v817_v43 = vpop.f32.mrf.mxu1 }
 0x14f   : > { %1112 = vst.msk [vmem:[%s1699_s28 + $0x3c] sm:$0xf] %vm1096_vm0, %v1346_v38  ;;  %1138 = vst.msk [vmem:[%s1699_s28 + $0xa4] sm:$0xf] %vm1096_vm0, %v1372_v39  ;;  %v862_v44 = vmax.f32 %v712_v40, 0.0  ;;  %v888_v45 = vmax.f32 %v816_v41, 0.0 }
 0x150   : > { %v714_v46 = vpop.f32.mrf.mxu0  ;;  %v818_v47 = vpop.f32.mrf.mxu1 }
 0x151   : > { %v1347_v48 = vpack.c.bf16 %v862_v44, %v862_v44  ;;  %v1373_v49 = vpack.c.bf16 %v888_v45, %v888_v45  ;;  %v715_v50 = vadd.f32 %v1691_v3, %v714_v46  ;;  %v819_v51 = vadd.f32 %v1691_v3, %v818_v47 }
 0x152   : > { %v716_v52 = vpop.f32.mrf.mxu0  ;;  %v820_v53 = vpop.f32.mrf.mxu1 }
 0x153   : > { %1113 = vst.msk [vmem:[%s1699_s28 + $0x40] sm:$0xf] %vm1096_vm0, %v1347_v48  ;;  %1139 = vst.msk [vmem:[%s1699_s28 + $0xa8] sm:$0xf] %vm1096_vm0, %v1373_v49  ;;  %v863_v54 = vmax.f32 %v715_v50, 0.0  ;;  %v889_v55 = vmax.f32 %v819_v51, 0.0 }
 0x154   : > { %v719_v56 = vpop.f32.mrf.mxu0  ;;  %v823_v57 = vpop.f32.mrf.mxu1 }
 0x155   : > { %v1348_v58 = vpack.c.bf16 %v863_v54, %v863_v54  ;;  %v1374_v59 = vpack.c.bf16 %v889_v55, %v889_v55  ;;  %v720_v60 = vadd.f32 %v1691_v3, %v719_v56  ;;  %v824_v61 = vadd.f32 %v1691_v3, %v823_v57 }
 0x156   : > { %v721_v62 = vpop.f32.mrf.mxu0  ;;  %v825_v63 = vpop.f32.mrf.mxu1 }
 0x157   : > { %1114 = vst.msk [vmem:[%s1699_s28 + $0x44] sm:$0xf] %vm1096_vm0, %v1348_v58  ;;  %1140 = vst.msk [vmem:[%s1699_s28 + $0xac] sm:$0xf] %vm1096_vm0, %v1374_v59  ;;  %v864_v0 = vmax.f32 %v720_v60, 0.0  ;;  %v890_v1 = vmax.f32 %v824_v61, 0.0 }
 0x158   : > { %v722_v2 = vpop.f32.mrf.mxu0  ;;  %v826_v4 = vpop.f32.mrf.mxu1 }
 0x159   : > { %v1349_v5 = vpack.c.bf16 %v864_v0, %v864_v0  ;;  %v1375_v6 = vpack.c.bf16 %v890_v1, %v890_v1  ;;  %v723_v7 = vadd.f32 %v1691_v3, %v722_v2  ;;  %v827_v8 = vadd.f32 %v1691_v3, %v826_v4 }
 0x15a   : > { %v724_v9 = vpop.f32.mrf.mxu0  ;;  %v828_v10 = vpop.f32.mrf.mxu1 }
 0x15b   : > { %1115 = vst.msk [vmem:[%s1699_s28 + $0x48] sm:$0xf] %vm1096_vm0, %v1349_v5  ;;  %1141 = vst.msk [vmem:[%s1699_s28 + $0xb0] sm:$0xf] %vm1096_vm0, %v1375_v6  ;;  %v865_v11 = vmax.f32 %v723_v7, 0.0  ;;  %v891_v12 = vmax.f32 %v827_v8, 0.0 }
 0x15c   : > { %v727_v13 = vpop.f32.mrf.mxu0  ;;  %v831_v14 = vpop.f32.mrf.mxu1 }
 0x15d   : > { %v1350_v15 = vpack.c.bf16 %v865_v11, %v865_v11  ;;  %v1376_v16 = vpack.c.bf16 %v891_v12, %v891_v12  ;;  %v728_v17 = vadd.f32 %v1691_v3, %v727_v13  ;;  %v832_v18 = vadd.f32 %v1691_v3, %v831_v14 }
 0x15e   : > { %v729_v19 = vpop.f32.mrf.mxu0  ;;  %v833_v20 = vpop.f32.mrf.mxu1 }
 0x15f   : > { %1116 = vst.msk [vmem:[%s1699_s28 + $0x4c] sm:$0xf] %vm1096_vm0, %v1350_v15  ;;  %1142 = vst.msk [vmem:[%s1699_s28 + $0xb4] sm:$0xf] %vm1096_vm0, %v1376_v16  ;;  %v866_v21 = vmax.f32 %v728_v17, 0.0  ;;  %v892_v22 = vmax.f32 %v832_v18, 0.0 }
 0x160   : > { %v730_v23 = vpop.f32.mrf.mxu0  ;;  %v834_v24 = vpop.f32.mrf.mxu1 }
 0x161   : > { %v1351_v25 = vpack.c.bf16 %v866_v21, %v866_v21  ;;  %v1377_v26 = vpack.c.bf16 %v892_v22, %v892_v22  ;;  %v731_v27 = vadd.f32 %v1691_v3, %v730_v23  ;;  %v835_v28 = vadd.f32 %v1691_v3, %v834_v24 }
 0x162   : > { %v732_v29 = vpop.f32.mrf.mxu0  ;;  %v836_v30 = vpop.f32.mrf.mxu1 }
 0x163   : > { %1117 = vst.msk [vmem:[%s1699_s28 + $0x50] sm:$0xf] %vm1096_vm0, %v1351_v25  ;;  %1143 = vst.msk [vmem:[%s1699_s28 + $0xb8] sm:$0xf] %vm1096_vm0, %v1377_v26  ;;  %v867_v31 = vmax.f32 %v731_v27, 0.0  ;;  %v893_v32 = vmax.f32 %v835_v28, 0.0 }
 0x164   : > { %v735_v33 = vpop.f32.mrf.mxu0  ;;  %v839_v34 = vpop.f32.mrf.mxu1 }
 0x165   : > { %v1352_v35 = vpack.c.bf16 %v867_v31, %v867_v31  ;;  %v1378_v36 = vpack.c.bf16 %v893_v32, %v893_v32  ;;  %v736_v37 = vadd.f32 %v1691_v3, %v735_v33  ;;  %v840_v38 = vadd.f32 %v1691_v3, %v839_v34 }
 0x166   : > { %v737_v39 = vpop.f32.mrf.mxu0  ;;  %v841_v40 = vpop.f32.mrf.mxu1 }
 0x167   : > { %1118 = vst.msk [vmem:[%s1699_s28 + $0x54] sm:$0xf] %vm1096_vm0, %v1352_v35  ;;  %1144 = vst.msk [vmem:[%s1699_s28 + $0xbc] sm:$0xf] %vm1096_vm0, %v1378_v36  ;;  %v868_v41 = vmax.f32 %v736_v37, 0.0  ;;  %v894_v42 = vmax.f32 %v840_v38, 0.0 }
 0x168   : > { %v738_v43 = vpop.f32.mrf.mxu0  ;;  %v842_v44 = vpop.f32.mrf.mxu1 }
 0x169   : > { %v1353_v45 = vpack.c.bf16 %v868_v41, %v868_v41  ;;  %v1379_v46 = vpack.c.bf16 %v894_v42, %v894_v42  ;;  %v739_v47 = vadd.f32 %v1691_v3, %v738_v43  ;;  %v843_v48 = vadd.f32 %v1691_v3, %v842_v44 }
 0x16a   : > { %v740_v49 = vpop.f32.mrf.mxu0  ;;  %v844_v50 = vpop.f32.mrf.mxu1 }
 0x16b   : > { %1119 = vst.msk [vmem:[%s1699_s28 + $0x58] sm:$0xf] %vm1096_vm0, %v1353_v45  ;;  %1145 = vst.msk [vmem:[%s1699_s28 + $0xc0] sm:$0xf] %vm1096_vm0, %v1379_v46  ;;  %v869_v51 = vmax.f32 %v739_v47, 0.0  ;;  %v895_v52 = vmax.f32 %v843_v48, 0.0 }
 0x16c   : > { %v743_v53 = vpop.f32.mrf.mxu0 }
 0x16d   : > { %v1354_v54 = vpack.c.bf16 %v869_v51, %v869_v51  ;;  %v1380_v55 = vpack.c.bf16 %v895_v52, %v895_v52  ;;  %v744_v56 = vadd.f32 %v1691_v3, %v743_v53 }
 0x16e   : > { %v745_v57 = vpop.f32.mrf.mxu0 }
 0x16f   : > { %1120 = vst.msk [vmem:[%s1699_s28 + $0x5c] sm:$0xf] %vm1096_vm0, %v1354_v54  ;;  %1146 = vst.msk [vmem:[%s1699_s28 + $0xc4] sm:$0xf] %vm1096_vm0, %v1380_v55  ;;  %v870_v58 = vmax.f32 %v744_v56, 0.0 }
 0x170   : > { %v746_v59 = vpop.f32.mrf.mxu0 }
 0x171   : > { %v1355_v60 = vpack.c.bf16 %v870_v58, %v870_v58  ;;  %v747_v61 = vadd.f32 %v1691_v3, %v746_v59 }
 0x172   : > { %v748_v62 = vpop.f32.mrf.mxu0 }
 0x173   : > { %1121 = vst.msk [vmem:[%s1699_s28 + $0x60] sm:$0xf] %vm1096_vm0, %v1355_v60  ;;  %v871_v63 = vmax.f32 %v747_v61, 0.0 }
 0x175   : > { %v1356_v0 = vpack.c.bf16 %v871_v63, %v871_v63 }
 0x177   : > { %1122 = vst.msk [vmem:[%s1699_s28 + $0x64] sm:$0xf] %vm1096_vm0, %v1356_v0 }
 0x178 PF: > { %s13_s12 = sadd.s32 1, %s1519_s12  }
 0x179   : > { %p10_p4 = scmp.ge.s32.totalorder %s13_s12, 4  }
 0x17b   :  { %12 = sbr.rel (!%p10_p4) target bundleno = 1 (0x1), region = 62 }

// kernel: dqn_forward.5
= control target key start
LH: loop header
LB: loop body
LE: loop exit
PB: predicated region body
PF: predicated region fallthrough
CT: control target
= control target key end

     0   :  { %s1157_s12 = smov 0   ;;  %s1340_s0 = inlined_call_operand.vmem [shape: bf16[176,512], index: 0, kind: input, shape index: {}]   ;;  %s1341_s1 = inlined_call_operand.vmem [shape: bf16[512,64], index: 1, kind: input, shape index: {}]   ;;  %s1342_s2 = inlined_call_operand.vmem [shape: f32[1,64], index: 2, kind: input, shape index: {}]   ;;  %s1343_s3 = inlined_call_operand.vmem [shape: bf16[176,64], index: 3, kind: output, shape index: {}]  }
   0x1 LB: > { %s861_s13 = sadd.s32 4294967295, %s1135_s12   ;;  %p865_p0 = scmp.ge.s32.totalorder %s1135_s12, 1  ;;  %s1135_s12 = sphi %s1157_s12, %s13_s12  }
   0x2   : > { %p139_p1 = scmp.lt.s32.totalorder %s1135_s12, 3 }
   0x4   : > { %p140_p2 = pnand %p865_p0, %p139_p1 }
   0x5   : > { %s164_s19 = smul.u32 (!%p140_p2), 11, %s861_s13 }
   0x6   : > { %143 = sbr.rel (%p140_p2) target bundleno = 291 (0x123), region = 32 }
   0x7   : > { %p165_p3 = scmp.lt.s32.totalorder (!%p140_p2), %s164_s19, 21 }
   0xb   : > { %v1063_v0 = vld [vmem:[%s1341_s1 + $0x78] sm:$0xff]   ;;  %v1067_v4 = vld [vmem:[%s1341_s1 + $0x70] sm:$0xff]   ;;  %v1071_v8 = vld [vmem:[%s1341_s1 + $0x68] sm:$0xff]   ;;  %s1345_s19 = smov (!%p165_p3, %s164_s19), 21  ;;  %vm793_vm0 = vcmask 519168  }
   0xc   : > { %v1064_v1 = vld [vmem:[%s1341_s1 + $0xf8] sm:$0xff]   ;;  %951 = vmatprep.subr.bf16.mxu0 %v1063_v0  ;;  %v1068_v5 = vld [vmem:[%s1341_s1 + $0xf0] sm:$0xff]   ;;  %v1072_v9 = vld [vmem:[%s1341_s1 + $0xe8] sm:$0xff]   ;;  %s939_s18 = sshll.u32 %s1345_s19, 4  ;;  %s868_s7 = sshll.u32 %s1345_s19, 2 }
   0xd   : > { %v1065_v2 = vld [vmem:[%s1341_s1 + $0x38] sm:$0xff]   ;;  %1003 = vmatprep.subr.bf16.mxu1 %v1064_v1  ;;  %v1069_v6 = vld [vmem:[%s1341_s1 + $0x30] sm:$0xff]   ;;  %v1073_v10 = vld [vmem:[%s1341_s1 + $0x28] sm:$0xff]   ;;  %s1263_s13 = scalar_lea.vmem %s1340_s0, %s939_s18  ;;  %s1304_s10 = scalar_lea.vmem %s1343_s3, %s868_s7 }
   0xe   : > { %v1066_v3 = vld [vmem:[%s1341_s1 + $0xb8] sm:$0xff]   ;;  %952 = vmatpush3.bf16.msra.mxu0 %v1065_v2  ;;  %v1070_v7 = vld [vmem:[%s1341_s1 + $0xb0] sm:$0xff]   ;;  %v1074_v11 = vld [vmem:[%s1341_s1 + $0xa8] sm:$0xff]  }
   0xf   : > { %1004 = vmatpush3.bf16.msra.mxu1 %v1066_v3  ;;  %953 = vmatprep.subr.bf16.mxu0 %v1067_v4  ;;  %v1075_v12 = vld [vmem:[%s1341_s1 + $0x60] sm:$0xff]   ;;  %v1079_v16 = vld [vmem:[%s1341_s1 + $0x58] sm:$0xff]   ;;  %v1083_v20 = vld [vmem:[%s1341_s1 + $0x50] sm:$0xff]  }
  0x10   : > { %1005 = vmatprep.subr.bf16.mxu1 %v1068_v5  ;;  %v1076_v13 = vld [vmem:[%s1341_s1 + $0xe0] sm:$0xff]   ;;  %v1080_v17 = vld [vmem:[%s1341_s1 + $0xd8] sm:$0xff]   ;;  %v1084_v21 = vld [vmem:[%s1341_s1 + $0xd0] sm:$0xff]  }
  0x11   : > { %v1077_v14 = vld [vmem:[%s1341_s1 + $0x20] sm:$0xff]   ;;  %v1081_v18 = vld [vmem:[%s1341_s1 + $0x18] sm:$0xff]   ;;  %v1085_v22 = vld [vmem:[%s1341_s1 + $0x10] sm:$0xff]  }
  0x12   : > { %954 = vmatpush3.bf16.msra.mxu0 %v1069_v6  ;;  %v1078_v15 = vld [vmem:[%s1341_s1 + $0xa0] sm:$0xff]   ;;  %v1082_v19 = vld [vmem:[%s1341_s1 + $0x98] sm:$0xff]   ;;  %v1086_v23 = vld [vmem:[%s1341_s1 + $0x90] sm:$0xff]  }
  0x13   : > { %1006 = vmatpush3.bf16.msra.mxu1 %v1070_v7  ;;  %955 = vmatprep.subr.bf16.mxu0 %v1071_v8  ;;  %v1087_v24 = vld [vmem:[%s1341_s1 + $0x48] sm:$0xff]   ;;  %v1091_v28 = vld [vmem:[%s1341_s1 + $0x40] sm:$0xff]  }
  0x14   : > { %1007 = vmatprep.subr.bf16.mxu1 %v1072_v9  ;;  %v1088_v25 = vld [vmem:[%s1341_s1 + $0xc8] sm:$0xff]   ;;  %v1092_v29 = vld [vmem:[%s1341_s1 + $0xc0] sm:$0xff]  }
  0x15   : > { %v1089_v26 = vld [vmem:[%s1341_s1 + $0x8] sm:$0xff]   ;;  %v1093_v30 = vld [vmem:[%s1341_s1] sm:$0xff]  }
  0x16   : > { %956 = vmatpush3.bf16.msra.mxu0 %v1073_v10  ;;  %v1090_v27 = vld [vmem:[%s1341_s1 + $0x88] sm:$0xff]   ;;  %v1094_v31 = vld [vmem:[%s1341_s1 + $0x80] sm:$0xff]  }
  0x17   : > { %1008 = vmatpush3.bf16.msra.mxu1 %v1074_v11  ;;  %957 = vmatprep.subr.bf16.mxu0 %v1075_v12  ;;  %v1095_v32 = vld [vmem:[%s1263_s13] ss:$16 sps:$4 sm:$0xff]   ;;  %v1097_v33 = vld [vmem:[%s1263_s13 + $0x4] ss:$16 sps:$4 sm:$0xff]   ;;  %v1098_v34 = vld [vmem:[%s1263_s13 + $0x8] ss:$16 sps:$4 sm:$0xff]  }
  0x18   : > { %1009 = vmatprep.subr.bf16.mxu1 %v1076_v13  ;;  %v1100_v35 = vld [vmem:[%s1263_s13 + $0xc] ss:$16 sps:$4 sm:$0xff]   ;;  %609 = vmatprep.mubr.bf16.mxu0 %v1097_v33  ;;  %v1101_v36 = vld [vmem:[%s1263_s13 + $0x24] ss:$16 sps:$4 sm:$0xff]   ;;  %v1105_v38 = vld [vmem:[%s1263_s13 + $0x20] ss:$16 sps:$4 sm:$0xff]  }
  0x19   : > { %689 = vmatprep.mubr.bf16.mxu1 %v1100_v35  ;;  %v1103_v37 = vld [vmem:[%s1263_s13 + $0x2c] ss:$16 sps:$4 sm:$0xff]   ;;  %v1106_v39 = vld [vmem:[%s1263_s13 + $0x28] ss:$16 sps:$4 sm:$0xff]   ;;  %v1107_v40 = vld [vmem:[%s1263_s13 + $0x44] ss:$16 sps:$4 sm:$0xff]  }
  0x1a   : > { %958 = vmatpush3.bf16.msra.mxu0 %v1077_v14  ;;  %v1109_v41 = vld [vmem:[%s1263_s13 + $0x4c] ss:$16 sps:$4 sm:$0xff]   ;;  %v1111_v42 = vld [vmem:[%s1263_s13 + $0x40] ss:$16 sps:$4 sm:$0xff]   ;;  %v1112_v43 = vld [vmem:[%s1263_s13 + $0x48] ss:$16 sps:$4 sm:$0xff]  }
  0x1b   : > { %1010 = vmatpush3.bf16.msra.mxu1 %v1078_v15  ;;  %959 = vmatprep.subr.bf16.mxu0 %v1079_v16  ;;  %v1113_v44 = vld [vmem:[%s1263_s13 + $0x64] ss:$16 sps:$4 sm:$0xff]   ;;  %v1115_v45 = vld [vmem:[%s1263_s13 + $0x6c] ss:$16 sps:$4 sm:$0xff]   ;;  %v1117_v46 = vld [vmem:[%s1263_s13 + $0x60] ss:$16 sps:$4 sm:$0xff]  }
  0x1c   : > { %1011 = vmatprep.subr.bf16.mxu1 %v1080_v17  ;;  %v1118_v47 = vld [vmem:[%s1263_s13 + $0x68] ss:$16 sps:$4 sm:$0xff]   ;;  %v1119_v48 = vld [vmem:[%s1263_s13 + $0x84] ss:$16 sps:$4 sm:$0xff]   ;;  %v1121_v49 = vld [vmem:[%s1263_s13 + $0x8c] ss:$16 sps:$4 sm:$0xff]  }
  0x1d   : > { %v198_v50 = vld [vmem:[%s1263_s13 + $0xa0] sm:$0xff]  ;;  %v199_v51 = vld [vmem:[%s1263_s13 + $0xa8] sm:$0xff] }
  0x1e   : > { %960 = vmatpush3.bf16.msra.mxu0 %v1081_v18  ;;  %v1123_v52 = vld [vmem:[%s1263_s13 + $0x80] ss:$16 sps:$4 sm:$0xff]   ;;  %v1124_v53 = vld [vmem:[%s1263_s13 + $0x88] ss:$16 sps:$4 sm:$0xff]   ;;  %v891_v54 = vcombine.high %v198_v50, %v198_v50  ;;  %v893_v55 = vcombine.high %v199_v51, %v199_v51  ;;  %v890_v56 = vcombine.low %v198_v50, %v198_v50  ;;  %v892_v57 = vcombine.low %v199_v51, %v199_v51 }
  0x1f   : > { %1012 = vmatpush3.bf16.msra.mxu1 %v1082_v19  ;;  %961 = vmatprep.subr.bf16.mxu0 %v1083_v20  ;;  %v1296_v60 = vld [vmem:[%s1342_s2] ss:$0 sm:$0xff] }
  0x20   : > { %1013 = vmatprep.subr.bf16.mxu1 %v1084_v21 }
  0x22   : > { %962 = vmatpush3.bf16.msra.mxu0 %v1085_v22 }
  0x23   : > { %1014 = vmatpush3.bf16.msra.mxu1 %v1086_v23  ;;  %963 = vmatprep.subr.bf16.mxu0 %v1087_v24 }
  0x24   : > { %1015 = vmatprep.subr.bf16.mxu1 %v1088_v25 }
  0x26   : > { %964 = vmatpush3.bf16.msra.mxu0 %v1089_v26 }
  0x27   : > { %1016 = vmatpush3.bf16.msra.mxu1 %v1090_v27  ;;  %965 = vmatprep.subr.bf16.mxu0 %v1091_v28 }
  0x28   : > { %1017 = vmatprep.subr.bf16.mxu1 %v1092_v29 }
  0x2a   : > { %966 = vmatpush3.bf16.msra.mxu0 %v1093_v30 }
  0x2b   : > { %1018 = vmatpush3.bf16.msra.mxu1 %v1094_v31 }
  0x2d   : > { %610 = vmatmul.mubr.bf16.vlgmr.msra.gmra.mxu0 %v1095_v32 }
  0x2e   : > { %690 = vmatmul.mubr.bf16.vlgmr.msra.gmra.mxu1 %v1098_v34  ;;  %617 = vmatprep.mubr.bf16.mxu0 %v1101_v36 }
  0x2f   : > { %697 = vmatprep.mubr.bf16.mxu1 %v1103_v37 }
  0x35   : > { %618 = vmatmul.mubr.bf16.gmra.mxu0 %v1105_v38 }
  0x36   : > { %698 = vmatmul.mubr.bf16.gmra.mxu1 %v1106_v39  ;;  %625 = vmatprep.mubr.bf16.mxu0 %v1107_v40 }
  0x37   : > { %705 = vmatprep.mubr.bf16.mxu1 %v1109_v41 }
  0x3d   : > { %626 = vmatmul.mubr.bf16.gmra.mxu0 %v1111_v42 }
  0x3e   : > { %706 = vmatmul.mubr.bf16.gmra.mxu1 %v1112_v43  ;;  %633 = vmatprep.mubr.bf16.mxu0 %v1113_v44 }
  0x3f   : > { %713 = vmatprep.mubr.bf16.mxu1 %v1115_v45 }
  0x45   : > { %634 = vmatmul.mubr.bf16.gmra.mxu0 %v1117_v46 }
  0x46   : > { %714 = vmatmul.mubr.bf16.gmra.mxu1 %v1118_v47  ;;  %641 = vmatprep.mubr.bf16.mxu0 %v1119_v48 }
  0x47   : > { %721 = vmatprep.mubr.bf16.mxu1 %v1121_v49 }
  0x4d   : > { %642 = vmatmul.mubr.bf16.gmra.mxu0 %v1123_v52 }
  0x4e   : > { %722 = vmatmul.mubr.bf16.gmra.mxu1 %v1124_v53  ;;  %649 = vmatprep.mubr.bf16.mxu0 %v891_v54 }
  0x4f   : > { %729 = vmatprep.mubr.bf16.mxu1 %v893_v55 }
  0x55   : > { %650 = vmatmul.mubr.bf16.gmra.mxu0 %v890_v56 }
  0x56   : > { %730 = vmatmul.mubr.bf16.gmra.mxu1 %v892_v57 }
  0xed   : > { %v967_v58 = vpop.f32.mrf.mxu0 }
  0xee   : > { %v1019_v59 = vpop.f32.mrf.mxu1 }
  0xef   : > { %v968_v61 = vpop.f32.mrf.mxu0 }
  0xf0   : > { %v969_v62 = vadd.f32 %v968_v61, %v967_v58  ;;  %v1020_v63 = vpop.f32.mrf.mxu1 }
  0xf1   : > { %v970_v0 = vpop.f32.mrf.mxu0  ;;  %v1021_v2 = vadd.f32 %v1020_v63, %v1019_v59 }
  0xf2   : > { %v612_v1 = vadd.f32 %v969_v62, %v1296_v60  ;;  %v1022_v3 = vpop.f32.mrf.mxu1 }
  0xf3   : > { %v971_v4 = vpop.f32.mrf.mxu0 }
  0xf4   : > { %v692_v5 = vadd.f32 %v1021_v2, %v612_v1  ;;  %v972_v6 = vadd.f32 %v971_v4, %v970_v0  ;;  %v1023_v7 = vpop.f32.mrf.mxu1 }
  0xf5   : > { %v973_v8 = vpop.f32.mrf.mxu0  ;;  %v1024_v11 = vadd.f32 %v1023_v7, %v1022_v3 }
  0xf6   : > { %v737_v9 = vmax.f32 %v692_v5, 0.0  ;;  %v615_v10 = vadd.f32 %v972_v6, %v1296_v60  ;;  %v1025_v12 = vpop.f32.mrf.mxu1 }
  0xf7   : > { %v974_v13 = vpop.f32.mrf.mxu0 }
  0xf8   : > { %v940_v14 = vpack.c.bf16 %v737_v9, %v737_v9  ;;  %v695_v15 = vadd.f32 %v1024_v11, %v615_v10  ;;  %v975_v16 = vadd.f32 %v974_v13, %v973_v8  ;;  %v1026_v17 = vpop.f32.mrf.mxu1 }
  0xf9   : > { %v976_v18 = vpop.f32.mrf.mxu0  ;;  %v1027_v21 = vadd.f32 %v1026_v17, %v1025_v12 }
  0xfa   : > { %794 = vst.msk [vmem:[%s1304_s10] sm:$0xf] %vm793_vm0, %v940_v14  ;;  %v738_v19 = vmax.f32 %v695_v15, 0.0  ;;  %v620_v20 = vadd.f32 %v975_v16, %v1296_v60  ;;  %v1028_v22 = vpop.f32.mrf.mxu1 }
  0xfb   : > { %v977_v23 = vpop.f32.mrf.mxu0 }
  0xfc   : > { %v941_v24 = vpack.c.bf16 %v738_v19, %v738_v19  ;;  %v700_v25 = vadd.f32 %v1027_v21, %v620_v20  ;;  %v978_v26 = vadd.f32 %v977_v23, %v976_v18  ;;  %v1029_v27 = vpop.f32.mrf.mxu1 }
  0xfd   : > { %v979_v28 = vpop.f32.mrf.mxu0  ;;  %v1030_v31 = vadd.f32 %v1029_v27, %v1028_v22 }
  0xfe   : > { %795 = vst.msk [vmem:[%s1304_s10 + $0x4] sm:$0xf] %vm793_vm0, %v941_v24  ;;  %v739_v29 = vmax.f32 %v700_v25, 0.0  ;;  %v623_v30 = vadd.f32 %v978_v26, %v1296_v60  ;;  %v1031_v32 = vpop.f32.mrf.mxu1 }
  0xff   : > { %v980_v33 = vpop.f32.mrf.mxu0 }
 0x100   : > { %v942_v34 = vpack.c.bf16 %v739_v29, %v739_v29  ;;  %v703_v35 = vadd.f32 %v1030_v31, %v623_v30  ;;  %v981_v36 = vadd.f32 %v980_v33, %v979_v28  ;;  %v1032_v37 = vpop.f32.mrf.mxu1 }
 0x101   : > { %v982_v38 = vpop.f32.mrf.mxu0  ;;  %v1033_v41 = vadd.f32 %v1032_v37, %v1031_v32 }
 0x102   : > { %796 = vst.msk [vmem:[%s1304_s10 + $0x8] sm:$0xf] %vm793_vm0, %v942_v34  ;;  %v740_v39 = vmax.f32 %v703_v35, 0.0  ;;  %v628_v40 = vadd.f32 %v981_v36, %v1296_v60  ;;  %v1034_v42 = vpop.f32.mrf.mxu1 }
 0x103   : > { %v983_v43 = vpop.f32.mrf.mxu0 }
 0x104   : > { %v943_v44 = vpack.c.bf16 %v740_v39, %v740_v39  ;;  %v708_v45 = vadd.f32 %v1033_v41, %v628_v40  ;;  %v984_v46 = vadd.f32 %v983_v43, %v982_v38  ;;  %v1035_v47 = vpop.f32.mrf.mxu1 }
 0x105   : > { %v985_v48 = vpop.f32.mrf.mxu0  ;;  %v1036_v51 = vadd.f32 %v1035_v47, %v1034_v42 }
 0x106   : > { %797 = vst.msk [vmem:[%s1304_s10 + $0xc] sm:$0xf] %vm793_vm0, %v943_v44  ;;  %v741_v49 = vmax.f32 %v708_v45, 0.0  ;;  %v631_v50 = vadd.f32 %v984_v46, %v1296_v60  ;;  %v1037_v52 = vpop.f32.mrf.mxu1 }
 0x107   : > { %v986_v53 = vpop.f32.mrf.mxu0 }
 0x108   : > { %v944_v54 = vpack.c.bf16 %v741_v49, %v741_v49  ;;  %v711_v55 = vadd.f32 %v1036_v51, %v631_v50  ;;  %v987_v56 = vadd.f32 %v986_v53, %v985_v48  ;;  %v1038_v57 = vpop.f32.mrf.mxu1 }
 0x109   : > { %v988_v58 = vpop.f32.mrf.mxu0  ;;  %v1039_v62 = vadd.f32 %v1038_v57, %v1037_v52 }
 0x10a   : > { %798 = vst.msk [vmem:[%s1304_s10 + $0x10] sm:$0xf] %vm793_vm0, %v944_v54  ;;  %v742_v59 = vmax.f32 %v711_v55, 0.0  ;;  %v636_v61 = vadd.f32 %v987_v56, %v1296_v60  ;;  %v1040_v63 = vpop.f32.mrf.mxu1 }
 0x10b   : > { %v989_v0 = vpop.f32.mrf.mxu0 }
 0x10c   : > { %v945_v1 = vpack.c.bf16 %v742_v59, %v742_v59  ;;  %v716_v2 = vadd.f32 %v1039_v62, %v636_v61  ;;  %v990_v3 = vadd.f32 %v989_v0, %v988_v58  ;;  %v1041_v4 = vpop.f32.mrf.mxu1 }
 0x10d   : > { %v991_v5 = vpop.f32.mrf.mxu0  ;;  %v1042_v8 = vadd.f32 %v1041_v4, %v1040_v63 }
 0x10e   : > { %799 = vst.msk [vmem:[%s1304_s10 + $0x14] sm:$0xf] %vm793_vm0, %v945_v1  ;;  %v743_v6 = vmax.f32 %v716_v2, 0.0  ;;  %v639_v7 = vadd.f32 %v990_v3, %v1296_v60  ;;  %v1043_v9 = vpop.f32.mrf.mxu1 }
 0x10f   : > { %v992_v10 = vpop.f32.mrf.mxu0 }
 0x110   : > { %v946_v11 = vpack.c.bf16 %v743_v6, %v743_v6  ;;  %v719_v12 = vadd.f32 %v1042_v8, %v639_v7  ;;  %v993_v13 = vadd.f32 %v992_v10, %v991_v5  ;;  %v1044_v14 = vpop.f32.mrf.mxu1 }
 0x111   : > { %v994_v15 = vpop.f32.mrf.mxu0  ;;  %v1045_v18 = vadd.f32 %v1044_v14, %v1043_v9 }
 0x112   : > { %800 = vst.msk [vmem:[%s1304_s10 + $0x18] sm:$0xf] %vm793_vm0, %v946_v11  ;;  %v744_v16 = vmax.f32 %v719_v12, 0.0  ;;  %v644_v17 = vadd.f32 %v993_v13, %v1296_v60  ;;  %v1046_v19 = vpop.f32.mrf.mxu1 }
 0x113   : > { %v995_v20 = vpop.f32.mrf.mxu0 }
 0x114   : > { %v947_v21 = vpack.c.bf16 %v744_v16, %v744_v16  ;;  %v724_v22 = vadd.f32 %v1045_v18, %v644_v17  ;;  %v996_v23 = vadd.f32 %v995_v20, %v994_v15  ;;  %v1047_v24 = vpop.f32.mrf.mxu1 }
 0x115   : > { %v997_v25 = vpop.f32.mrf.mxu0  ;;  %v1048_v28 = vadd.f32 %v1047_v24, %v1046_v19 }
 0x116   : > { %801 = vst.msk [vmem:[%s1304_s10 + $0x1c] sm:$0xf] %vm793_vm0, %v947_v21  ;;  %v745_v26 = vmax.f32 %v724_v22, 0.0  ;;  %v647_v27 = vadd.f32 %v996_v23, %v1296_v60  ;;  %v1049_v29 = vpop.f32.mrf.mxu1 }
 0x117   : > { %v998_v30 = vpop.f32.mrf.mxu0 }
 0x118   : > { %v948_v31 = vpack.c.bf16 %v745_v26, %v745_v26  ;;  %v727_v32 = vadd.f32 %v1048_v28, %v647_v27  ;;  %v999_v33 = vadd.f32 %v998_v30, %v997_v25  ;;  %v1050_v34 = vpop.f32.mrf.mxu1 }
 0x119   : > { %v1000_v35 = vpop.f32.mrf.mxu0  ;;  %v1051_v38 = vadd.f32 %v1050_v34, %v1049_v29 }
 0x11a   : > { %802 = vst.msk [vmem:[%s1304_s10 + $0x20] sm:$0xf] %vm793_vm0, %v948_v31  ;;  %v746_v36 = vmax.f32 %v727_v32, 0.0  ;;  %v652_v37 = vadd.f32 %v999_v33, %v1296_v60  ;;  %v1052_v39 = vpop.f32.mrf.mxu1 }
 0x11b   : > { %v1001_v40 = vpop.f32.mrf.mxu0 }
 0x11c   : > { %v949_v41 = vpack.c.bf16 %v746_v36, %v746_v36  ;;  %v732_v42 = vadd.f32 %v1051_v38, %v652_v37  ;;  %v1053_v43 = vpop.f32.mrf.mxu1 }
 0x11e   : > { %803 = vst.msk [vmem:[%s1304_s10 + $0x24] sm:$0xf] %vm793_vm0, %v949_v41  ;;  %v747_v44 = vmax.f32 %v732_v42, 0.0 }
 0x120   : > { %v950_v45 = vpack.c.bf16 %v747_v44, %v747_v44 }
 0x122   : > { %804 = vst.msk [vmem:[%s1304_s10 + $0x28] sm:$0xf] %vm793_vm0, %v950_v45 }
 0x123 PF: > { %s13_s12 = sadd.s32 1, %s1135_s12  }
 0x124   : > { %p10_p4 = scmp.ge.s32.totalorder %s13_s12, 4  }
 0x126   :  { %12 = sbr.rel (!%p10_p4) target bundleno = 1 (0x1), region = 62 }

// kernel: dqn_forward.6
= control target key start
LH: loop header
LB: loop body
LE: loop exit
PB: predicated region body
PF: predicated region fallthrough
CT: control target
= control target key end

     0   :  { %s1186_s12 = smov 0   ;;  %s1356_s0 = inlined_call_operand.vmem [shape: bf16[112,576], index: 0, kind: input, shape index: {}]   ;;  %s1357_s1 = inlined_call_operand.vmem [shape: bf16[576,64], index: 1, kind: input, shape index: {}]   ;;  %s1358_s2 = inlined_call_operand.vmem [shape: f32[1,64], index: 2, kind: input, shape index: {}]   ;;  %s1359_s3 = inlined_call_operand.vmem [shape: bf16[112,64], index: 3, kind: output, shape index: {}]  }
   0x1 LB: > { %s891_s13 = sadd.s32 4294967295, %s1164_s12   ;;  %p895_p0 = scmp.ge.s32.totalorder %s1164_s12, 1  ;;  %s1164_s12 = sphi %s1186_s12, %s13_s12  }
   0x2   : > { %p139_p1 = scmp.lt.s32.totalorder %s1164_s12, 3 }
   0x4   : > { %p140_p2 = pnand %p895_p0, %p139_p1 }
   0x5   : > { %s164_s17 = smul.u32 (!%p140_p2), 7, %s891_s13 }
   0x6   : > { %143 = sbr.rel (%p140_p2) target bundleno = 284 (0x11c), region = 32 }
   0x7   : > { %p165_p3 = scmp.lt.s32.totalorder (!%p140_p2), %s164_s17, 13 }
   0xb   : > { %v1096_v0 = vld [vmem:[%s1357_s1 + $0x78] sm:$0xff]   ;;  %v1100_v4 = vld [vmem:[%s1357_s1 + $0x70] sm:$0xff]   ;;  %v1104_v8 = vld [vmem:[%s1357_s1 + $0x68] sm:$0xff]   ;;  %s1361_s17 = smov (!%p165_p3, %s164_s17), 13  ;;  %vm586_vm0 = vcmask 523264   ;;  %vm827_vm1 = vcmask 519168  }
   0xc   : > { %v1097_v1 = vld [vmem:[%s1357_s1 + $0xf8] sm:$0xff]   ;;  %975 = vmatprep.subr.bf16.mxu0 %v1096_v0  ;;  %v1101_v5 = vld [vmem:[%s1357_s1 + $0xf0] sm:$0xff]   ;;  %v1105_v9 = vld [vmem:[%s1357_s1 + $0xe8] sm:$0xff]   ;;  %s1087_s16 = smul.u32 20, %s1361_s17  ;;  %s897_s18 = sshll.u32 %s1361_s17, 2 }
   0xd   : > { %v1098_v2 = vld [vmem:[%s1357_s1 + $0x38] sm:$0xff]   ;;  %1015 = vmatprep.subr.bf16.mxu1 %v1097_v1  ;;  %v1102_v6 = vld [vmem:[%s1357_s1 + $0x30] sm:$0xff]   ;;  %v1106_v10 = vld [vmem:[%s1357_s1 + $0x28] sm:$0xff]   ;;  %s1337_s21 = scalar_lea.vmem %s1359_s3, %s897_s18 }
   0xe   : > { %v1099_v3 = vld [vmem:[%s1357_s1 + $0xb8] sm:$0xff]   ;;  %976 = vmatpush3.bf16.msra.mxu0 %v1098_v2  ;;  %v1103_v7 = vld [vmem:[%s1357_s1 + $0xb0] sm:$0xff]   ;;  %v1107_v11 = vld [vmem:[%s1357_s1 + $0xa8] sm:$0xff]   ;;  %s1292_s27 = scalar_lea.vmem %s1356_s0, %s1087_s16 }
   0xf   : > { %1016 = vmatpush3.bf16.msra.mxu1 %v1099_v3  ;;  %977 = vmatprep.subr.bf16.mxu0 %v1100_v4  ;;  %v1108_v12 = vld [vmem:[%s1357_s1 + $0x60] sm:$0xff]   ;;  %v1112_v16 = vld [vmem:[%s1357_s1 + $0x58] sm:$0xff]   ;;  %v1116_v20 = vld [vmem:[%s1357_s1 + $0x50] sm:$0xff]  }
  0x10   : > { %1017 = vmatprep.subr.bf16.mxu1 %v1101_v5  ;;  %v1109_v13 = vld [vmem:[%s1357_s1 + $0xe0] sm:$0xff]   ;;  %v1113_v17 = vld [vmem:[%s1357_s1 + $0xd8] sm:$0xff]   ;;  %v1117_v21 = vld [vmem:[%s1357_s1 + $0xd0] sm:$0xff]  }
  0x11   : > { %v1110_v14 = vld [vmem:[%s1357_s1 + $0x20] sm:$0xff]   ;;  %v1114_v18 = vld [vmem:[%s1357_s1 + $0x18] sm:$0xff]   ;;  %v1118_v22 = vld [vmem:[%s1357_s1 + $0x10] sm:$0xff]  }
  0x12   : > { %978 = vmatpush3.bf16.msra.mxu0 %v1102_v6  ;;  %v1111_v15 = vld [vmem:[%s1357_s1 + $0xa0] sm:$0xff]   ;;  %v1115_v19 = vld [vmem:[%s1357_s1 + $0x98] sm:$0xff]   ;;  %v1119_v23 = vld [vmem:[%s1357_s1 + $0x90] sm:$0xff]  }
  0x13   : > { %1018 = vmatpush3.bf16.msra.mxu1 %v1103_v7  ;;  %979 = vmatprep.subr.bf16.mxu0 %v1104_v8  ;;  %v1120_v24 = vld [vmem:[%s1357_s1 + $0x48] sm:$0xff]   ;;  %v1124_v28 = vld [vmem:[%s1357_s1 + $0x40] sm:$0xff]   ;;  %v1134_v36 = vld [vmem:[%s1357_s1 + $0x118] sm:$0xff]  }
  0x14   : > { %1019 = vmatprep.subr.bf16.mxu1 %v1105_v9  ;;  %v1121_v25 = vld [vmem:[%s1357_s1 + $0xc8] sm:$0xff]   ;;  %v1125_v29 = vld [vmem:[%s1357_s1 + $0xc0] sm:$0xff]   ;;  %v1141_v39 = vld [vmem:[%s1357_s1 + $0x110] sm:$0xff]  }
  0x15   : > { %v1122_v26 = vld [vmem:[%s1357_s1 + $0x8] sm:$0xff]   ;;  %v1126_v30 = vld [vmem:[%s1357_s1] sm:$0xff]   ;;  %v1144_v43 = vld [vmem:[%s1292_s27 + $0x5c] ss:$20 sps:$4 sm:$0xff]  }
  0x16   : > { %980 = vmatpush3.bf16.msra.mxu0 %v1106_v10  ;;  %v1123_v27 = vld [vmem:[%s1357_s1 + $0x88] sm:$0xff]   ;;  %v1127_v31 = vld [vmem:[%s1357_s1 + $0x80] sm:$0xff]   ;;  %v196_v46 = vld [vmem:[%s1292_s27 + $0x78] sm:$0xff] }
  0x17   : > { %1020 = vmatpush3.bf16.msra.mxu1 %v1107_v11  ;;  %981 = vmatprep.subr.bf16.mxu0 %v1108_v12  ;;  %v1128_v32 = vld [vmem:[%s1292_s27] ss:$20 sps:$4 sm:$0xff]   ;;  %v1130_v33 = vld [vmem:[%s1292_s27 + $0x4] ss:$20 sps:$4 sm:$0xff]   ;;  %v1131_v34 = vld [vmem:[%s1292_s27 + $0x8] ss:$20 sps:$4 sm:$0xff]   ;;  %v915_v50 = vcombine.high %v196_v46, %v196_v46  ;;  %v914_v52 = vcombine.low %v196_v46, %v196_v46 }
  0x18   : > { %1021 = vmatprep.subr.bf16.mxu1 %v1109_v13  ;;  %v1133_v35 = vld [vmem:[%s1292_s27 + $0xc] ss:$20 sps:$4 sm:$0xff]   ;;  %631 = vmatprep.mubr.bf16.mxu0 %v1130_v33  ;;  %v1137_v38 = vld [vmem:[%s1292_s27 + $0x34] ss:$20 sps:$4 sm:$0xff]   ;;  %v1140_v41 = vld [vmem:[%s1292_s27 + $0x30] ss:$20 sps:$4 sm:$0xff]  }
  0x19   : > { %695 = vmatprep.mubr.bf16.mxu1 %v1133_v35  ;;  %v1135_v37 = vld [vmem:[%s1292_s27 + $0x2c] ss:$20 sps:$4 sm:$0xff]   ;;  %v1139_v40 = vld [vmem:[%s1292_s27 + $0x28] ss:$20 sps:$4 sm:$0xff]   ;;  %v1146_v48 = vld [vmem:[%s1292_s27 + $0x50] ss:$20 sps:$4 sm:$0xff]  }
  0x1a   : > { %982 = vmatpush3.bf16.msra.mxu0 %v1110_v14  ;;  %v1142_v42 = vld [vmem:[%s1292_s27 + $0x54] ss:$20 sps:$4 sm:$0xff]   ;;  %v1153_v45 = vld [vmem:[%s1357_s1 + $0x100] sm:$0xff]   ;;  %v1147_v49 = vld [vmem:[%s1292_s27 + $0x58] ss:$20 sps:$4 sm:$0xff]  }
  0x1b   : > { %1022 = vmatpush3.bf16.msra.mxu1 %v1111_v15  ;;  %983 = vmatprep.subr.bf16.mxu0 %v1112_v16  ;;  %v1148_v44 = vld [vmem:[%s1357_s1 + $0x108] sm:$0xff]   ;;  %v197_v47 = vld [vmem:[%s1292_s27 + $0x80] sm:$0xff] }
  0x1c   : > { %1023 = vmatprep.subr.bf16.mxu1 %v1113_v17  ;;  %v917_v51 = vcombine.high %v197_v47, %v197_v47  ;;  %v916_v53 = vcombine.low %v197_v47, %v197_v47  ;;  %v1154_v54 = vld [vmem:[%s1292_s27 + $0x10] ss:$20 sps:$4 sm:$0xff]   ;;  %v1155_v55 = vld [vmem:[%s1292_s27 + $0x60] ss:$20 sps:$4 sm:$0xff]   ;;  %v1156_v56 = vld [vmem:[%s1292_s27 + $0x38] ss:$20 sps:$4 sm:$0xff]  }
  0x1d   : > { %v1157_v57 = vld [vmem:[%s1292_s27 + $0x88] ss:$0 sps:$4 sm:$0xff]  }
  0x1e   : > { %984 = vmatpush3.bf16.msra.mxu0 %v1114_v18 }
  0x1f   : > { %1024 = vmatpush3.bf16.msra.mxu1 %v1115_v19  ;;  %985 = vmatprep.subr.bf16.mxu0 %v1116_v20 }
  0x20   : > { %1025 = vmatprep.subr.bf16.mxu1 %v1117_v21  ;;  %v898_v21 = vld [vmem:[%s1358_s2] ss:$0 sm:$0xff] }
  0x22   : > { %986 = vmatpush3.bf16.msra.mxu0 %v1118_v22 }
  0x23   : > { %1026 = vmatpush3.bf16.msra.mxu1 %v1119_v23  ;;  %987 = vmatprep.subr.bf16.mxu0 %v1120_v24 }
  0x24   : > { %1027 = vmatprep.subr.bf16.mxu1 %v1121_v25 }
  0x26   : > { %988 = vmatpush3.bf16.msra.mxu0 %v1122_v26 }
  0x27   : > { %1028 = vmatpush3.bf16.msra.mxu1 %v1123_v27  ;;  %989 = vmatprep.subr.bf16.mxu0 %v1124_v28 }
  0x28   : > { %1029 = vmatprep.subr.bf16.mxu1 %v1125_v29 }
  0x2a   : > { %990 = vmatpush3.bf16.msra.mxu0 %v1126_v30 }
  0x2b   : > { %1030 = vmatpush3.bf16.msra.mxu1 %v1127_v31  ;;  %1063 = vmatprep.subr.bf16.mxu0 %v1134_v36 }
  0x2c   : > { %1079 = vmatprep.subr.bf16.mxu1 %v1134_v36 }
  0x2d   : > { %632 = vmatmul.mubr.bf16.vlgmr.msra.gmra.mxu0 %v1128_v32 }
  0x2e   : > { %696 = vmatmul.mubr.bf16.vlgmr.msra.gmra.mxu1 %v1131_v34  ;;  %1064 = vmatpush3.bf16.msra.mxu0 %v1134_v36 }
  0x2f   : > { %1083 = vmatpush3.bf16.msra.mxu1 %v1134_v36  ;;  %639 = vmatprep.mubr.bf16.mxu0 %v1135_v37 }
  0x30   : > { %703 = vmatprep.mubr.bf16.mxu1 %v1137_v38  ;;  %1065 = vmatprep.subr.bf16.mxu0 %v1141_v39 }
  0x31   : > { %1080 = vmatprep.subr.bf16.mxu1 %v1141_v39 }
  0x32   : > { %1066 = vmatpush3.bf16.msra.mxu0 %v1141_v39 }
  0x33   : > { %1084 = vmatpush3.bf16.msra.mxu1 %v1141_v39  ;;  %1067 = vmatprep.subr.bf16.mxu0 %v1148_v44 }
  0x34   : > { %1081 = vmatprep.subr.bf16.mxu1 %v1148_v44 }
  0x35   : > { %640 = vmatmul.mubr.bf16.gmra.mxu0 %v1139_v40 }
  0x36   : > { %704 = vmatmul.mubr.bf16.gmra.mxu1 %v1140_v41  ;;  %647 = vmatprep.mubr.bf16.mxu0 %v1142_v42 }
  0x37   : > { %711 = vmatprep.mubr.bf16.mxu1 %v1144_v43  ;;  %1068 = vmatpush3.bf16.msra.mxu0 %v1148_v44 }
  0x38   : > { %1085 = vmatpush3.bf16.msra.mxu1 %v1148_v44  ;;  %1069 = vmatprep.subr.bf16.mxu0 %v1153_v45 }
  0x39   : > { %1082 = vmatprep.subr.bf16.mxu1 %v1153_v45 }
  0x3b   : > { %1070 = vmatpush3.bf16.msra.mxu0 %v1153_v45 }
  0x3c   : > { %1086 = vmatpush3.bf16.msra.mxu1 %v1153_v45 }
  0x3d   : > { %648 = vmatmul.mubr.bf16.gmra.mxu0 %v1146_v48 }
  0x3e   : > { %712 = vmatmul.mubr.bf16.gmra.mxu1 %v1147_v49  ;;  %655 = vmatprep.mubr.bf16.mxu0 %v915_v50 }
  0x3f   : > { %719 = vmatprep.mubr.bf16.mxu1 %v917_v51 }
  0x45   : > { %656 = vmatmul.mubr.bf16.gmra.mxu0 %v914_v52 }
  0x46   : > { %720 = vmatmul.mubr.bf16.gmra.mxu1 %v916_v53  ;;  %1071 = vmatprep.mubr.msk.bf16.mxu0 %vm586_vm0, %v1154_v54 }
  0x47   : > { %1075 = vmatprep.mubr.msk.bf16.mxu1 %vm586_vm0, %v1155_v55 }
  0x4d   : > { %1072 = vmatmul.mubr.msk.bf16.vlgmr.msra.gmra.mxu0 %vm586_vm0, %v1156_v56 }
  0x4e   : > { %1076 = vmatmul.mubr.msk.bf16.vlgmr.msra.gmra.mxu1 %vm586_vm0, %v1157_v57 }
  0xed   : > { %v991_v58 = vpop.f32.mrf.mxu0 }
  0xee   : > { %v1031_v59 = vpop.f32.mrf.mxu1 }
  0xef   : > { %v992_v60 = vpop.f32.mrf.mxu0 }
  0xf0   : > { %v1032_v61 = vpop.f32.mrf.mxu1  ;;  %v993_v19 = vadd.f32 %v992_v60, %v991_v58 }
  0xf1   : > { %v994_v62 = vpop.f32.mrf.mxu0  ;;  %v1033_v39 = vadd.f32 %v1032_v61, %v1031_v59 }
  0xf2   : > { %v1034_v63 = vpop.f32.mrf.mxu1  ;;  %v634_v29 = vadd.f32 %v993_v19, %v898_v21 }
  0xf3   : > { %v995_v0 = vpop.f32.mrf.mxu0 }
  0xf4   : > { %v1035_v1 = vpop.f32.mrf.mxu1  ;;  %v996_v31 = vadd.f32 %v995_v0, %v994_v62  ;;  %v698_v50 = vadd.f32 %v1033_v39, %v634_v29 }
  0xf5   : > { %v997_v2 = vpop.f32.mrf.mxu0  ;;  %v1036_v55 = vadd.f32 %v1035_v1, %v1034_v63 }
  0xf6   : > { %v1037_v3 = vpop.f32.mrf.mxu1  ;;  %v637_v46 = vadd.f32 %v996_v31, %v898_v21 }
  0xf7   : > { %v998_v4 = vpop.f32.mrf.mxu0 }
  0xf8   : > { %v1038_v5 = vpop.f32.mrf.mxu1  ;;  %v999_v17 = vadd.f32 %v998_v4, %v997_v2  ;;  %v701_v4 = vadd.f32 %v1036_v55, %v637_v46 }
  0xf9   : > { %v1000_v6 = vpop.f32.mrf.mxu0  ;;  %v1039_v32 = vadd.f32 %v1038_v5, %v1037_v3 }
  0xfa   : > { %v1040_v7 = vpop.f32.mrf.mxu1  ;;  %v642_v25 = vadd.f32 %v999_v17, %v898_v21 }
  0xfb   : > { %v1001_v8 = vpop.f32.mrf.mxu0 }
  0xfc   : > { %v1041_v9 = vpop.f32.mrf.mxu1  ;;  %v1002_v26 = vadd.f32 %v1001_v8, %v1000_v6  ;;  %v706_v42 = vadd.f32 %v1039_v32, %v642_v25 }
  0xfd   : > { %v1003_v10 = vpop.f32.mrf.mxu0  ;;  %v1042_v47 = vadd.f32 %v1041_v9, %v1040_v7 }
  0xfe   : > { %v1043_v11 = vpop.f32.mrf.mxu1  ;;  %v645_v40 = vadd.f32 %v1002_v26, %v898_v21 }
  0xff   : > { %v1004_v12 = vpop.f32.mrf.mxu0 }
 0x100   : > { %v1044_v13 = vpop.f32.mrf.mxu1  ;;  %v1005_v23 = vadd.f32 %v1004_v12, %v1003_v10  ;;  %v709_v59 = vadd.f32 %v1042_v47, %v645_v40 }
 0x101   : > { %v1006_v14 = vpop.f32.mrf.mxu0  ;;  %v1045_v44 = vadd.f32 %v1044_v13, %v1043_v11 }
 0x102   : > { %v1046_v15 = vpop.f32.mrf.mxu1  ;;  %v650_v36 = vadd.f32 %v1005_v23, %v898_v21 }
 0x103   : > { %v1007_v16 = vpop.f32.mrf.mxu0 }
 0x104   : > { %v1047_v18 = vpop.f32.mrf.mxu1  ;;  %v1008_v37 = vadd.f32 %v1007_v16, %v1006_v14  ;;  %v714_v54 = vadd.f32 %v1045_v44, %v650_v36 }
 0x105   : > { %v1009_v20 = vpop.f32.mrf.mxu0  ;;  %v1048_v60 = vadd.f32 %v1047_v18, %v1046_v15 }
 0x106   : > { %v1049_v22 = vpop.f32.mrf.mxu1  ;;  %v653_v51 = vadd.f32 %v1008_v37, %v898_v21 }
 0x107   : > { %v1010_v24 = vpop.f32.mrf.mxu0 }
 0x108   : > { %v1011_v27 = vadd.f32 %v1010_v24, %v1009_v20  ;;  %v1050_v28 = vpop.f32.mrf.mxu1  ;;  %v717_v8 = vadd.f32 %v1048_v60, %v653_v51 }
 0x109   : > { %v1012_v30 = vpop.f32.mrf.mxu0  ;;  %v1051_v34 = vadd.f32 %v1050_v28, %v1049_v22 }
 0x10a   : > { %v658_v33 = vadd.f32 %v1011_v27, %v898_v21  ;;  %v1052_v35 = vpop.f32.mrf.mxu1 }
 0x10b   : > { %v1013_v38 = vpop.f32.mrf.mxu0 }
 0x10c   : > { %v1053_v41 = vpop.f32.mrf.mxu1  ;;  %v722_v43 = vadd.f32 %v1051_v34, %v658_v33 }
 0x10d   : > { %v1073_v45 = vpop.f32.mrf.mxu0 }
 0x10e   : > { %v770_v48 = vadd.f32 %v1073_v45, %v706_v42  ;;  %v1077_v49 = vpop.f32.mrf.mxu1 }
 0x10f   : > { %v786_v52 = vadd.f32 %v1077_v49, %v722_v43  ;;  %v761_v53 = vpop.f32.mrf.mxu0 }
 0x110   : > { %v793_v56 = vmax.f32 %v770_v48, 0.0  ;;  %v762_v57 = vadd.f32 %v761_v53, %v698_v50  ;;  %v777_v58 = vpop.f32.mrf.mxu1 }
 0x111   : > { %v797_v61 = vmax.f32 %v786_v52, 0.0  ;;  %v778_v62 = vadd.f32 %v777_v58, %v714_v54  ;;  %v1074_v0 = vpop.f32.mrf.mxu0 }
 0x112   : > { %v970_v2 = vpack.c.bf16 %v793_v56, %v793_v56  ;;  %v791_v3 = vmax.f32 %v762_v57, 0.0  ;;  %v773_v63 = vadd.f32 %v1074_v0, %v709_v59  ;;  %v1078_v1 = vpop.f32.mrf.mxu1 }
 0x113   : > { %v974_v5 = vpack.c.bf16 %v797_v61, %v797_v61  ;;  %v795_v6 = vmax.f32 %v778_v62, 0.0  ;;  %v764_v7 = vpop.f32.mrf.mxu0 }
 0x114   : > { %830 = vst.msk [vmem:[%s1337_s21 + $0x8] sm:$0xf] %vm827_vm1, %v970_v2  ;;  %v968_v9 = vpack.c.bf16 %v791_v3, %v791_v3  ;;  %v794_v10 = vmax.f32 %v773_v63, 0.0  ;;  %v765_v11 = vadd.f32 %v764_v7, %v701_v4  ;;  %v780_v12 = vpop.f32.mrf.mxu1 }
 0x115   : > { %834 = vst.msk [vmem:[%s1337_s21 + $0x18] sm:$0xf] %vm827_vm1, %v974_v5  ;;  %v972_v13 = vpack.c.bf16 %v795_v6, %v795_v6  ;;  %v781_v14 = vadd.f32 %v780_v12, %v717_v8 }
 0x116   : > { %828 = vst.msk [vmem:[%s1337_s21] sm:$0xf] %vm827_vm1, %v968_v9  ;;  %v971_v15 = vpack.c.bf16 %v794_v10, %v794_v10  ;;  %v792_v16 = vmax.f32 %v765_v11, 0.0 }
 0x117   : > { %832 = vst.msk [vmem:[%s1337_s21 + $0x10] sm:$0xf] %vm827_vm1, %v972_v13  ;;  %v796_v17 = vmax.f32 %v781_v14, 0.0 }
 0x118   : > { %831 = vst.msk [vmem:[%s1337_s21 + $0xc] sm:$0xf] %vm827_vm1, %v971_v15  ;;  %v969_v18 = vpack.c.bf16 %v792_v16, %v792_v16 }
 0x119   : > { %v973_v19 = vpack.c.bf16 %v796_v17, %v796_v17 }
 0x11a   : > { %829 = vst.msk [vmem:[%s1337_s21 + $0x4] sm:$0xf] %vm827_vm1, %v969_v18 }
 0x11b   : > { %833 = vst.msk [vmem:[%s1337_s21 + $0x14] sm:$0xf] %vm827_vm1, %v973_v19 }
 0x11c PF: > { %s13_s12 = sadd.s32 1, %s1164_s12  }
 0x11d   : > { %p10_p4 = scmp.ge.s32.totalorder %s13_s12, 4  }
 0x11f   :  { %12 = sbr.rel (!%p10_p4) target bundleno = 1 (0x1), region = 62 }

// kernel: dqn_forward.7
= control target key start
LH: loop header
LB: loop body
LE: loop exit
PB: predicated region body
PF: predicated region fallthrough
CT: control target
= control target key end

     0   :  { %vm4847_vm0 = vcmask 523264   ;;  %s11156_s1 = inlined_call_operand.vmem [shape: bf16[3136,512], index: 1, kind: input, shape index: {}]   ;;  %s11157_s0 = inlined_call_operand.vmem [shape: bf16[8,3136], index: 0, kind: input, shape index: {}]   ;;  %s11158_s2 = inlined_call_operand.vmem [shape: f32[1,512], index: 2, kind: input, shape index: {}]   ;;  %s11159_s3 = inlined_call_operand.vmem [shape: bf16[512,128], index: 3, kind: input, shape index: {}]   ;;  %s11160_s4 = inlined_call_operand.vmem [shape: f32[1,128], index: 4, kind: input, shape index: {}]   ;;  %s11161_s5 = inlined_call_operand.vmem [shape: f32[8,128], index: 5, kind: output, shape index: {}]  }
   0x1   :  { %v7170_v0 = vld [vmem:[%s11156_s1 + $0xe4] ss:$16 sps:$4 sm:$0xff]   ;;  %v7174_v2 = vld [vmem:[%s11156_s1 + $0xe0] ss:$16 sps:$4 sm:$0xff]   ;;  %v22_v48 = vld [vmem:[%s11157_s0 + $0x8] sm:$0xff] }
   0x2   :  { %v7172_v1 = vld [vmem:[%s11156_s1 + $0x2e4] ss:$16 sps:$4 sm:$0xff]   ;;  %4851 = vmatprep.subr.bf16.mxu0 %v7170_v0  ;;  %v7175_v3 = vld [vmem:[%s11156_s1 + $0x2e0] ss:$16 sps:$4 sm:$0xff]   ;;  %v8588_v51 = vcombine.high %v22_v48, %v22_v48 }
   0x3   :  { %4892 = vmatprep.subr.bf16.mxu1 %v7172_v1  ;;  %v7176_v4 = vld [vmem:[%s11156_s1 + $0xc4] ss:$16 sps:$4 sm:$0xff]   ;;  %4852 = vmatpush1.bf16.msra.mxu0 %v7174_v2  ;;  %v7180_v6 = vld [vmem:[%s11156_s1 + $0xc0] ss:$16 sps:$4 sm:$0xff]  }
   0x4   :  { %4893 = vmatpush1.bf16.msra.mxu1 %v7175_v3  ;;  %v7178_v5 = vld [vmem:[%s11156_s1 + $0x2c4] ss:$16 sps:$4 sm:$0xff]   ;;  %4853 = vmatprep.subr.bf16.mxu0 %v7176_v4  ;;  %v7181_v7 = vld [vmem:[%s11156_s1 + $0x2c0] ss:$16 sps:$4 sm:$0xff]  }
   0x5   :  { %4894 = vmatprep.subr.bf16.mxu1 %v7178_v5  ;;  %v7182_v8 = vld [vmem:[%s11156_s1 + $0xa4] ss:$16 sps:$4 sm:$0xff]   ;;  %v7186_v10 = vld [vmem:[%s11156_s1 + $0xa0] ss:$16 sps:$4 sm:$0xff]   ;;  %4924 = vmatprep.mubr.bf16.mxu1 %v8588_v51 }
   0x6   :  { %v7184_v9 = vld [vmem:[%s11156_s1 + $0x2a4] ss:$16 sps:$4 sm:$0xff]   ;;  %v7187_v11 = vld [vmem:[%s11156_s1 + $0x2a0] ss:$16 sps:$4 sm:$0xff]  }
   0x7   :  { %4854 = vmatpush1.bf16.msra.mxu0 %v7180_v6  ;;  %v7188_v12 = vld [vmem:[%s11156_s1 + $0x84] ss:$16 sps:$4 sm:$0xff]   ;;  %v7192_v14 = vld [vmem:[%s11156_s1 + $0x80] ss:$16 sps:$4 sm:$0xff]  }
   0x8   :  { %4895 = vmatpush1.bf16.msra.mxu1 %v7181_v7  ;;  %4855 = vmatprep.subr.bf16.mxu0 %v7182_v8  ;;  %v7190_v13 = vld [vmem:[%s11156_s1 + $0x284] ss:$16 sps:$4 sm:$0xff]   ;;  %v7193_v15 = vld [vmem:[%s11156_s1 + $0x280] ss:$16 sps:$4 sm:$0xff]   ;;  %v8648_v7 = vcombine.low %v22_v48, %v22_v48 }
   0x9   :  { %4896 = vmatprep.subr.bf16.mxu1 %v7184_v9  ;;  %v7194_v16 = vld [vmem:[%s11156_s1 + $0x64] ss:$16 sps:$4 sm:$0xff]   ;;  %v7198_v18 = vld [vmem:[%s11156_s1 + $0x60] ss:$16 sps:$4 sm:$0xff]  }
   0xa   :  { %v7196_v17 = vld [vmem:[%s11156_s1 + $0x264] ss:$16 sps:$4 sm:$0xff]   ;;  %v7199_v19 = vld [vmem:[%s11156_s1 + $0x260] ss:$16 sps:$4 sm:$0xff]  }
   0xb   :  { %4856 = vmatpush1.bf16.msra.mxu0 %v7186_v10  ;;  %v7200_v20 = vld [vmem:[%s11156_s1 + $0x44] ss:$16 sps:$4 sm:$0xff]   ;;  %v7204_v22 = vld [vmem:[%s11156_s1 + $0x40] ss:$16 sps:$4 sm:$0xff]  }
   0xc   :  { %4897 = vmatpush1.bf16.msra.mxu1 %v7187_v11  ;;  %4857 = vmatprep.subr.bf16.mxu0 %v7188_v12  ;;  %v7202_v21 = vld [vmem:[%s11156_s1 + $0x244] ss:$16 sps:$4 sm:$0xff]   ;;  %v7205_v23 = vld [vmem:[%s11156_s1 + $0x240] ss:$16 sps:$4 sm:$0xff]  }
   0xd   :  { %4898 = vmatprep.subr.bf16.mxu1 %v7190_v13  ;;  %v7206_v24 = vld [vmem:[%s11156_s1 + $0x24] ss:$16 sps:$4 sm:$0xff]   ;;  %v7210_v26 = vld [vmem:[%s11156_s1 + $0x20] ss:$16 sps:$4 sm:$0xff]  }
   0xe   :  { %v7208_v25 = vld [vmem:[%s11156_s1 + $0x224] ss:$16 sps:$4 sm:$0xff]   ;;  %v7211_v27 = vld [vmem:[%s11156_s1 + $0x220] ss:$16 sps:$4 sm:$0xff]  }
   0xf   :  { %4858 = vmatpush1.bf16.msra.mxu0 %v7192_v14  ;;  %v7212_v28 = vld [vmem:[%s11156_s1 + $0x4] ss:$16 sps:$4 sm:$0xff]   ;;  %v7216_v30 = vld [vmem:[%s11156_s1] ss:$16 sps:$4 sm:$0xff]  }
  0x10   :  { %4899 = vmatpush1.bf16.msra.mxu1 %v7193_v15  ;;  %4859 = vmatprep.subr.bf16.mxu0 %v7194_v16  ;;  %v7214_v29 = vld [vmem:[%s11156_s1 + $0x204] ss:$16 sps:$4 sm:$0xff]   ;;  %v7217_v31 = vld [vmem:[%s11156_s1 + $0x200] ss:$16 sps:$4 sm:$0xff]  }
  0x11   :  { %4900 = vmatprep.subr.bf16.mxu1 %v7196_v17  ;;  %v7218_v32 = vld [vmem:[%s11156_s1 + $0x1e4] ss:$16 sps:$4 sm:$0xff]   ;;  %v7222_v34 = vld [vmem:[%s11156_s1 + $0x1e0] ss:$16 sps:$4 sm:$0xff]  }
  0x12   :  { %v7220_v33 = vld [vmem:[%s11156_s1 + $0x3e4] ss:$16 sps:$4 sm:$0xff]   ;;  %v7223_v35 = vld [vmem:[%s11156_s1 + $0x3e0] ss:$16 sps:$4 sm:$0xff]  }
  0x13   :  { %4860 = vmatpush1.bf16.msra.mxu0 %v7198_v18  ;;  %v7224_v36 = vld [vmem:[%s11156_s1 + $0x1c4] ss:$16 sps:$4 sm:$0xff]   ;;  %v7228_v38 = vld [vmem:[%s11156_s1 + $0x1c0] ss:$16 sps:$4 sm:$0xff]  }
  0x14   :  { %4901 = vmatpush1.bf16.msra.mxu1 %v7199_v19  ;;  %4861 = vmatprep.subr.bf16.mxu0 %v7200_v20  ;;  %v7226_v37 = vld [vmem:[%s11156_s1 + $0x3c4] ss:$16 sps:$4 sm:$0xff]   ;;  %v7229_v39 = vld [vmem:[%s11156_s1 + $0x3c0] ss:$16 sps:$4 sm:$0xff]  }
  0x15   :  { %4902 = vmatprep.subr.bf16.mxu1 %v7202_v21  ;;  %v7230_v40 = vld [vmem:[%s11156_s1 + $0x1a4] ss:$16 sps:$4 sm:$0xff]   ;;  %v7234_v42 = vld [vmem:[%s11156_s1 + $0x1a0] ss:$16 sps:$4 sm:$0xff]  }
  0x16   :  { %v7232_v41 = vld [vmem:[%s11156_s1 + $0x3a4] ss:$16 sps:$4 sm:$0xff]   ;;  %v7235_v43 = vld [vmem:[%s11156_s1 + $0x3a0] ss:$16 sps:$4 sm:$0xff]  }
  0x17   :  { %4862 = vmatpush1.bf16.msra.mxu0 %v7204_v22  ;;  %v7236_v44 = vld [vmem:[%s11156_s1 + $0x184] ss:$16 sps:$4 sm:$0xff]   ;;  %v7240_v49 = vld [vmem:[%s11156_s1 + $0x180] ss:$16 sps:$4 sm:$0xff]  }
  0x18   :  { %4903 = vmatpush1.bf16.msra.mxu1 %v7205_v23  ;;  %4863 = vmatprep.subr.bf16.mxu0 %v7206_v24  ;;  %v7238_v45 = vld [vmem:[%s11156_s1 + $0x384] ss:$16 sps:$4 sm:$0xff]   ;;  %v7241_v50 = vld [vmem:[%s11156_s1 + $0x380] ss:$16 sps:$4 sm:$0xff]  }
  0x19   :  { %4904 = vmatprep.subr.bf16.mxu1 %v7208_v25  ;;  %v21_v46 = vld [vmem:[%s11157_s0] sm:$0xff] }
  0x1a   :  { %v8577_v47 = vcombine.high %v21_v46, %v21_v46  ;;  %v7242_v52 = vld [vmem:[%s11156_s1 + $0x164] ss:$16 sps:$4 sm:$0xff]   ;;  %v7246_v54 = vld [vmem:[%s11156_s1 + $0x160] ss:$16 sps:$4 sm:$0xff]   ;;  %v8646_v6 = vcombine.low %v21_v46, %v21_v46 }
  0x1b   :  { %4864 = vmatpush1.bf16.msra.mxu0 %v7210_v26  ;;  %v7244_v53 = vld [vmem:[%s11156_s1 + $0x364] ss:$16 sps:$4 sm:$0xff]   ;;  %v7247_v55 = vld [vmem:[%s11156_s1 + $0x360] ss:$16 sps:$4 sm:$0xff]  }
  0x1c   :  { %4905 = vmatpush1.bf16.msra.mxu1 %v7211_v27  ;;  %4865 = vmatprep.subr.bf16.mxu0 %v7212_v28  ;;  %v7248_v56 = vld [vmem:[%s11156_s1 + $0x144] ss:$16 sps:$4 sm:$0xff]   ;;  %v7252_v58 = vld [vmem:[%s11156_s1 + $0x140] ss:$16 sps:$4 sm:$0xff]  }
  0x1d   :  { %4906 = vmatprep.subr.bf16.mxu1 %v7214_v29  ;;  %4883 = vmatprep.mubr.bf16.mxu0 %v8577_v47  ;;  %v7250_v57 = vld [vmem:[%s11156_s1 + $0x344] ss:$16 sps:$4 sm:$0xff]   ;;  %v7253_v59 = vld [vmem:[%s11156_s1 + $0x340] ss:$16 sps:$4 sm:$0xff]  }
  0x1e   :  { %v7254_v60 = vld [vmem:[%s11156_s1 + $0x124] ss:$16 sps:$4 sm:$0xff]   ;;  %v7258_v62 = vld [vmem:[%s11156_s1 + $0x120] ss:$16 sps:$4 sm:$0xff]  }
  0x1f   :  { %4866 = vmatpush1.bf16.msra.mxu0 %v7216_v30  ;;  %v7256_v61 = vld [vmem:[%s11156_s1 + $0x324] ss:$16 sps:$4 sm:$0xff]   ;;  %v7259_v63 = vld [vmem:[%s11156_s1 + $0x320] ss:$16 sps:$4 sm:$0xff]  }
  0x20   :  { %4907 = vmatpush1.bf16.msra.mxu1 %v7217_v31  ;;  %4867 = vmatprep.subr.bf16.mxu0 %v7218_v32  ;;  %v7260_v0 = vld [vmem:[%s11156_s1 + $0x104] ss:$16 sps:$4 sm:$0xff]   ;;  %v7264_v2 = vld [vmem:[%s11156_s1 + $0x100] ss:$16 sps:$4 sm:$0xff]  }
  0x21   :  { %4908 = vmatprep.subr.bf16.mxu1 %v7220_v33  ;;  %v7262_v1 = vld [vmem:[%s11156_s1 + $0x304] ss:$16 sps:$4 sm:$0xff]   ;;  %v7265_v3 = vld [vmem:[%s11156_s1 + $0x300] ss:$16 sps:$4 sm:$0xff]   ;;  %v8732_v33 = vld [vmem:[%s11157_s0 + $0x18] sm:$0xff] }
  0x22   :  { %v7272_v4 = vld [vmem:[%s11156_s1 + $0x4e4] ss:$16 sps:$4 sm:$0xff]   ;;  %v7270_v8 = vld [vmem:[%s11156_s1 + $0x4e0] ss:$16 sps:$4 sm:$0xff]  }
  0x23   :  { %4868 = vmatpush2.bf16.msra.mxu0 %v7222_v34  ;;  %v7275_v5 = vld [vmem:[%s11156_s1 + $0x6e4] ss:$16 sps:$4 sm:$0xff]   ;;  %v7273_v9 = vld [vmem:[%s11156_s1 + $0x6e0] ss:$16 sps:$4 sm:$0xff]  }
  0x24   :  { %4909 = vmatpush2.bf16.msra.mxu1 %v7223_v35  ;;  %4869 = vmatprep.subr.bf16.mxu0 %v7224_v36  ;;  %v7278_v10 = vld [vmem:[%s11156_s1 + $0x4c4] ss:$16 sps:$4 sm:$0xff]   ;;  %v7276_v12 = vld [vmem:[%s11156_s1 + $0x4c0] ss:$16 sps:$4 sm:$0xff]  }
  0x25   :  { %4910 = vmatprep.subr.bf16.mxu1 %v7226_v37  ;;  %v7281_v11 = vld [vmem:[%s11156_s1 + $0x6c4] ss:$16 sps:$4 sm:$0xff]   ;;  %v7279_v13 = vld [vmem:[%s11156_s1 + $0x6c0] ss:$16 sps:$4 sm:$0xff]   ;;  %v8746_v37 = vcombine.high %v8732_v33, %v8732_v33 }
  0x26   :  { %v7284_v14 = vld [vmem:[%s11156_s1 + $0x4a4] ss:$16 sps:$4 sm:$0xff]   ;;  %v7282_v16 = vld [vmem:[%s11156_s1 + $0x4a0] ss:$16 sps:$4 sm:$0xff]  }
  0x27   :  { %4870 = vmatpush2.bf16.msra.mxu0 %v7228_v38  ;;  %v7287_v15 = vld [vmem:[%s11156_s1 + $0x6a4] ss:$16 sps:$4 sm:$0xff]   ;;  %v7285_v17 = vld [vmem:[%s11156_s1 + $0x6a0] ss:$16 sps:$4 sm:$0xff]  }
  0x28   :  { %4911 = vmatpush2.bf16.msra.mxu1 %v7229_v39  ;;  %4871 = vmatprep.subr.bf16.mxu0 %v7230_v40  ;;  %v7290_v18 = vld [vmem:[%s11156_s1 + $0x484] ss:$16 sps:$4 sm:$0xff]   ;;  %v7288_v20 = vld [vmem:[%s11156_s1 + $0x480] ss:$16 sps:$4 sm:$0xff]  }
  0x29   :  { %4912 = vmatprep.subr.bf16.mxu1 %v7232_v41  ;;  %v7293_v19 = vld [vmem:[%s11156_s1 + $0x684] ss:$16 sps:$4 sm:$0xff]   ;;  %v7291_v21 = vld [vmem:[%s11156_s1 + $0x680] ss:$16 sps:$4 sm:$0xff]  }
  0x2a   :  { %v7296_v22 = vld [vmem:[%s11156_s1 + $0x464] ss:$16 sps:$4 sm:$0xff]   ;;  %v7294_v24 = vld [vmem:[%s11156_s1 + $0x460] ss:$16 sps:$4 sm:$0xff]  }
  0x2b   :  { %4872 = vmatpush2.bf16.msra.mxu0 %v7234_v42  ;;  %v7299_v23 = vld [vmem:[%s11156_s1 + $0x664] ss:$16 sps:$4 sm:$0xff]   ;;  %v7297_v25 = vld [vmem:[%s11156_s1 + $0x660] ss:$16 sps:$4 sm:$0xff]  }
  0x2c   :  { %4913 = vmatpush2.bf16.msra.mxu1 %v7235_v43  ;;  %4873 = vmatprep.subr.bf16.mxu0 %v7236_v44  ;;  %v7302_v26 = vld [vmem:[%s11156_s1 + $0x444] ss:$16 sps:$4 sm:$0xff]   ;;  %v7300_v28 = vld [vmem:[%s11156_s1 + $0x440] ss:$16 sps:$4 sm:$0xff]  }
  0x2d   :  { %4914 = vmatprep.subr.bf16.mxu1 %v7238_v45  ;;  %v7305_v27 = vld [vmem:[%s11156_s1 + $0x644] ss:$16 sps:$4 sm:$0xff]   ;;  %v7303_v29 = vld [vmem:[%s11156_s1 + $0x640] ss:$16 sps:$4 sm:$0xff]  }
  0x2e   :  { %v7308_v30 = vld [vmem:[%s11156_s1 + $0x424] ss:$16 sps:$4 sm:$0xff]   ;;  %v7306_v34 = vld [vmem:[%s11156_s1 + $0x420] ss:$16 sps:$4 sm:$0xff]  }
  0x2f   :  { %4874 = vmatpush2.bf16.msra.mxu0 %v7240_v49  ;;  %v7311_v31 = vld [vmem:[%s11156_s1 + $0x624] ss:$16 sps:$4 sm:$0xff]   ;;  %v7309_v35 = vld [vmem:[%s11156_s1 + $0x620] ss:$16 sps:$4 sm:$0xff]  }
  0x30   :  { %4915 = vmatpush2.bf16.msra.mxu1 %v7241_v50  ;;  %4875 = vmatprep.subr.bf16.mxu0 %v7242_v52  ;;  %v8727_v32 = vld [vmem:[%s11157_s0 + $0x10] sm:$0xff] }
  0x31   :  { %4916 = vmatprep.subr.bf16.mxu1 %v7244_v53  ;;  %v8742_v36 = vcombine.high %v8727_v32, %v8727_v32  ;;  %v7314_v38 = vld [vmem:[%s11156_s1 + $0x404] ss:$16 sps:$4 sm:$0xff]   ;;  %v7312_v40 = vld [vmem:[%s11156_s1 + $0x400] ss:$16 sps:$4 sm:$0xff]  }
  0x32   :  { %v7317_v39 = vld [vmem:[%s11156_s1 + $0x604] ss:$16 sps:$4 sm:$0xff]   ;;  %v7315_v41 = vld [vmem:[%s11156_s1 + $0x600] ss:$16 sps:$4 sm:$0xff]  }
  0x33   :  { %4876 = vmatpush2.bf16.msra.mxu0 %v7246_v54  ;;  %v7320_v42 = vld [vmem:[%s11156_s1 + $0x5e4] ss:$16 sps:$4 sm:$0xff]   ;;  %v7318_v44 = vld [vmem:[%s11156_s1 + $0x5e0] ss:$16 sps:$4 sm:$0xff]  }
  0x34   :  { %4917 = vmatpush2.bf16.msra.mxu1 %v7247_v55  ;;  %4877 = vmatprep.subr.bf16.mxu0 %v7248_v56  ;;  %v7323_v43 = vld [vmem:[%s11156_s1 + $0x7e4] ss:$16 sps:$4 sm:$0xff]   ;;  %v7321_v45 = vld [vmem:[%s11156_s1 + $0x7e0] ss:$16 sps:$4 sm:$0xff]  }
  0x35   :  { %4918 = vmatprep.subr.bf16.mxu1 %v7250_v57  ;;  %v7326_v46 = vld [vmem:[%s11156_s1 + $0x5c4] ss:$16 sps:$4 sm:$0xff]   ;;  %v7324_v49 = vld [vmem:[%s11156_s1 + $0x5c0] ss:$16 sps:$4 sm:$0xff]  }
  0x36   :  { %v7329_v48 = vld [vmem:[%s11156_s1 + $0x7c4] ss:$16 sps:$4 sm:$0xff]   ;;  %v7327_v50 = vld [vmem:[%s11156_s1 + $0x7c0] ss:$16 sps:$4 sm:$0xff]  }
  0x37   :  { %4878 = vmatpush2.bf16.msra.mxu0 %v7252_v58  ;;  %v7332_v52 = vld [vmem:[%s11156_s1 + $0x5a4] ss:$16 sps:$4 sm:$0xff]   ;;  %v7330_v54 = vld [vmem:[%s11156_s1 + $0x5a0] ss:$16 sps:$4 sm:$0xff]  }
  0x38   :  { %4919 = vmatpush2.bf16.msra.mxu1 %v7253_v59  ;;  %4879 = vmatprep.subr.bf16.mxu0 %v7254_v60  ;;  %v7335_v53 = vld [vmem:[%s11156_s1 + $0x7a4] ss:$16 sps:$4 sm:$0xff]   ;;  %v7333_v55 = vld [vmem:[%s11156_s1 + $0x7a0] ss:$16 sps:$4 sm:$0xff]  }
  0x39   :  { %4920 = vmatprep.subr.bf16.mxu1 %v7256_v61  ;;  %v7338_v56 = vld [vmem:[%s11156_s1 + $0x584] ss:$16 sps:$4 sm:$0xff]   ;;  %v7336_v58 = vld [vmem:[%s11156_s1 + $0x580] ss:$16 sps:$4 sm:$0xff]  }
  0x3a   :  { %v7341_v57 = vld [vmem:[%s11156_s1 + $0x784] ss:$16 sps:$4 sm:$0xff]   ;;  %v7339_v59 = vld [vmem:[%s11156_s1 + $0x780] ss:$16 sps:$4 sm:$0xff]  }
  0x3b   :  { %4880 = vmatpush2.bf16.msra.mxu0 %v7258_v62  ;;  %v7344_v60 = vld [vmem:[%s11156_s1 + $0x564] ss:$16 sps:$4 sm:$0xff]   ;;  %v7342_v62 = vld [vmem:[%s11156_s1 + $0x560] ss:$16 sps:$4 sm:$0xff]  }
  0x3c   :  { %4921 = vmatpush2.bf16.msra.mxu1 %v7259_v63  ;;  %4881 = vmatprep.subr.bf16.mxu0 %v7260_v0  ;;  %v7347_v61 = vld [vmem:[%s11156_s1 + $0x764] ss:$16 sps:$4 sm:$0xff]   ;;  %v7345_v63 = vld [vmem:[%s11156_s1 + $0x760] ss:$16 sps:$4 sm:$0xff]  }
  0x3d   :  { %4922 = vmatprep.subr.bf16.mxu1 %v7262_v1  ;;  %v7350_v0 = vld [vmem:[%s11156_s1 + $0x544] ss:$16 sps:$4 sm:$0xff]  }
  0x3e   :  { %v7353_v1 = vld [vmem:[%s11156_s1 + $0x744] ss:$16 sps:$4 sm:$0xff]  }
  0x3f   :  { %4882 = vmatpush2.bf16.msra.mxu0 %v7264_v2  ;;  %v7348_v2 = vld [vmem:[%s11156_s1 + $0x540] ss:$16 sps:$4 sm:$0xff]  }
  0x40   :  { %4923 = vmatpush2.bf16.msra.mxu1 %v7265_v3  ;;  %4933 = vmatprep.subr.bf16.mxu0 %v7272_v4  ;;  %v7351_v3 = vld [vmem:[%s11156_s1 + $0x740] ss:$16 sps:$4 sm:$0xff]   ;;  %v7356_v4 = vld [vmem:[%s11156_s1 + $0x524] ss:$16 sps:$4 sm:$0xff]  }
  0x41   :  { %4974 = vmatprep.subr.bf16.mxu1 %v7275_v5  ;;  %v7359_v5 = vld [vmem:[%s11156_s1 + $0x724] ss:$16 sps:$4 sm:$0xff]  }
  0x42   :  { %4884 = vmatmul.mubr.bf16.vlgmr.msra.gmra.mxu0 %v8646_v6 }
  0x43   :  { %4925 = vmatmul.mubr.bf16.vlgmr.msra.gmra.mxu1 %v8648_v7  ;;  %4934 = vmatpush1.bf16.msra.mxu0 %v7270_v8  ;;  %v7354_v8 = vld [vmem:[%s11156_s1 + $0x520] ss:$16 sps:$4 sm:$0xff]  }
  0x44   :  { %4975 = vmatpush1.bf16.msra.mxu1 %v7273_v9  ;;  %4935 = vmatprep.subr.bf16.mxu0 %v7278_v10  ;;  %v7357_v9 = vld [vmem:[%s11156_s1 + $0x720] ss:$16 sps:$4 sm:$0xff]   ;;  %v7362_v10 = vld [vmem:[%s11156_s1 + $0x504] ss:$16 sps:$4 sm:$0xff]  }
  0x45   :  { %4976 = vmatprep.subr.bf16.mxu1 %v7281_v11  ;;  %4965 = vmatprep.mubr.bf16.mxu0 %v8742_v36  ;;  %v7365_v11 = vld [vmem:[%s11156_s1 + $0x704] ss:$16 sps:$4 sm:$0xff]  }
  0x46   :  { %5006 = vmatprep.mubr.bf16.mxu1 %v8746_v37 }
  0x47   :  { %4936 = vmatpush1.bf16.msra.mxu0 %v7276_v12  ;;  %v7360_v12 = vld [vmem:[%s11156_s1 + $0x500] ss:$16 sps:$4 sm:$0xff]  }
  0x48   :  { %4977 = vmatpush1.bf16.msra.mxu1 %v7279_v13  ;;  %4937 = vmatprep.subr.bf16.mxu0 %v7284_v14  ;;  %v7363_v13 = vld [vmem:[%s11156_s1 + $0x700] ss:$16 sps:$4 sm:$0xff]   ;;  %v7372_v14 = vld [vmem:[%s11156_s1 + $0x8e4] ss:$16 sps:$4 sm:$0xff]  }
  0x49   :  { %4978 = vmatprep.subr.bf16.mxu1 %v7287_v15  ;;  %v7375_v15 = vld [vmem:[%s11156_s1 + $0xae4] ss:$16 sps:$4 sm:$0xff]  }
  0x4b   :  { %4938 = vmatpush1.bf16.msra.mxu0 %v7282_v16  ;;  %v8866_v16 = vcombine.low %v8727_v32, %v8727_v32  ;;  %v7390_v32 = vld [vmem:[%s11156_s1 + $0x884] ss:$16 sps:$4 sm:$0xff]  }
  0x4c   :  { %4979 = vmatpush1.bf16.msra.mxu1 %v7285_v17  ;;  %4939 = vmatprep.subr.bf16.mxu0 %v7290_v18  ;;  %v8870_v17 = vcombine.low %v8732_v33, %v8732_v33  ;;  %v7370_v18 = vld [vmem:[%s11156_s1 + $0x8e0] ss:$16 sps:$4 sm:$0xff]   ;;  %v7393_v33 = vld [vmem:[%s11156_s1 + $0xa84] ss:$16 sps:$4 sm:$0xff]  }
  0x4d   :  { %4980 = vmatprep.subr.bf16.mxu1 %v7293_v19  ;;  %v7373_v19 = vld [vmem:[%s11156_s1 + $0xae0] ss:$16 sps:$4 sm:$0xff]  }
  0x4f   :  { %4940 = vmatpush1.bf16.msra.mxu0 %v7288_v20  ;;  %v7378_v20 = vld [vmem:[%s11156_s1 + $0x8c4] ss:$16 sps:$4 sm:$0xff]  }
  0x50   :  { %4981 = vmatpush1.bf16.msra.mxu1 %v7291_v21  ;;  %4941 = vmatprep.subr.bf16.mxu0 %v7296_v22  ;;  %v7381_v21 = vld [vmem:[%s11156_s1 + $0xac4] ss:$16 sps:$4 sm:$0xff]  }
  0x51   :  { %4982 = vmatprep.subr.bf16.mxu1 %v7299_v23  ;;  %v8887_v22 = vld [vmem:[%s11157_s0 + $0x20] sm:$0xff]  ;;  %v8892_v23 = vld [vmem:[%s11157_s0 + $0x28] sm:$0xff] }
  0x53   :  { %4942 = vmatpush1.bf16.msra.mxu0 %v7294_v24  ;;  %v8896_v24 = vcombine.high %v8887_v22, %v8887_v22 }
  0x54   :  { %4983 = vmatpush1.bf16.msra.mxu1 %v7297_v25  ;;  %4943 = vmatprep.subr.bf16.mxu0 %v7302_v26  ;;  %v8900_v25 = vcombine.high %v8892_v23, %v8892_v23  ;;  %v7376_v26 = vld [vmem:[%s11156_s1 + $0x8c0] ss:$16 sps:$4 sm:$0xff]  }
  0x55   :  { %4984 = vmatprep.subr.bf16.mxu1 %v7305_v27  ;;  %v7379_v27 = vld [vmem:[%s11156_s1 + $0xac0] ss:$16 sps:$4 sm:$0xff]  }
  0x57   :  { %4944 = vmatpush1.bf16.msra.mxu0 %v7300_v28  ;;  %v7384_v28 = vld [vmem:[%s11156_s1 + $0x8a4] ss:$16 sps:$4 sm:$0xff]  }
  0x58   :  { %4985 = vmatpush1.bf16.msra.mxu1 %v7303_v29  ;;  %4945 = vmatprep.subr.bf16.mxu0 %v7308_v30  ;;  %v7387_v29 = vld [vmem:[%s11156_s1 + $0xaa4] ss:$16 sps:$4 sm:$0xff]   ;;  %v7382_v30 = vld [vmem:[%s11156_s1 + $0x8a0] ss:$16 sps:$4 sm:$0xff]  }
  0x59   :  { %4986 = vmatprep.subr.bf16.mxu1 %v7311_v31  ;;  %v7385_v31 = vld [vmem:[%s11156_s1 + $0xaa0] ss:$16 sps:$4 sm:$0xff]  }
  0x5b   :  { %4946 = vmatpush1.bf16.msra.mxu0 %v7306_v34  ;;  %v7388_v34 = vld [vmem:[%s11156_s1 + $0x880] ss:$16 sps:$4 sm:$0xff]  }
  0x5c   :  { %4987 = vmatpush1.bf16.msra.mxu1 %v7309_v35  ;;  %4947 = vmatprep.subr.bf16.mxu0 %v7314_v38  ;;  %v7391_v35 = vld [vmem:[%s11156_s1 + $0xa80] ss:$16 sps:$4 sm:$0xff]   ;;  %v7396_v38 = vld [vmem:[%s11156_s1 + $0x864] ss:$16 sps:$4 sm:$0xff]  }
  0x5d   :  { %4988 = vmatprep.subr.bf16.mxu1 %v7317_v39  ;;  %v7399_v39 = vld [vmem:[%s11156_s1 + $0xa64] ss:$16 sps:$4 sm:$0xff]  }
  0x5f   :  { %4948 = vmatpush1.bf16.msra.mxu0 %v7312_v40  ;;  %v7394_v40 = vld [vmem:[%s11156_s1 + $0x860] ss:$16 sps:$4 sm:$0xff]  }
  0x60   :  { %4989 = vmatpush1.bf16.msra.mxu1 %v7315_v41  ;;  %4949 = vmatprep.subr.bf16.mxu0 %v7320_v42  ;;  %v7397_v41 = vld [vmem:[%s11156_s1 + $0xa60] ss:$16 sps:$4 sm:$0xff]   ;;  %v7402_v42 = vld [vmem:[%s11156_s1 + $0x844] ss:$16 sps:$4 sm:$0xff]  }
  0x61   :  { %4990 = vmatprep.subr.bf16.mxu1 %v7323_v43  ;;  %v7405_v43 = vld [vmem:[%s11156_s1 + $0xa44] ss:$16 sps:$4 sm:$0xff]  }
  0x63   :  { %4950 = vmatpush2.bf16.msra.mxu0 %v7318_v44  ;;  %v7400_v44 = vld [vmem:[%s11156_s1 + $0x840] ss:$16 sps:$4 sm:$0xff]  }
  0x64   :  { %4991 = vmatpush2.bf16.msra.mxu1 %v7321_v45  ;;  %4951 = vmatprep.subr.bf16.mxu0 %v7326_v46  ;;  %v7403_v45 = vld [vmem:[%s11156_s1 + $0xa40] ss:$16 sps:$4 sm:$0xff]   ;;  %v7408_v46 = vld [vmem:[%s11156_s1 + $0x824] ss:$16 sps:$4 sm:$0xff]  }
  0x65   :  { %4992 = vmatprep.subr.bf16.mxu1 %v7329_v48  ;;  %v7411_v48 = vld [vmem:[%s11156_s1 + $0xa24] ss:$16 sps:$4 sm:$0xff]  }
  0x67   :  { %4952 = vmatpush2.bf16.msra.mxu0 %v7324_v49  ;;  %v7406_v49 = vld [vmem:[%s11156_s1 + $0x820] ss:$16 sps:$4 sm:$0xff]  }
  0x68   :  { %4993 = vmatpush2.bf16.msra.mxu1 %v7327_v50  ;;  %4953 = vmatprep.subr.bf16.mxu0 %v7332_v52  ;;  %v7409_v50 = vld [vmem:[%s11156_s1 + $0xa20] ss:$16 sps:$4 sm:$0xff]   ;;  %v7414_v52 = vld [vmem:[%s11156_s1 + $0x804] ss:$16 sps:$4 sm:$0xff]  }
  0x69   :  { %4994 = vmatprep.subr.bf16.mxu1 %v7335_v53  ;;  %v7417_v53 = vld [vmem:[%s11156_s1 + $0xa04] ss:$16 sps:$4 sm:$0xff]  }
  0x6b   :  { %4954 = vmatpush2.bf16.msra.mxu0 %v7330_v54  ;;  %v7412_v54 = vld [vmem:[%s11156_s1 + $0x800] ss:$16 sps:$4 sm:$0xff]  }
  0x6c   :  { %4995 = vmatpush2.bf16.msra.mxu1 %v7333_v55  ;;  %4955 = vmatprep.subr.bf16.mxu0 %v7338_v56  ;;  %v7415_v55 = vld [vmem:[%s11156_s1 + $0xa00] ss:$16 sps:$4 sm:$0xff]   ;;  %v7420_v56 = vld [vmem:[%s11156_s1 + $0x9e4] ss:$16 sps:$4 sm:$0xff]  }
  0x6d   :  { %4996 = vmatprep.subr.bf16.mxu1 %v7341_v57  ;;  %v7423_v57 = vld [vmem:[%s11156_s1 + $0xbe4] ss:$16 sps:$4 sm:$0xff]  }
  0x6f   :  { %4956 = vmatpush2.bf16.msra.mxu0 %v7336_v58  ;;  %v7418_v58 = vld [vmem:[%s11156_s1 + $0x9e0] ss:$16 sps:$4 sm:$0xff]  }
  0x70   :  { %4997 = vmatpush2.bf16.msra.mxu1 %v7339_v59  ;;  %4957 = vmatprep.subr.bf16.mxu0 %v7344_v60  ;;  %v7421_v59 = vld [vmem:[%s11156_s1 + $0xbe0] ss:$16 sps:$4 sm:$0xff]   ;;  %v7426_v60 = vld [vmem:[%s11156_s1 + $0x9c4] ss:$16 sps:$4 sm:$0xff]  }
  0x71   :  { %4998 = vmatprep.subr.bf16.mxu1 %v7347_v61  ;;  %v7429_v61 = vld [vmem:[%s11156_s1 + $0xbc4] ss:$16 sps:$4 sm:$0xff]  }
  0x73   :  { %4958 = vmatpush2.bf16.msra.mxu0 %v7342_v62  ;;  %v7424_v62 = vld [vmem:[%s11156_s1 + $0x9c0] ss:$16 sps:$4 sm:$0xff]  }
  0x74   :  { %4999 = vmatpush2.bf16.msra.mxu1 %v7345_v63  ;;  %4959 = vmatprep.subr.bf16.mxu0 %v7350_v0  ;;  %v7427_v63 = vld [vmem:[%s11156_s1 + $0xbc0] ss:$16 sps:$4 sm:$0xff]   ;;  %v7432_v0 = vld [vmem:[%s11156_s1 + $0x9a4] ss:$16 sps:$4 sm:$0xff]  }
  0x75   :  { %5000 = vmatprep.subr.bf16.mxu1 %v7353_v1  ;;  %v7435_v1 = vld [vmem:[%s11156_s1 + $0xba4] ss:$16 sps:$4 sm:$0xff]  }
  0x77   :  { %4960 = vmatpush2.bf16.msra.mxu0 %v7348_v2  ;;  %v7430_v2 = vld [vmem:[%s11156_s1 + $0x9a0] ss:$16 sps:$4 sm:$0xff]  }
  0x78   :  { %5001 = vmatpush2.bf16.msra.mxu1 %v7351_v3  ;;  %4961 = vmatprep.subr.bf16.mxu0 %v7356_v4  ;;  %v7433_v3 = vld [vmem:[%s11156_s1 + $0xba0] ss:$16 sps:$4 sm:$0xff]   ;;  %v7438_v4 = vld [vmem:[%s11156_s1 + $0x984] ss:$16 sps:$4 sm:$0xff]  }
  0x79   :  { %5002 = vmatprep.subr.bf16.mxu1 %v7359_v5  ;;  %v7441_v5 = vld [vmem:[%s11156_s1 + $0xb84] ss:$16 sps:$4 sm:$0xff]  }
  0x7b   :  { %4962 = vmatpush2.bf16.msra.mxu0 %v7354_v8  ;;  %v7436_v8 = vld [vmem:[%s11156_s1 + $0x980] ss:$16 sps:$4 sm:$0xff]  }
  0x7c   :  { %5003 = vmatpush2.bf16.msra.mxu1 %v7357_v9  ;;  %4963 = vmatprep.subr.bf16.mxu0 %v7362_v10  ;;  %v7439_v9 = vld [vmem:[%s11156_s1 + $0xb80] ss:$16 sps:$4 sm:$0xff]   ;;  %v7444_v10 = vld [vmem:[%s11156_s1 + $0x964] ss:$16 sps:$4 sm:$0xff]  }
  0x7d   :  { %5004 = vmatprep.subr.bf16.mxu1 %v7365_v11  ;;  %v7447_v11 = vld [vmem:[%s11156_s1 + $0xb64] ss:$16 sps:$4 sm:$0xff]  }
  0x7f   :  { %4964 = vmatpush2.bf16.msra.mxu0 %v7360_v12  ;;  %v7442_v12 = vld [vmem:[%s11156_s1 + $0x960] ss:$16 sps:$4 sm:$0xff]  }
  0x80   :  { %5005 = vmatpush2.bf16.msra.mxu1 %v7363_v13  ;;  %5015 = vmatprep.subr.bf16.mxu0 %v7372_v14  ;;  %v7445_v13 = vld [vmem:[%s11156_s1 + $0xb60] ss:$16 sps:$4 sm:$0xff]   ;;  %v7450_v14 = vld [vmem:[%s11156_s1 + $0x944] ss:$16 sps:$4 sm:$0xff]  }
  0x81   :  { %5056 = vmatprep.subr.bf16.mxu1 %v7375_v15  ;;  %v7453_v15 = vld [vmem:[%s11156_s1 + $0xb44] ss:$16 sps:$4 sm:$0xff]  }
  0x82   :  { %4966 = vmatmul.mubr.bf16.vlgmr.msra.gmra.mxu0 %v8866_v16 }
  0x83   :  { %5007 = vmatmul.mubr.bf16.vlgmr.msra.gmra.mxu1 %v8870_v17  ;;  %5016 = vmatpush1.bf16.msra.mxu0 %v7370_v18  ;;  %v7448_v18 = vld [vmem:[%s11156_s1 + $0x940] ss:$16 sps:$4 sm:$0xff]  }
  0x84   :  { %5057 = vmatpush1.bf16.msra.mxu1 %v7373_v19  ;;  %5017 = vmatprep.subr.bf16.mxu0 %v7378_v20  ;;  %v7451_v19 = vld [vmem:[%s11156_s1 + $0xb40] ss:$16 sps:$4 sm:$0xff]   ;;  %v7456_v20 = vld [vmem:[%s11156_s1 + $0x924] ss:$16 sps:$4 sm:$0xff]  }
  0x85   :  { %5058 = vmatprep.subr.bf16.mxu1 %v7381_v21  ;;  %5047 = vmatprep.mubr.bf16.mxu0 %v8896_v24  ;;  %v7459_v21 = vld [vmem:[%s11156_s1 + $0xb24] ss:$16 sps:$4 sm:$0xff]  }
  0x86   :  { %5088 = vmatprep.mubr.bf16.mxu1 %v8900_v25 }
  0x87   :  { %5018 = vmatpush1.bf16.msra.mxu0 %v7376_v26  ;;  %v7454_v26 = vld [vmem:[%s11156_s1 + $0x920] ss:$16 sps:$4 sm:$0xff]  }
  0x88   :  { %5059 = vmatpush1.bf16.msra.mxu1 %v7379_v27  ;;  %5019 = vmatprep.subr.bf16.mxu0 %v7384_v28  ;;  %v7457_v27 = vld [vmem:[%s11156_s1 + $0xb20] ss:$16 sps:$4 sm:$0xff]   ;;  %v7462_v28 = vld [vmem:[%s11156_s1 + $0x904] ss:$16 sps:$4 sm:$0xff]  }
  0x89   :  { %5060 = vmatprep.subr.bf16.mxu1 %v7387_v29  ;;  %v7465_v29 = vld [vmem:[%s11156_s1 + $0xb04] ss:$16 sps:$4 sm:$0xff]  }
  0x8b   :  { %5020 = vmatpush1.bf16.msra.mxu0 %v7382_v30  ;;  %v7460_v30 = vld [vmem:[%s11156_s1 + $0x900] ss:$16 sps:$4 sm:$0xff]  }
  0x8c   :  { %5061 = vmatpush1.bf16.msra.mxu1 %v7385_v31  ;;  %5021 = vmatprep.subr.bf16.mxu0 %v7390_v32  ;;  %v7463_v31 = vld [vmem:[%s11156_s1 + $0xb00] ss:$16 sps:$4 sm:$0xff]   ;;  %v7472_v32 = vld [vmem:[%s11156_s1 + $0xce4] ss:$16 sps:$4 sm:$0xff]  }
  0x8d   :  { %5062 = vmatprep.subr.bf16.mxu1 %v7393_v33  ;;  %v7475_v33 = vld [vmem:[%s11156_s1 + $0xee4] ss:$16 sps:$4 sm:$0xff]  }
  0x8f   :  { %5022 = vmatpush1.bf16.msra.mxu0 %v7388_v34  ;;  %v7470_v34 = vld [vmem:[%s11156_s1 + $0xce0] ss:$16 sps:$4 sm:$0xff]  }
  0x90   :  { %5063 = vmatpush1.bf16.msra.mxu1 %v7391_v35  ;;  %5023 = vmatprep.subr.bf16.mxu0 %v7396_v38  ;;  %v9092_v35 = vld [vmem:[%s11157_s0 + $0x30] sm:$0xff]  ;;  %v9096_v38 = vcombine.low %v8887_v22, %v8887_v22 }
  0x91   :  { %5064 = vmatprep.subr.bf16.mxu1 %v7399_v39  ;;  %v9100_v39 = vcombine.low %v8892_v23, %v8892_v23  ;;  %v7478_v22 = vld [vmem:[%s11156_s1 + $0xcc4] ss:$16 sps:$4 sm:$0xff]  }
  0x92   :  { %v7481_v23 = vld [vmem:[%s11156_s1 + $0xec4] ss:$16 sps:$4 sm:$0xff]  }
  0x93   :  { %5024 = vmatpush1.bf16.msra.mxu0 %v7394_v40  ;;  %v9105_v40 = vld [vmem:[%s11157_s0 + $0x38] sm:$0xff] }
  0x94   :  { %5065 = vmatpush1.bf16.msra.mxu1 %v7397_v41  ;;  %5025 = vmatprep.subr.bf16.mxu0 %v7402_v42  ;;  %v7473_v41 = vld [vmem:[%s11156_s1 + $0xee0] ss:$16 sps:$4 sm:$0xff]   ;;  %v9118_v42 = vcombine.high %v9092_v35, %v9092_v35 }
  0x95   :  { %5066 = vmatprep.subr.bf16.mxu1 %v7405_v43  ;;  %v9122_v43 = vcombine.high %v9105_v40, %v9105_v40 }
  0x97   :  { %5026 = vmatpush1.bf16.msra.mxu0 %v7400_v44  ;;  %v7476_v44 = vld [vmem:[%s11156_s1 + $0xcc0] ss:$16 sps:$4 sm:$0xff]  }
  0x98   :  { %5067 = vmatpush1.bf16.msra.mxu1 %v7403_v45  ;;  %5027 = vmatprep.subr.bf16.mxu0 %v7408_v46  ;;  %v7479_v45 = vld [vmem:[%s11156_s1 + $0xec0] ss:$16 sps:$4 sm:$0xff]   ;;  %v7484_v46 = vld [vmem:[%s11156_s1 + $0xca4] ss:$16 sps:$4 sm:$0xff]  }
  0x99   :  { %5068 = vmatprep.subr.bf16.mxu1 %v7411_v48  ;;  %v7487_v48 = vld [vmem:[%s11156_s1 + $0xea4] ss:$16 sps:$4 sm:$0xff]  }
  0x9b   :  { %5028 = vmatpush1.bf16.msra.mxu0 %v7406_v49  ;;  %v7482_v49 = vld [vmem:[%s11156_s1 + $0xca0] ss:$16 sps:$4 sm:$0xff]  }
  0x9c   :  { %5069 = vmatpush1.bf16.msra.mxu1 %v7409_v50  ;;  %5029 = vmatprep.subr.bf16.mxu0 %v7414_v52  ;;  %v7485_v50 = vld [vmem:[%s11156_s1 + $0xea0] ss:$16 sps:$4 sm:$0xff]   ;;  %v7490_v52 = vld [vmem:[%s11156_s1 + $0xc84] ss:$16 sps:$4 sm:$0xff]  }
  0x9d   :  { %5070 = vmatprep.subr.bf16.mxu1 %v7417_v53  ;;  %v7493_v53 = vld [vmem:[%s11156_s1 + $0xe84] ss:$16 sps:$4 sm:$0xff]  }
  0x9f   :  { %5030 = vmatpush1.bf16.msra.mxu0 %v7412_v54  ;;  %v7488_v54 = vld [vmem:[%s11156_s1 + $0xc80] ss:$16 sps:$4 sm:$0xff]  }
  0xa0   :  { %5071 = vmatpush1.bf16.msra.mxu1 %v7415_v55  ;;  %5031 = vmatprep.subr.bf16.mxu0 %v7420_v56  ;;  %v7491_v55 = vld [vmem:[%s11156_s1 + $0xe80] ss:$16 sps:$4 sm:$0xff]   ;;  %v7496_v56 = vld [vmem:[%s11156_s1 + $0xc64] ss:$16 sps:$4 sm:$0xff]  }
  0xa1   :  { %5072 = vmatprep.subr.bf16.mxu1 %v7423_v57  ;;  %v7499_v57 = vld [vmem:[%s11156_s1 + $0xe64] ss:$16 sps:$4 sm:$0xff]  }
  0xa3   :  { %5032 = vmatpush2.bf16.msra.mxu0 %v7418_v58  ;;  %v7494_v58 = vld [vmem:[%s11156_s1 + $0xc60] ss:$16 sps:$4 sm:$0xff]  }
  0xa4   :  { %5073 = vmatpush2.bf16.msra.mxu1 %v7421_v59  ;;  %5033 = vmatprep.subr.bf16.mxu0 %v7426_v60  ;;  %v7497_v59 = vld [vmem:[%s11156_s1 + $0xe60] ss:$16 sps:$4 sm:$0xff]   ;;  %v7502_v60 = vld [vmem:[%s11156_s1 + $0xc44] ss:$16 sps:$4 sm:$0xff]  }
  0xa5   :  { %5074 = vmatprep.subr.bf16.mxu1 %v7429_v61  ;;  %v7505_v61 = vld [vmem:[%s11156_s1 + $0xe44] ss:$16 sps:$4 sm:$0xff]  }
  0xa7   :  { %5034 = vmatpush2.bf16.msra.mxu0 %v7424_v62  ;;  %v7500_v62 = vld [vmem:[%s11156_s1 + $0xc40] ss:$16 sps:$4 sm:$0xff]  }
  0xa8   :  { %5075 = vmatpush2.bf16.msra.mxu1 %v7427_v63  ;;  %5035 = vmatprep.subr.bf16.mxu0 %v7432_v0  ;;  %v7503_v63 = vld [vmem:[%s11156_s1 + $0xe40] ss:$16 sps:$4 sm:$0xff]   ;;  %v7508_v0 = vld [vmem:[%s11156_s1 + $0xc24] ss:$16 sps:$4 sm:$0xff]  }
  0xa9   :  { %5076 = vmatprep.subr.bf16.mxu1 %v7435_v1  ;;  %v7511_v1 = vld [vmem:[%s11156_s1 + $0xe24] ss:$16 sps:$4 sm:$0xff]  }
  0xab   :  { %5036 = vmatpush2.bf16.msra.mxu0 %v7430_v2  ;;  %v7506_v2 = vld [vmem:[%s11156_s1 + $0xc20] ss:$16 sps:$4 sm:$0xff]  }
  0xac   :  { %5077 = vmatpush2.bf16.msra.mxu1 %v7433_v3  ;;  %5037 = vmatprep.subr.bf16.mxu0 %v7438_v4  ;;  %v7509_v3 = vld [vmem:[%s11156_s1 + $0xe20] ss:$16 sps:$4 sm:$0xff]   ;;  %v7514_v4 = vld [vmem:[%s11156_s1 + $0xc04] ss:$16 sps:$4 sm:$0xff]  }
  0xad   :  { %5078 = vmatprep.subr.bf16.mxu1 %v7441_v5  ;;  %v7517_v5 = vld [vmem:[%s11156_s1 + $0xe04] ss:$16 sps:$4 sm:$0xff]  }
  0xaf   :  { %5038 = vmatpush2.bf16.msra.mxu0 %v7436_v8  ;;  %v7512_v8 = vld [vmem:[%s11156_s1 + $0xc00] ss:$16 sps:$4 sm:$0xff]  }
  0xb0   :  { %5079 = vmatpush2.bf16.msra.mxu1 %v7439_v9  ;;  %5039 = vmatprep.subr.bf16.mxu0 %v7444_v10  ;;  %v7515_v9 = vld [vmem:[%s11156_s1 + $0xe00] ss:$16 sps:$4 sm:$0xff]   ;;  %v7520_v10 = vld [vmem:[%s11156_s1 + $0xde4] ss:$16 sps:$4 sm:$0xff]  }
  0xb1   :  { %5080 = vmatprep.subr.bf16.mxu1 %v7447_v11  ;;  %v7523_v11 = vld [vmem:[%s11156_s1 + $0xfe4] ss:$16 sps:$4 sm:$0xff]  }
  0xb3   :  { %5040 = vmatpush2.bf16.msra.mxu0 %v7442_v12  ;;  %v7518_v12 = vld [vmem:[%s11156_s1 + $0xde0] ss:$16 sps:$4 sm:$0xff]  }
  0xb4   :  { %5081 = vmatpush2.bf16.msra.mxu1 %v7445_v13  ;;  %5041 = vmatprep.subr.bf16.mxu0 %v7450_v14  ;;  %v7521_v13 = vld [vmem:[%s11156_s1 + $0xfe0] ss:$16 sps:$4 sm:$0xff]   ;;  %v7526_v14 = vld [vmem:[%s11156_s1 + $0xdc4] ss:$16 sps:$4 sm:$0xff]  }
  0xb5   :  { %5082 = vmatprep.subr.bf16.mxu1 %v7453_v15  ;;  %v7529_v15 = vld [vmem:[%s11156_s1 + $0xfc4] ss:$16 sps:$4 sm:$0xff]  }
  0xb7   :  { %5042 = vmatpush2.bf16.msra.mxu0 %v7448_v18  ;;  %v7524_v18 = vld [vmem:[%s11156_s1 + $0xdc0] ss:$16 sps:$4 sm:$0xff]  }
  0xb8   :  { %5083 = vmatpush2.bf16.msra.mxu1 %v7451_v19  ;;  %5043 = vmatprep.subr.bf16.mxu0 %v7456_v20  ;;  %v7527_v19 = vld [vmem:[%s11156_s1 + $0xfc0] ss:$16 sps:$4 sm:$0xff]   ;;  %v7532_v20 = vld [vmem:[%s11156_s1 + $0xda4] ss:$16 sps:$4 sm:$0xff]  }
  0xb9   :  { %5084 = vmatprep.subr.bf16.mxu1 %v7459_v21  ;;  %v7535_v21 = vld [vmem:[%s11156_s1 + $0xfa4] ss:$16 sps:$4 sm:$0xff]  }
  0xbb   :  { %5044 = vmatpush2.bf16.msra.mxu0 %v7454_v26  ;;  %v7530_v26 = vld [vmem:[%s11156_s1 + $0xda0] ss:$16 sps:$4 sm:$0xff]  }
  0xbc   :  { %5085 = vmatpush2.bf16.msra.mxu1 %v7457_v27  ;;  %5045 = vmatprep.subr.bf16.mxu0 %v7462_v28  ;;  %v7533_v27 = vld [vmem:[%s11156_s1 + $0xfa0] ss:$16 sps:$4 sm:$0xff]   ;;  %v7538_v28 = vld [vmem:[%s11156_s1 + $0xd84] ss:$16 sps:$4 sm:$0xff]  }
  0xbd   :  { %5086 = vmatprep.subr.bf16.mxu1 %v7465_v29  ;;  %v7541_v29 = vld [vmem:[%s11156_s1 + $0xf84] ss:$16 sps:$4 sm:$0xff]  }
  0xbf   :  { %5046 = vmatpush2.bf16.msra.mxu0 %v7460_v30  ;;  %v7536_v30 = vld [vmem:[%s11156_s1 + $0xd80] ss:$16 sps:$4 sm:$0xff]  }
  0xc0   :  { %5087 = vmatpush2.bf16.msra.mxu1 %v7463_v31  ;;  %5097 = vmatprep.subr.bf16.mxu0 %v7472_v32  ;;  %v7539_v31 = vld [vmem:[%s11156_s1 + $0xf80] ss:$16 sps:$4 sm:$0xff]   ;;  %v7544_v32 = vld [vmem:[%s11156_s1 + $0xd64] ss:$16 sps:$4 sm:$0xff]  }
  0xc1   :  { %5138 = vmatprep.subr.bf16.mxu1 %v7475_v33  ;;  %v7547_v33 = vld [vmem:[%s11156_s1 + $0xf64] ss:$16 sps:$4 sm:$0xff]  }
  0xc2   :  { %5048 = vmatmul.mubr.bf16.vlgmr.msra.gmra.mxu0 %v9096_v38 }
  0xc3   :  { %5089 = vmatmul.mubr.bf16.vlgmr.msra.gmra.mxu1 %v9100_v39  ;;  %5098 = vmatpush1.bf16.msra.mxu0 %v7470_v34  ;;  %v7542_v34 = vld [vmem:[%s11156_s1 + $0xd60] ss:$16 sps:$4 sm:$0xff]  }
  0xc4   :  { %5139 = vmatpush1.bf16.msra.mxu1 %v7473_v41  ;;  %5099 = vmatprep.subr.bf16.mxu0 %v7478_v22  ;;  %v7545_v41 = vld [vmem:[%s11156_s1 + $0xf60] ss:$16 sps:$4 sm:$0xff]   ;;  %v7550_v22 = vld [vmem:[%s11156_s1 + $0xd44] ss:$16 sps:$4 sm:$0xff]  }
  0xc5   :  { %5140 = vmatprep.subr.bf16.mxu1 %v7481_v23  ;;  %5129 = vmatprep.mubr.bf16.mxu0 %v9118_v42  ;;  %v7553_v23 = vld [vmem:[%s11156_s1 + $0xf44] ss:$16 sps:$4 sm:$0xff]  }
  0xc6   :  { %5170 = vmatprep.mubr.bf16.mxu1 %v9122_v43 }
  0xc7   :  { %5100 = vmatpush1.bf16.msra.mxu0 %v7476_v44  ;;  %v7548_v44 = vld [vmem:[%s11156_s1 + $0xd40] ss:$16 sps:$4 sm:$0xff]  }
  0xc8   :  { %5141 = vmatpush1.bf16.msra.mxu1 %v7479_v45  ;;  %5101 = vmatprep.subr.bf16.mxu0 %v7484_v46  ;;  %v7551_v45 = vld [vmem:[%s11156_s1 + $0xf40] ss:$16 sps:$4 sm:$0xff]   ;;  %v7556_v46 = vld [vmem:[%s11156_s1 + $0xd24] ss:$16 sps:$4 sm:$0xff]  }
  0xc9   :  { %5142 = vmatprep.subr.bf16.mxu1 %v7487_v48  ;;  %v820_v48 = vlaneseq }
  0xcb   :  { %5102 = vmatpush1.bf16.msra.mxu0 %v7482_v49  ;;  %v7559_v49 = vld [vmem:[%s11156_s1 + $0xf24] ss:$16 sps:$4 sm:$0xff]  }
  0xcc   :  { %5143 = vmatpush1.bf16.msra.mxu1 %v7485_v50  ;;  %5103 = vmatprep.subr.bf16.mxu0 %v7490_v52  ;;  %v7554_v50 = vld [vmem:[%s11156_s1 + $0xd20] ss:$16 sps:$4 sm:$0xff]  }
  0xcd   :  { %5144 = vmatprep.subr.bf16.mxu1 %v7493_v53  ;;  %v7557_v52 = vld [vmem:[%s11156_s1 + $0xf20] ss:$16 sps:$4 sm:$0xff]   ;;  %v7562_v53 = vld [vmem:[%s11156_s1 + $0xd04] ss:$16 sps:$4 sm:$0xff]  }
  0xcf   :  { %5104 = vmatpush1.bf16.msra.mxu0 %v7488_v54  ;;  %v9293_v54 = vshrl.u32 %v820_v48, 7  ;;  %v7594_v48 = vld [vmem:[%s11156_s1 + $0x1060] ss:$16 sps:$4 sm:$0xff]  }
  0xd0   :  { %5145 = vmatpush1.bf16.msra.mxu1 %v7491_v55  ;;  %5105 = vmatprep.subr.bf16.mxu0 %v7496_v56  ;;  %v7565_v55 = vld [vmem:[%s11156_s1 + $0xf04] ss:$16 sps:$4 sm:$0xff]   ;;  %v7560_v56 = vld [vmem:[%s11156_s1 + $0xd00] ss:$16 sps:$4 sm:$0xff]  }
  0xd1   :  { %5146 = vmatprep.subr.bf16.mxu1 %v7499_v57  ;;  %v7563_v57 = vld [vmem:[%s11156_s1 + $0xf00] ss:$16 sps:$4 sm:$0xff]  }
  0xd3   :  { %5106 = vmatpush1.bf16.msra.mxu0 %v7494_v58  ;;  %v818_v58 = vld [vmem:[%s11158_s2] sm:$0xf] }
  0xd4   :  { %5147 = vmatpush1.bf16.msra.mxu1 %v7497_v59  ;;  %5107 = vmatprep.subr.bf16.mxu0 %v7502_v60  ;;  %v822_v59 = vsub.s32 0, %v9293_v54  ;;  %v7572_v60 = vld [vmem:[%s11156_s1 + $0x10e4] ss:$16 sps:$4 sm:$0xff]  }
  0xd5   :  { %5148 = vmatprep.subr.bf16.mxu1 %v7505_v61  ;;  %v7575_v61 = vld [vmem:[%s11156_s1 + $0x12e4] ss:$16 sps:$4 sm:$0xff]  }
  0xd7   :  { %5108 = vmatpush1.bf16.msra.mxu0 %v7500_v62  ;;  %v7570_v62 = vld [vmem:[%s11156_s1 + $0x10e0] ss:$16 sps:$4 sm:$0xff]  }
  0xd8   :  { %5149 = vmatpush1.bf16.msra.mxu1 %v7503_v63  ;;  %5109 = vmatprep.subr.bf16.mxu0 %v7508_v0  ;;  %v826_v63 = vsub.s32 1, %v9293_v54  ;;  %v9320_v0 = vcombine.low %v9092_v35, %v9092_v35  ;;  %v7573_v35 = vld [vmem:[%s11156_s1 + $0x12e0] ss:$16 sps:$4 sm:$0xff]  }
  0xd9   :  { %5150 = vmatprep.subr.bf16.mxu1 %v7511_v1  ;;  %v9324_v1 = vcombine.low %v9105_v40, %v9105_v40  ;;  %v7578_v40 = vld [vmem:[%s11156_s1 + $0x10c4] ss:$16 sps:$4 sm:$0xff]  }
  0xdb   :  { %5110 = vmatpush1.bf16.msra.mxu0 %v7506_v2  ;;  %v9329_v2 = vld [vmem:[%s11157_s0 + $0x40] sm:$0xff] }
  0xdc   :  { %5151 = vmatpush1.bf16.msra.mxu1 %v7509_v3  ;;  %5111 = vmatprep.subr.bf16.mxu0 %v7514_v4  ;;  %v9334_v3 = vld [vmem:[%s11157_s0 + $0x48] sm:$0xff]  ;;  %v823_v4 = vrot.slane %v818_v58, %v822_v59  ;;  %v7609_v59 = vld [vmem:[%s11156_s1 + $0x1220] ss:$16 sps:$4 sm:$0xff]  }
  0xdd   :  { %5152 = vmatprep.subr.bf16.mxu1 %v7517_v5  ;;  %v7581_v5 = vld [vmem:[%s11156_s1 + $0x12c4] ss:$16 sps:$4 sm:$0xff]  }
  0xdf   :  { %5112 = vmatpush1.bf16.msra.mxu0 %v7512_v8  ;;  %v827_v8 = vrot.slane %v818_v58, %v826_v63  ;;  %v7606_v58 = vld [vmem:[%s11156_s1 + $0x1020] ss:$16 sps:$4 sm:$0xff]  }
  0xe0   :  { %5153 = vmatpush1.bf16.msra.mxu1 %v7515_v9  ;;  %5113 = vmatprep.subr.bf16.mxu0 %v7520_v10  ;;  %v9347_v9 = vcombine.high %v9329_v2, %v9329_v2  ;;  %v9351_v10 = vcombine.high %v9334_v3, %v9334_v3  ;;  %v7615_v63 = vld [vmem:[%s11156_s1 + $0x1200] ss:$16 sps:$4 sm:$0xff]  }
  0xe1   :  { %5154 = vmatprep.subr.bf16.mxu1 %v7523_v11 }
  0xe3   :  { %5114 = vmatpush2.bf16.msra.mxu0 %v7518_v12 }
  0xe4   :  { %5155 = vmatpush2.bf16.msra.mxu1 %v7521_v13  ;;  %5115 = vmatprep.subr.bf16.mxu0 %v7526_v14  ;;  %v7576_v13 = vld [vmem:[%s11156_s1 + $0x10c0] ss:$16 sps:$4 sm:$0xff]  }
  0xe5   :  { %5156 = vmatprep.subr.bf16.mxu1 %v7529_v15  ;;  %v7579_v15 = vld [vmem:[%s11156_s1 + $0x12c0] ss:$16 sps:$4 sm:$0xff]  }
  0xe7   :  { %5116 = vmatpush2.bf16.msra.mxu0 %v7524_v18 }
  0xe8   :  { %5157 = vmatpush2.bf16.msra.mxu1 %v7527_v19  ;;  %5117 = vmatprep.subr.bf16.mxu0 %v7532_v20  ;;  %v7584_v20 = vld [vmem:[%s11156_s1 + $0x10a4] ss:$16 sps:$4 sm:$0xff]  }
  0xe9   :  { %5158 = vmatprep.subr.bf16.mxu1 %v7535_v21  ;;  %v7587_v21 = vld [vmem:[%s11156_s1 + $0x12a4] ss:$16 sps:$4 sm:$0xff]  }
  0xeb   :  { %5118 = vmatpush2.bf16.msra.mxu0 %v7530_v26 }
  0xec   :  { %5159 = vmatpush2.bf16.msra.mxu1 %v7533_v27  ;;  %5119 = vmatprep.subr.bf16.mxu0 %v7538_v28 }
  0xed   :  { %5160 = vmatprep.subr.bf16.mxu1 %v7541_v29 }
  0xef   :  { %5120 = vmatpush2.bf16.msra.mxu0 %v7536_v30  ;;  %v7582_v30 = vld [vmem:[%s11156_s1 + $0x10a0] ss:$16 sps:$4 sm:$0xff]  }
  0xf0   :  { %5161 = vmatpush2.bf16.msra.mxu1 %v7539_v31  ;;  %5121 = vmatprep.subr.bf16.mxu0 %v7544_v32  ;;  %v7585_v32 = vld [vmem:[%s11156_s1 + $0x12a0] ss:$16 sps:$4 sm:$0xff]  }
  0xf1   :  { %5162 = vmatprep.subr.bf16.mxu1 %v7547_v33 }
  0xf3   :  { %5122 = vmatpush2.bf16.msra.mxu0 %v7542_v34 }
  0xf4   :  { %5163 = vmatpush2.bf16.msra.mxu1 %v7545_v41  ;;  %5123 = vmatprep.subr.bf16.mxu0 %v7550_v22  ;;  %v7590_v41 = vld [vmem:[%s11156_s1 + $0x1084] ss:$16 sps:$4 sm:$0xff]  }
  0xf5   :  { %5164 = vmatprep.subr.bf16.mxu1 %v7553_v23  ;;  %v7593_v22 = vld [vmem:[%s11156_s1 + $0x1284] ss:$16 sps:$4 sm:$0xff]   ;;  %v7588_v23 = vld [vmem:[%s11156_s1 + $0x1080] ss:$16 sps:$4 sm:$0xff]  }
  0xf7   :  { %5124 = vmatpush2.bf16.msra.mxu0 %v7548_v44  ;;  %v7591_v44 = vld [vmem:[%s11156_s1 + $0x1280] ss:$16 sps:$4 sm:$0xff]  }
  0xf8   :  { %5165 = vmatpush2.bf16.msra.mxu1 %v7551_v45  ;;  %5125 = vmatprep.subr.bf16.mxu0 %v7556_v46  ;;  %v7596_v45 = vld [vmem:[%s11156_s1 + $0x1064] ss:$16 sps:$4 sm:$0xff]  }
  0xf9   :  { %5166 = vmatprep.subr.bf16.mxu1 %v7559_v49  ;;  %v7599_v46 = vld [vmem:[%s11156_s1 + $0x1264] ss:$16 sps:$4 sm:$0xff]   ;;  %v7597_v49 = vld [vmem:[%s11156_s1 + $0x1260] ss:$16 sps:$4 sm:$0xff]  }
  0xfb   :  { %5126 = vmatpush2.bf16.msra.mxu0 %v7554_v50  ;;  %v7602_v50 = vld [vmem:[%s11156_s1 + $0x1044] ss:$16 sps:$4 sm:$0xff]  }
  0xfc   :  { %5167 = vmatpush2.bf16.msra.mxu1 %v7557_v52  ;;  %5127 = vmatprep.subr.bf16.mxu0 %v7562_v53  ;;  %v7605_v52 = vld [vmem:[%s11156_s1 + $0x1244] ss:$16 sps:$4 sm:$0xff]   ;;  %v7600_v53 = vld [vmem:[%s11156_s1 + $0x1040] ss:$16 sps:$4 sm:$0xff]  }
  0xfd   :  { %5168 = vmatprep.subr.bf16.mxu1 %v7565_v55  ;;  %v7603_v55 = vld [vmem:[%s11156_s1 + $0x1240] ss:$16 sps:$4 sm:$0xff]  }
  0xff   :  { %5128 = vmatpush2.bf16.msra.mxu0 %v7560_v56  ;;  %v7608_v56 = vld [vmem:[%s11156_s1 + $0x1024] ss:$16 sps:$4 sm:$0xff]  }
 0x100   :  { %5169 = vmatpush2.bf16.msra.mxu1 %v7563_v57  ;;  %5179 = vmatprep.subr.bf16.mxu0 %v7572_v60  ;;  %v7611_v57 = vld [vmem:[%s11156_s1 + $0x1224] ss:$16 sps:$4 sm:$0xff]  }
 0x101   :  { %5220 = vmatprep.subr.bf16.mxu1 %v7575_v61  ;;  %v7614_v60 = vld [vmem:[%s11156_s1 + $0x1004] ss:$16 sps:$4 sm:$0xff]  }
 0x102   :  { %v4885_v11 = vpop.f32.mrf.mxu0  ;;  %5130 = vmatmul.mubr.bf16.vlgmr.msra.gmra.mxu0 %v9320_v0  ;;  %v7617_v61 = vld [vmem:[%s11156_s1 + $0x1204] ss:$16 sps:$4 sm:$0xff]  }
 0x103   :  { %v4926_v12 = vpop.f32.mrf.mxu1  ;;  %5171 = vmatmul.mubr.bf16.vlgmr.msra.gmra.mxu1 %v9324_v1  ;;  %v4886_v14 = vadd.f32 %v4885_v11, %v823_v4  ;;  %5180 = vmatpush1.bf16.msra.mxu0 %v7570_v62  ;;  %v7612_v62 = vld [vmem:[%s11156_s1 + $0x1000] ss:$16 sps:$4 sm:$0xff]   ;;  %v7620_v4 = vld [vmem:[%s11156_s1 + $0x11e4] ss:$16 sps:$4 sm:$0xff]  }
 0x104   :  { %5221 = vmatpush1.bf16.msra.mxu1 %v7573_v35  ;;  %v4887_v18 = vpop.f32.mrf.mxu0  ;;  %5181 = vmatprep.subr.bf16.mxu0 %v7578_v40  ;;  %v7623_v35 = vld [vmem:[%s11156_s1 + $0x13e4] ss:$16 sps:$4 sm:$0xff]   ;;  %v7618_v40 = vld [vmem:[%s11156_s1 + $0x11e0] ss:$16 sps:$4 sm:$0xff]  }
 0x105   :  { %v4928_v19 = vpop.f32.mrf.mxu1  ;;  %5222 = vmatprep.subr.bf16.mxu1 %v7581_v5  ;;  %v9367_v26 = vadd.f32 %v4926_v12, %v4886_v14  ;;  %v4888_v27 = vadd.f32 %v4887_v18, %v827_v8  ;;  %5211 = vmatprep.mubr.bf16.mxu0 %v9347_v9  ;;  %v7621_v5 = vld [vmem:[%s11156_s1 + $0x13e0] ss:$16 sps:$4 sm:$0xff]   ;;  %v7626_v8 = vld [vmem:[%s11156_s1 + $0x11c4] ss:$16 sps:$4 sm:$0xff]  }
 0x106   :  { %5252 = vmatprep.mubr.bf16.mxu1 %v9351_v10  ;;  %v4889_v28 = vpop.f32.mrf.mxu0  ;;  %v7629_v11 = vld [vmem:[%s11156_s1 + $0x13c4] ss:$16 sps:$4 sm:$0xff]   ;;  %v7624_v12 = vld [vmem:[%s11156_s1 + $0x11c0] ss:$16 sps:$4 sm:$0xff]  }
 0x107   :  { %v4930_v29 = vpop.f32.mrf.mxu1  ;;  %v9374_v31 = vadd.f32 %v4928_v19, %v4888_v27  ;;  %5182 = vmatpush1.bf16.msra.mxu0 %v7576_v13  ;;  %v7627_v13 = vld [vmem:[%s11156_s1 + $0x13c0] ss:$16 sps:$4 sm:$0xff]   ;;  %v7632_v14 = vld [vmem:[%s11156_s1 + $0x11a4] ss:$16 sps:$4 sm:$0xff]  }
 0x108   :  { %5223 = vmatpush1.bf16.msra.mxu1 %v7579_v15  ;;  %v4890_v33 = vpop.f32.mrf.mxu0  ;;  %5183 = vmatprep.subr.bf16.mxu0 %v7584_v20  ;;  %v7635_v15 = vld [vmem:[%s11156_s1 + $0x13a4] ss:$16 sps:$4 sm:$0xff]   ;;  %v7630_v18 = vld [vmem:[%s11156_s1 + $0x11a0] ss:$16 sps:$4 sm:$0xff]  }
 0x109   :  { %v4931_v34 = vpop.f32.mrf.mxu1  ;;  %5224 = vmatprep.subr.bf16.mxu1 %v7587_v21  ;;  %v7633_v19 = vld [vmem:[%s11156_s1 + $0x13a0] ss:$16 sps:$4 sm:$0xff]   ;;  %v7638_v20 = vld [vmem:[%s11156_s1 + $0x1184] ss:$16 sps:$4 sm:$0xff]  }
 0x10a   :  { %v7641_v21 = vld [vmem:[%s11156_s1 + $0x1384] ss:$16 sps:$4 sm:$0xff]   ;;  %v7636_v27 = vld [vmem:[%s11156_s1 + $0x1180] ss:$16 sps:$4 sm:$0xff]  }
 0x10b   :  { %5184 = vmatpush1.bf16.msra.mxu0 %v7582_v30  ;;  %v7639_v28 = vld [vmem:[%s11156_s1 + $0x1380] ss:$16 sps:$4 sm:$0xff]   ;;  %v7644_v29 = vld [vmem:[%s11156_s1 + $0x1164] ss:$16 sps:$4 sm:$0xff]  }
 0x10c   :  { %5225 = vmatpush1.bf16.msra.mxu1 %v7585_v32  ;;  %5185 = vmatprep.subr.bf16.mxu0 %v7590_v41  ;;  %v7647_v30 = vld [vmem:[%s11156_s1 + $0x1364] ss:$16 sps:$4 sm:$0xff]   ;;  %v7642_v32 = vld [vmem:[%s11156_s1 + $0x1160] ss:$16 sps:$4 sm:$0xff]  }
 0x10d   :  { %5226 = vmatprep.subr.bf16.mxu1 %v7593_v22  ;;  %v7645_v33 = vld [vmem:[%s11156_s1 + $0x1360] ss:$16 sps:$4 sm:$0xff]   ;;  %v7650_v34 = vld [vmem:[%s11156_s1 + $0x1144] ss:$16 sps:$4 sm:$0xff]  }
 0x10e   :  { %v7653_v41 = vld [vmem:[%s11156_s1 + $0x1344] ss:$16 sps:$4 sm:$0xff]   ;;  %v7648_v22 = vld [vmem:[%s11156_s1 + $0x1140] ss:$16 sps:$4 sm:$0xff]  }
 0x10f   :  { %5186 = vmatpush1.bf16.msra.mxu0 %v7588_v23  ;;  %v7651_v23 = vld [vmem:[%s11156_s1 + $0x1340] ss:$16 sps:$4 sm:$0xff]  }
 0x110   :  { %5227 = vmatpush1.bf16.msra.mxu1 %v7591_v44  ;;  %5187 = vmatprep.subr.bf16.mxu0 %v7596_v45  ;;  %v7656_v44 = vld [vmem:[%s11156_s1 + $0x1124] ss:$16 sps:$4 sm:$0xff]  }
 0x111   :  { %5228 = vmatprep.subr.bf16.mxu1 %v7599_v46  ;;  %v7659_v45 = vld [vmem:[%s11156_s1 + $0x1324] ss:$16 sps:$4 sm:$0xff]   ;;  %v7654_v46 = vld [vmem:[%s11156_s1 + $0x1120] ss:$16 sps:$4 sm:$0xff]  }
 0x113   :  { %5188 = vmatpush1.bf16.msra.mxu0 %v7594_v48  ;;  %v7657_v48 = vld [vmem:[%s11156_s1 + $0x1320] ss:$16 sps:$4 sm:$0xff]  }
 0x114   :  { %5229 = vmatpush1.bf16.msra.mxu1 %v7597_v49  ;;  %5189 = vmatprep.subr.bf16.mxu0 %v7602_v50  ;;  %v7662_v49 = vld [vmem:[%s11156_s1 + $0x1104] ss:$16 sps:$4 sm:$0xff]  }
 0x115   :  { %5230 = vmatprep.subr.bf16.mxu1 %v7605_v52  ;;  %v7665_v50 = vld [vmem:[%s11156_s1 + $0x1304] ss:$16 sps:$4 sm:$0xff]   ;;  %v7660_v52 = vld [vmem:[%s11156_s1 + $0x1100] ss:$16 sps:$4 sm:$0xff]  }
 0x117   :  { %5190 = vmatpush1.bf16.msra.mxu0 %v7600_v53  ;;  %v7663_v53 = vld [vmem:[%s11156_s1 + $0x1300] ss:$16 sps:$4 sm:$0xff]  }
 0x118   :  { %5231 = vmatpush1.bf16.msra.mxu1 %v7603_v55  ;;  %5191 = vmatprep.subr.bf16.mxu0 %v7608_v56  ;;  %v7672_v55 = vld [vmem:[%s11156_s1 + $0x14e4] ss:$16 sps:$4 sm:$0xff]  }
 0x119   :  { %5232 = vmatprep.subr.bf16.mxu1 %v7611_v57  ;;  %v7675_v56 = vld [vmem:[%s11156_s1 + $0x16e4] ss:$16 sps:$4 sm:$0xff]  }
 0x11a   :  { %v9544_v57 = vld [vmem:[%s11157_s0 + $0x50] sm:$0xff] }
 0x11b   :  { %5192 = vmatpush1.bf16.msra.mxu0 %v7606_v58  ;;  %v9549_v58 = vld [vmem:[%s11157_s0 + $0x58] sm:$0xff] }
 0x11c   :  { %5233 = vmatpush1.bf16.msra.mxu1 %v7609_v59  ;;  %5193 = vmatprep.subr.bf16.mxu0 %v7614_v60  ;;  %v7670_v59 = vld [vmem:[%s11156_s1 + $0x14e0] ss:$16 sps:$4 sm:$0xff]  }
 0x11d   :  { %5234 = vmatprep.subr.bf16.mxu1 %v7617_v61  ;;  %v7673_v60 = vld [vmem:[%s11156_s1 + $0x16e0] ss:$16 sps:$4 sm:$0xff]   ;;  %v9559_v61 = vcombine.low %v9329_v2, %v9329_v2 }
 0x11e   :  { %v7676_v2 = vld [vmem:[%s11156_s1 + $0x14c0] ss:$16 sps:$4 sm:$0xff]  }
 0x11f   :  { %5194 = vmatpush1.bf16.msra.mxu0 %v7612_v62  ;;  %v9563_v62 = vcombine.low %v9334_v3, %v9334_v3  ;;  %v7679_v3 = vld [vmem:[%s11156_s1 + $0x16c0] ss:$16 sps:$4 sm:$0xff]  }
 0x120   :  { %5235 = vmatpush1.bf16.msra.mxu1 %v7615_v63  ;;  %5195 = vmatprep.subr.bf16.mxu0 %v7620_v4  ;;  %v7678_v63 = vld [vmem:[%s11156_s1 + $0x14c4] ss:$16 sps:$4 sm:$0xff]  }
 0x121   :  { %5236 = vmatprep.subr.bf16.mxu1 %v7623_v35  ;;  %v7681_v4 = vld [vmem:[%s11156_s1 + $0x16c4] ss:$16 sps:$4 sm:$0xff]   ;;  %v9579_v35 = vcombine.high %v9544_v57, %v9544_v57 }
 0x123   :  { %5196 = vmatpush2.bf16.msra.mxu0 %v7618_v40  ;;  %v9583_v40 = vcombine.high %v9549_v58, %v9549_v58 }
 0x124   :  { %5237 = vmatpush2.bf16.msra.mxu1 %v7621_v5  ;;  %5197 = vmatprep.subr.bf16.mxu0 %v7626_v8 }
 0x125   :  { %5238 = vmatprep.subr.bf16.mxu1 %v7629_v11 }
 0x127   :  { %5198 = vmatpush2.bf16.msra.mxu0 %v7624_v12 }
 0x128   :  { %5239 = vmatpush2.bf16.msra.mxu1 %v7627_v13  ;;  %5199 = vmatprep.subr.bf16.mxu0 %v7632_v14  ;;  %v7684_v14 = vld [vmem:[%s11156_s1 + $0x14a4] ss:$16 sps:$4 sm:$0xff]  }
 0x129   :  { %5240 = vmatprep.subr.bf16.mxu1 %v7635_v15  ;;  %v7687_v15 = vld [vmem:[%s11156_s1 + $0x16a4] ss:$16 sps:$4 sm:$0xff]  }
 0x12b   :  { %5200 = vmatpush2.bf16.msra.mxu0 %v7630_v18 }
 0x12c   :  { %5241 = vmatpush2.bf16.msra.mxu1 %v7633_v19  ;;  %5201 = vmatprep.subr.bf16.mxu0 %v7638_v20  ;;  %v7685_v20 = vld [vmem:[%s11156_s1 + $0x16a0] ss:$16 sps:$4 sm:$0xff]  }
 0x12d   :  { %5242 = vmatprep.subr.bf16.mxu1 %v7641_v21 }
 0x12f   :  { %5202 = vmatpush2.bf16.msra.mxu0 %v7636_v27 }
 0x130   :  { %5243 = vmatpush2.bf16.msra.mxu1 %v7639_v28  ;;  %5203 = vmatprep.subr.bf16.mxu0 %v7644_v29 }
 0x131   :  { %5244 = vmatprep.subr.bf16.mxu1 %v7647_v30  ;;  %v7690_v30 = vld [vmem:[%s11156_s1 + $0x1484] ss:$16 sps:$4 sm:$0xff]  }
 0x133   :  { %5204 = vmatpush2.bf16.msra.mxu0 %v7642_v32  ;;  %v7693_v32 = vld [vmem:[%s11156_s1 + $0x1684] ss:$16 sps:$4 sm:$0xff]  }
 0x134   :  { %5245 = vmatpush2.bf16.msra.mxu1 %v7645_v33  ;;  %5205 = vmatprep.subr.bf16.mxu0 %v7650_v34  ;;  %v7688_v33 = vld [vmem:[%s11156_s1 + $0x1480] ss:$16 sps:$4 sm:$0xff]  }
 0x135   :  { %5246 = vmatprep.subr.bf16.mxu1 %v7653_v41  ;;  %v7691_v34 = vld [vmem:[%s11156_s1 + $0x1680] ss:$16 sps:$4 sm:$0xff]   ;;  %v7696_v41 = vld [vmem:[%s11156_s1 + $0x1464] ss:$16 sps:$4 sm:$0xff]  }
 0x137   :  { %5206 = vmatpush2.bf16.msra.mxu0 %v7648_v22  ;;  %v7699_v22 = vld [vmem:[%s11156_s1 + $0x1664] ss:$16 sps:$4 sm:$0xff]  }
 0x138   :  { %5247 = vmatpush2.bf16.msra.mxu1 %v7651_v23  ;;  %5207 = vmatprep.subr.bf16.mxu0 %v7656_v44  ;;  %v7694_v23 = vld [vmem:[%s11156_s1 + $0x1460] ss:$16 sps:$4 sm:$0xff]  }
 0x139   :  { %5248 = vmatprep.subr.bf16.mxu1 %v7659_v45  ;;  %v7697_v44 = vld [vmem:[%s11156_s1 + $0x1660] ss:$16 sps:$4 sm:$0xff]   ;;  %v7702_v45 = vld [vmem:[%s11156_s1 + $0x1444] ss:$16 sps:$4 sm:$0xff]  }
 0x13b   :  { %5208 = vmatpush2.bf16.msra.mxu0 %v7654_v46  ;;  %v7705_v46 = vld [vmem:[%s11156_s1 + $0x1644] ss:$16 sps:$4 sm:$0xff]  }
 0x13c   :  { %5249 = vmatpush2.bf16.msra.mxu1 %v7657_v48  ;;  %5209 = vmatprep.subr.bf16.mxu0 %v7662_v49  ;;  %v7700_v48 = vld [vmem:[%s11156_s1 + $0x1440] ss:$16 sps:$4 sm:$0xff]  }
 0x13d   :  { %5250 = vmatprep.subr.bf16.mxu1 %v7665_v50  ;;  %v7703_v49 = vld [vmem:[%s11156_s1 + $0x1640] ss:$16 sps:$4 sm:$0xff]   ;;  %v7708_v50 = vld [vmem:[%s11156_s1 + $0x1424] ss:$16 sps:$4 sm:$0xff]  }
 0x13f   :  { %5210 = vmatpush2.bf16.msra.mxu0 %v7660_v52  ;;  %v7711_v52 = vld [vmem:[%s11156_s1 + $0x1624] ss:$16 sps:$4 sm:$0xff]  }
 0x140   :  { %5251 = vmatpush2.bf16.msra.mxu1 %v7663_v53  ;;  %5261 = vmatprep.subr.bf16.mxu0 %v7672_v55  ;;  %v7706_v53 = vld [vmem:[%s11156_s1 + $0x1420] ss:$16 sps:$4 sm:$0xff]  }
 0x141   :  { %5302 = vmatprep.subr.bf16.mxu1 %v7675_v56  ;;  %v7709_v55 = vld [vmem:[%s11156_s1 + $0x1620] ss:$16 sps:$4 sm:$0xff]   ;;  %v7714_v56 = vld [vmem:[%s11156_s1 + $0x1404] ss:$16 sps:$4 sm:$0xff]  }
 0x142   :  { %v4967_v5 = vpop.f32.mrf.mxu0  ;;  %5212 = vmatmul.mubr.bf16.vlgmr.msra.gmra.mxu0 %v9559_v61 }
 0x143   :  { %v5008_v8 = vpop.f32.mrf.mxu1  ;;  %5253 = vmatmul.mubr.bf16.vlgmr.msra.gmra.mxu1 %v9563_v62  ;;  %v4968_v11 = vadd.f32 %v4967_v5, %v9367_v26  ;;  %5262 = vmatpush1.bf16.msra.mxu0 %v7670_v59  ;;  %v7682_v26 = vld [vmem:[%s11156_s1 + $0x14a0] ss:$16 sps:$4 sm:$0xff]   ;;  %v7717_v59 = vld [vmem:[%s11156_s1 + $0x1604] ss:$16 sps:$4 sm:$0xff]  }
 0x144   :  { %5303 = vmatpush1.bf16.msra.mxu1 %v7673_v60  ;;  %v4969_v12 = vpop.f32.mrf.mxu0  ;;  %5263 = vmatprep.subr.bf16.mxu0 %v7678_v63  ;;  %v7712_v60 = vld [vmem:[%s11156_s1 + $0x1400] ss:$16 sps:$4 sm:$0xff]  }
 0x145   :  { %v5010_v13 = vpop.f32.mrf.mxu1  ;;  %5304 = vmatprep.subr.bf16.mxu1 %v7681_v4  ;;  %v9594_v18 = vadd.f32 %v5008_v8, %v4968_v11  ;;  %v4970_v19 = vadd.f32 %v4969_v12, %v9374_v31  ;;  %5293 = vmatprep.mubr.bf16.mxu0 %v9579_v35  ;;  %v7715_v63 = vld [vmem:[%s11156_s1 + $0x1600] ss:$16 sps:$4 sm:$0xff]   ;;  %v7720_v4 = vld [vmem:[%s11156_s1 + $0x15e4] ss:$16 sps:$4 sm:$0xff]  }
 0x146   :  { %5334 = vmatprep.mubr.bf16.mxu1 %v9583_v40  ;;  %v4971_v21 = vpop.f32.mrf.mxu0  ;;  %v7721_v5 = vld [vmem:[%s11156_s1 + $0x17e0] ss:$16 sps:$4 sm:$0xff]   ;;  %v7726_v8 = vld [vmem:[%s11156_s1 + $0x15c4] ss:$16 sps:$4 sm:$0xff]  }
 0x147   :  { %v5012_v27 = vpop.f32.mrf.mxu1  ;;  %v9605_v28 = vadd.f32 %v5010_v13, %v4970_v19  ;;  %5264 = vmatpush1.bf16.msra.mxu0 %v7676_v2  ;;  %v7723_v2 = vld [vmem:[%s11156_s1 + $0x17e4] ss:$16 sps:$4 sm:$0xff]   ;;  %v7724_v12 = vld [vmem:[%s11156_s1 + $0x15c0] ss:$16 sps:$4 sm:$0xff]  }
 0x148   :  { %5305 = vmatpush1.bf16.msra.mxu1 %v7679_v3  ;;  %v4972_v29 = vpop.f32.mrf.mxu0  ;;  %5265 = vmatprep.subr.bf16.mxu0 %v7684_v14  ;;  %v7718_v3 = vld [vmem:[%s11156_s1 + $0x15e0] ss:$16 sps:$4 sm:$0xff]   ;;  %v7729_v11 = vld [vmem:[%s11156_s1 + $0x17c4] ss:$16 sps:$4 sm:$0xff]  }
 0x149   :  { %v5013_v31 = vpop.f32.mrf.mxu1  ;;  %5306 = vmatprep.subr.bf16.mxu1 %v7687_v15  ;;  %v7727_v13 = vld [vmem:[%s11156_s1 + $0x17c0] ss:$16 sps:$4 sm:$0xff]   ;;  %v7732_v14 = vld [vmem:[%s11156_s1 + $0x15a4] ss:$16 sps:$4 sm:$0xff]  }
 0x14a   :  { %v7735_v15 = vld [vmem:[%s11156_s1 + $0x17a4] ss:$16 sps:$4 sm:$0xff]   ;;  %v7730_v19 = vld [vmem:[%s11156_s1 + $0x15a0] ss:$16 sps:$4 sm:$0xff]  }
 0x14b   :  { %5266 = vmatpush1.bf16.msra.mxu0 %v7682_v26  ;;  %v7733_v26 = vld [vmem:[%s11156_s1 + $0x17a0] ss:$16 sps:$4 sm:$0xff]   ;;  %v7741_v21 = vld [vmem:[%s11156_s1 + $0x1784] ss:$16 sps:$4 sm:$0xff]  }
 0x14c   :  { %5307 = vmatpush1.bf16.msra.mxu1 %v7685_v20  ;;  %5267 = vmatprep.subr.bf16.mxu0 %v7690_v30  ;;  %v7738_v20 = vld [vmem:[%s11156_s1 + $0x1584] ss:$16 sps:$4 sm:$0xff]   ;;  %v7736_v27 = vld [vmem:[%s11156_s1 + $0x1580] ss:$16 sps:$4 sm:$0xff]  }
 0x14d   :  { %5308 = vmatprep.subr.bf16.mxu1 %v7693_v32  ;;  %v7739_v29 = vld [vmem:[%s11156_s1 + $0x1780] ss:$16 sps:$4 sm:$0xff]   ;;  %v7744_v31 = vld [vmem:[%s11156_s1 + $0x1564] ss:$16 sps:$4 sm:$0xff]  }
 0x14e   :  { %v7747_v30 = vld [vmem:[%s11156_s1 + $0x1764] ss:$16 sps:$4 sm:$0xff]   ;;  %v7742_v32 = vld [vmem:[%s11156_s1 + $0x1560] ss:$16 sps:$4 sm:$0xff]  }
 0x14f   :  { %5268 = vmatpush1.bf16.msra.mxu0 %v7688_v33  ;;  %v7745_v33 = vld [vmem:[%s11156_s1 + $0x1760] ss:$16 sps:$4 sm:$0xff]  }
 0x150   :  { %5309 = vmatpush1.bf16.msra.mxu1 %v7691_v34  ;;  %5269 = vmatprep.subr.bf16.mxu0 %v7696_v41  ;;  %v7750_v34 = vld [vmem:[%s11156_s1 + $0x1544] ss:$16 sps:$4 sm:$0xff]  }
 0x151   :  { %5310 = vmatprep.subr.bf16.mxu1 %v7699_v22  ;;  %v7753_v41 = vld [vmem:[%s11156_s1 + $0x1744] ss:$16 sps:$4 sm:$0xff]   ;;  %v7748_v22 = vld [vmem:[%s11156_s1 + $0x1540] ss:$16 sps:$4 sm:$0xff]  }
 0x153   :  { %5270 = vmatpush1.bf16.msra.mxu0 %v7694_v23  ;;  %v7751_v23 = vld [vmem:[%s11156_s1 + $0x1740] ss:$16 sps:$4 sm:$0xff]  }
 0x154   :  { %5311 = vmatpush1.bf16.msra.mxu1 %v7697_v44  ;;  %5271 = vmatprep.subr.bf16.mxu0 %v7702_v45  ;;  %v7756_v44 = vld [vmem:[%s11156_s1 + $0x1524] ss:$16 sps:$4 sm:$0xff]  }
 0x155   :  { %5312 = vmatprep.subr.bf16.mxu1 %v7705_v46  ;;  %v7759_v45 = vld [vmem:[%s11156_s1 + $0x1724] ss:$16 sps:$4 sm:$0xff]   ;;  %v7754_v46 = vld [vmem:[%s11156_s1 + $0x1520] ss:$16 sps:$4 sm:$0xff]  }
 0x157   :  { %5272 = vmatpush1.bf16.msra.mxu0 %v7700_v48  ;;  %v7757_v48 = vld [vmem:[%s11156_s1 + $0x1720] ss:$16 sps:$4 sm:$0xff]  }
 0x158   :  { %5313 = vmatpush1.bf16.msra.mxu1 %v7703_v49  ;;  %5273 = vmatprep.subr.bf16.mxu0 %v7708_v50  ;;  %v7762_v49 = vld [vmem:[%s11156_s1 + $0x1504] ss:$16 sps:$4 sm:$0xff]  }
 0x159   :  { %5314 = vmatprep.subr.bf16.mxu1 %v7711_v52  ;;  %v7765_v50 = vld [vmem:[%s11156_s1 + $0x1704] ss:$16 sps:$4 sm:$0xff]   ;;  %v7760_v52 = vld [vmem:[%s11156_s1 + $0x1500] ss:$16 sps:$4 sm:$0xff]  }
 0x15b   :  { %5274 = vmatpush1.bf16.msra.mxu0 %v7706_v53  ;;  %v7763_v53 = vld [vmem:[%s11156_s1 + $0x1700] ss:$16 sps:$4 sm:$0xff]  }
 0x15c   :  { %5315 = vmatpush1.bf16.msra.mxu1 %v7709_v55  ;;  %5275 = vmatprep.subr.bf16.mxu0 %v7714_v56  ;;  %v7772_v55 = vld [vmem:[%s11156_s1 + $0x1864] ss:$16 sps:$4 sm:$0xff]   ;;  %v7775_v56 = vld [vmem:[%s11156_s1 + $0xec] ss:$16 sps:$4 sm:$0xff]  }
 0x15d   :  { %5316 = vmatprep.subr.bf16.mxu1 %v7717_v59  ;;  %v7770_v59 = vld [vmem:[%s11156_s1 + $0x1860] ss:$16 sps:$4 sm:$0xff]  }
 0x15f   :  { %5276 = vmatpush1.bf16.msra.mxu0 %v7712_v60  ;;  %v7773_v60 = vld [vmem:[%s11156_s1 + $0xe8] ss:$16 sps:$4 sm:$0xff]  }
 0x160   :  { %5317 = vmatpush1.bf16.msra.mxu1 %v7715_v63  ;;  %5277 = vmatprep.subr.bf16.mxu0 %v7720_v4  ;;  %v9777_v63 = vcombine.low %v9544_v57, %v9544_v57  ;;  %v9781_v4 = vcombine.low %v9549_v58, %v9549_v58  ;;  %v7776_v57 = vld [vmem:[%s11156_s1 + $0x1840] ss:$16 sps:$4 sm:$0xff]   ;;  %v7779_v58 = vld [vmem:[%s11156_s1 + $0xc8] ss:$16 sps:$4 sm:$0xff]  }
 0x161   :  { %5318 = vmatprep.subr.bf16.mxu1 %v7723_v2  ;;  %v7778_v2 = vld [vmem:[%s11156_s1 + $0x1844] ss:$16 sps:$4 sm:$0xff]  }
 0x163   :  { %5278 = vmatpush2.bf16.msra.mxu0 %v7718_v3  ;;  %v7781_v3 = vld [vmem:[%s11156_s1 + $0xcc] ss:$16 sps:$4 sm:$0xff]  }
 0x164   :  { %5319 = vmatpush2.bf16.msra.mxu1 %v7721_v5  ;;  %5279 = vmatprep.subr.bf16.mxu0 %v7726_v8 }
 0x165   :  { %5320 = vmatprep.subr.bf16.mxu1 %v7729_v11 }
 0x167   :  { %5280 = vmatpush2.bf16.msra.mxu0 %v7724_v12 }
 0x168   :  { %5321 = vmatpush2.bf16.msra.mxu1 %v7727_v13  ;;  %5281 = vmatprep.subr.bf16.mxu0 %v7732_v14  ;;  %v7784_v14 = vld [vmem:[%s11156_s1 + $0x1824] ss:$16 sps:$4 sm:$0xff]  }
 0x169   :  { %5322 = vmatprep.subr.bf16.mxu1 %v7735_v15  ;;  %v7787_v15 = vld [vmem:[%s11156_s1 + $0xac] ss:$16 sps:$4 sm:$0xff]  }
 0x16b   :  { %5282 = vmatpush2.bf16.msra.mxu0 %v7730_v19 }
 0x16c   :  { %5323 = vmatpush2.bf16.msra.mxu1 %v7733_v26  ;;  %5283 = vmatprep.subr.bf16.mxu0 %v7738_v20  ;;  %v7785_v20 = vld [vmem:[%s11156_s1 + $0xa8] ss:$16 sps:$4 sm:$0xff]  }
 0x16d   :  { %5324 = vmatprep.subr.bf16.mxu1 %v7741_v21  ;;  %v8405_v21 = vmov 0  }
 0x16f   :  { %5284 = vmatpush2.bf16.msra.mxu0 %v7736_v27 }
 0x170   :  { %5325 = vmatpush2.bf16.msra.mxu1 %v7739_v29  ;;  %5285 = vmatprep.subr.bf16.mxu0 %v7744_v31 }
 0x171   :  { %5326 = vmatprep.subr.bf16.mxu1 %v7747_v30 }
 0x173   :  { %5286 = vmatpush2.bf16.msra.mxu0 %v7742_v32  ;;  %v7790_v32 = vld [vmem:[%s11156_s1 + $0x1804] ss:$16 sps:$4 sm:$0xff]  }
 0x174   :  { %5327 = vmatpush2.bf16.msra.mxu1 %v7745_v33  ;;  %5287 = vmatprep.subr.bf16.mxu0 %v7750_v34  ;;  %v7793_v33 = vld [vmem:[%s11156_s1 + $0x8c] ss:$16 sps:$4 sm:$0xff]   ;;  %v7791_v34 = vld [vmem:[%s11156_s1 + $0x88] ss:$16 sps:$4 sm:$0xff]  }
 0x175   :  { %5328 = vmatprep.subr.bf16.mxu1 %v7753_v41  ;;  %v7794_v41 = vld [vmem:[%s11157_s0 + $0x60] ss:$0 sps:$4 sm:$0xff]  }
 0x177   :  { %5288 = vmatpush2.bf16.msra.mxu0 %v7748_v22  ;;  %v7797_v22 = vld [vmem:[%s11156_s1 + $0x6c] ss:$16 sps:$4 sm:$0xff]  }
 0x178   :  { %5329 = vmatpush2.bf16.msra.mxu1 %v7751_v23  ;;  %5289 = vmatprep.subr.bf16.mxu0 %v7756_v44  ;;  %v7800_v23 = vld [vmem:[%s11156_s1 + $0x2ec] ss:$16 sps:$4 sm:$0xff]   ;;  %v7795_v44 = vld [vmem:[%s11156_s1 + $0x68] ss:$16 sps:$4 sm:$0xff]  }
 0x179   :  { %5330 = vmatprep.subr.bf16.mxu1 %v7759_v45  ;;  %v7798_v45 = vld [vmem:[%s11156_s1 + $0x2e8] ss:$16 sps:$4 sm:$0xff]  }
 0x17b   :  { %5290 = vmatpush2.bf16.msra.mxu0 %v7754_v46  ;;  %v7803_v46 = vld [vmem:[%s11156_s1 + $0x4c] ss:$16 sps:$4 sm:$0xff]  }
 0x17c   :  { %5331 = vmatpush2.bf16.msra.mxu1 %v7757_v48  ;;  %5291 = vmatprep.subr.bf16.mxu0 %v7762_v49  ;;  %v7806_v48 = vld [vmem:[%s11156_s1 + $0x2cc] ss:$16 sps:$4 sm:$0xff]   ;;  %v7801_v49 = vld [vmem:[%s11156_s1 + $0x48] ss:$16 sps:$4 sm:$0xff]  }
 0x17d   :  { %5332 = vmatprep.subr.bf16.mxu1 %v7765_v50  ;;  %v7804_v50 = vld [vmem:[%s11156_s1 + $0x2c8] ss:$16 sps:$4 sm:$0xff]  }
 0x17f   :  { %5292 = vmatpush2.bf16.msra.mxu0 %v7760_v52  ;;  %v7809_v52 = vld [vmem:[%s11156_s1 + $0x2c] ss:$16 sps:$4 sm:$0xff]  }
 0x180   :  { %5333 = vmatpush2.bf16.msra.mxu1 %v7763_v53  ;;  %5351 = vmatprep.subr.bf16.mxu0 %v7772_v55  ;;  %v7812_v53 = vld [vmem:[%s11156_s1 + $0x2ac] ss:$16 sps:$4 sm:$0xff]   ;;  %v7807_v55 = vld [vmem:[%s11156_s1 + $0x28] ss:$16 sps:$4 sm:$0xff]  }
 0x181   :  { %5384 = vmatprep.subr.bf16.mxu1 %v7775_v56  ;;  %v7810_v56 = vld [vmem:[%s11156_s1 + $0x2a8] ss:$16 sps:$4 sm:$0xff]  }
 0x182   :  { %v5049_v5 = vpop.f32.mrf.mxu0  ;;  %5294 = vmatmul.mubr.bf16.vlgmr.msra.gmra.mxu0 %v9777_v63 }
 0x183   :  { %v5090_v8 = vpop.f32.mrf.mxu1  ;;  %5335 = vmatmul.mubr.bf16.vlgmr.msra.gmra.mxu1 %v9781_v4  ;;  %v5050_v11 = vadd.f32 %v5049_v5, %v9594_v18  ;;  %5352 = vmatpush1.bf16.msra.mxu0 %v7770_v59  ;;  %v7782_v18 = vld [vmem:[%s11156_s1 + $0x1820] ss:$16 sps:$4 sm:$0xff]   ;;  %v7815_v59 = vld [vmem:[%s11156_s1 + $0xc] ss:$16 sps:$4 sm:$0xff]   ;;  %v7822_v5 = vld [vmem:[%s11156_s1 + $0x268] ss:$16 sps:$4 sm:$0xff]  }
 0x184   :  { %5385 = vmatpush1.bf16.msra.mxu1 %v7773_v60  ;;  %v5051_v12 = vpop.f32.mrf.mxu0  ;;  %5353 = vmatprep.subr.bf16.mxu0 %v7778_v2  ;;  %v7813_v60 = vld [vmem:[%s11156_s1 + $0x8] ss:$16 sps:$4 sm:$0xff]  }
 0x185   :  { %v5092_v13 = vpop.f32.mrf.mxu1  ;;  %5386 = vmatprep.subr.bf16.mxu1 %v7781_v3  ;;  %v9804_v19 = vadd.f32 %v5090_v8, %v5050_v11  ;;  %v5052_v26 = vadd.f32 %v5051_v12, %v9605_v28  ;;  %5375 = vmatprep.mubr.bf16.mxu0 %v8405_v21  ;;  %v7816_v2 = vld [vmem:[%s11156_s1 + $0x288] ss:$16 sps:$4 sm:$0xff]   ;;  %v7821_v3 = vld [vmem:[%s11156_s1 + $0x1ec] ss:$16 sps:$4 sm:$0xff]  }
 0x186   :  { %5416 = vmatprep.mubr.bf16.mxu1 %v8577_v47  ;;  %v5053_v27 = vpop.f32.mrf.mxu0  ;;  %v7788_v47 = vld [vmem:[%s11156_s1 + $0x1800] ss:$16 sps:$4 sm:$0xff]   ;;  %v7827_v8 = vld [vmem:[%s11156_s1 + $0x1cc] ss:$16 sps:$4 sm:$0xff]   ;;  %v7825_v12 = vld [vmem:[%s11156_s1 + $0x1c8] ss:$16 sps:$4 sm:$0xff]  }
 0x187   :  { %v5094_v29 = vpop.f32.mrf.mxu1  ;;  %v9815_v31 = vadd.f32 %v5092_v13, %v5052_v26  ;;  %5354 = vmatpush1.bf16.msra.mxu0 %v7776_v57  ;;  %v7824_v57 = vld [vmem:[%s11156_s1 + $0x26c] ss:$16 sps:$4 sm:$0xff]   ;;  %v7828_v13 = vld [vmem:[%s11156_s1 + $0x248] ss:$16 sps:$4 sm:$0xff]  }
 0x188   :  { %5387 = vmatpush1.bf16.msra.mxu1 %v7779_v58  ;;  %v5054_v28 = vpop.f32.mrf.mxu0  ;;  %5355 = vmatprep.subr.bf16.mxu0 %v7784_v14  ;;  %v7819_v58 = vld [vmem:[%s11156_s1 + $0x1e8] ss:$16 sps:$4 sm:$0xff]   ;;  %v7830_v11 = vld [vmem:[%s11156_s1 + $0x24c] ss:$16 sps:$4 sm:$0xff]  }
 0x189   :  { %v5095_v30 = vpop.f32.mrf.mxu1  ;;  %5388 = vmatprep.subr.bf16.mxu1 %v7787_v15  ;;  %v7833_v14 = vld [vmem:[%s11156_s1 + $0x1ac] ss:$16 sps:$4 sm:$0xff]   ;;  %v7831_v26 = vld [vmem:[%s11156_s1 + $0x1a8] ss:$16 sps:$4 sm:$0xff]  }
 0x18a   :  { %v7836_v15 = vld [vmem:[%s11156_s1 + $0x22c] ss:$16 sps:$4 sm:$0xff]   ;;  %v7837_v29 = vld [vmem:[%s11156_s1 + $0x188] ss:$16 sps:$4 sm:$0xff]  }
 0x18b   :  { %5356 = vmatpush1.bf16.msra.mxu0 %v7782_v18  ;;  %v7834_v18 = vld [vmem:[%s11156_s1 + $0x228] ss:$16 sps:$4 sm:$0xff]   ;;  %v7842_v27 = vld [vmem:[%s11156_s1 + $0x20c] ss:$16 sps:$4 sm:$0xff]  }
 0x18c   :  { %5389 = vmatpush1.bf16.msra.mxu1 %v7785_v20  ;;  %5357 = vmatprep.subr.bf16.mxu0 %v7790_v32  ;;  %v7839_v20 = vld [vmem:[%s11156_s1 + $0x18c] ss:$16 sps:$4 sm:$0xff]   ;;  %v7840_v28 = vld [vmem:[%s11156_s1 + $0x208] ss:$16 sps:$4 sm:$0xff]  }
 0x18d   :  { %5390 = vmatprep.subr.bf16.mxu1 %v7793_v33  ;;  %v7845_v30 = vld [vmem:[%s11156_s1 + $0x16c] ss:$16 sps:$4 sm:$0xff]   ;;  %v7843_v33 = vld [vmem:[%s11156_s1 + $0x168] ss:$16 sps:$4 sm:$0xff]  }
 0x18e   :  { %v7848_v32 = vld [vmem:[%s11156_s1 + $0x3ec] ss:$16 sps:$4 sm:$0xff]  }
 0x18f   :  { %5358 = vmatpush1.bf16.msra.mxu0 %v7788_v47  ;;  %v7846_v47 = vld [vmem:[%s11156_s1 + $0x3e8] ss:$16 sps:$4 sm:$0xff]  }
 0x190   :  { %5391 = vmatpush1.bf16.msra.mxu1 %v7791_v34  ;;  %5425 = vmatprep.subr.bf16.mxu0 %v7800_v23  ;;  %v7851_v34 = vld [vmem:[%s11156_s1 + $0x14c] ss:$16 sps:$4 sm:$0xff]   ;;  %v7852_v23 = vld [vmem:[%s11156_s1 + $0x3c8] ss:$16 sps:$4 sm:$0xff]  }
 0x191   :  { %5392 = vmatprep.subr.bf16.mxu1 %v7797_v22  ;;  %v7849_v22 = vld [vmem:[%s11156_s1 + $0x148] ss:$16 sps:$4 sm:$0xff]  }
 0x192   :  { %7090 = vmatmul.mubr.msk.bf16.vlgmr.msra.gmra.mxu0 %vm4847_vm0, %v7794_v41  ;;  %v7854_v41 = vld [vmem:[%s11156_s1 + $0x3cc] ss:$16 sps:$4 sm:$0xff]  }
 0x193   :  { %5426 = vmatpush1.bf16.msra.mxu0 %v7798_v45  ;;  %5457 = vmatprep.mubr.bf16.mxu0 %v8588_v51  ;;  %v7818_v51 = vld [vmem:[%s11156_s1 + $0x28c] ss:$16 sps:$4 sm:$0xff]  }
 0x194   :  { %5393 = vmatpush1.bf16.msra.mxu1 %v7795_v44  ;;  %5427 = vmatprep.subr.bf16.mxu0 %v7806_v48  ;;  %v7857_v44 = vld [vmem:[%s11156_s1 + $0x12c] ss:$16 sps:$4 sm:$0xff]   ;;  %v7858_v48 = vld [vmem:[%s11156_s1 + $0x3a8] ss:$16 sps:$4 sm:$0xff]  }
 0x195   :  { %5394 = vmatprep.subr.bf16.mxu1 %v7803_v46  ;;  %v7860_v45 = vld [vmem:[%s11156_s1 + $0x3ac] ss:$16 sps:$4 sm:$0xff]   ;;  %v7855_v46 = vld [vmem:[%s11156_s1 + $0x128] ss:$16 sps:$4 sm:$0xff]  }
 0x197   :  { %5428 = vmatpush1.bf16.msra.mxu0 %v7804_v50  ;;  %v7866_v50 = vld [vmem:[%s11156_s1 + $0x38c] ss:$16 sps:$4 sm:$0xff]  }
 0x198   :  { %5395 = vmatpush1.bf16.msra.mxu1 %v7801_v49  ;;  %5429 = vmatprep.subr.bf16.mxu0 %v7812_v53  ;;  %v7863_v49 = vld [vmem:[%s11156_s1 + $0x10c] ss:$16 sps:$4 sm:$0xff]   ;;  %v7864_v53 = vld [vmem:[%s11156_s1 + $0x388] ss:$16 sps:$4 sm:$0xff]  }
 0x199   :  { %5396 = vmatprep.subr.bf16.mxu1 %v7809_v52  ;;  %v7861_v52 = vld [vmem:[%s11156_s1 + $0x108] ss:$16 sps:$4 sm:$0xff]  }
 0x19b   :  { %5430 = vmatpush1.bf16.msra.mxu0 %v7810_v56  ;;  %v7872_v56 = vld [vmem:[%s11156_s1 + $0x4ec] ss:$16 sps:$4 sm:$0xff]  }
 0x19c   :  { %5397 = vmatpush1.bf16.msra.mxu1 %v7807_v55  ;;  %5431 = vmatprep.subr.bf16.mxu0 %v7818_v51  ;;  %v7869_v55 = vld [vmem:[%s11156_s1 + $0x36c] ss:$16 sps:$4 sm:$0xff]   ;;  %v7870_v51 = vld [vmem:[%s11156_s1 + $0x4e8] ss:$16 sps:$4 sm:$0xff]  }
 0x19d   :  { %5398 = vmatprep.subr.bf16.mxu1 %v7815_v59  ;;  %v7867_v59 = vld [vmem:[%s11156_s1 + $0x368] ss:$16 sps:$4 sm:$0xff]  }
 0x19f   :  { %5432 = vmatpush1.bf16.msra.mxu0 %v7816_v2  ;;  %v7878_v2 = vld [vmem:[%s11156_s1 + $0x4cc] ss:$16 sps:$4 sm:$0xff]  }
 0x1a0   :  { %5399 = vmatpush1.bf16.msra.mxu1 %v7813_v60  ;;  %5433 = vmatprep.subr.bf16.mxu0 %v7824_v57  ;;  %v7875_v60 = vld [vmem:[%s11156_s1 + $0x34c] ss:$16 sps:$4 sm:$0xff]   ;;  %v7876_v57 = vld [vmem:[%s11156_s1 + $0x4c8] ss:$16 sps:$4 sm:$0xff]  }
 0x1a1   :  { %5400 = vmatprep.subr.bf16.mxu1 %v7821_v3  ;;  %v7873_v3 = vld [vmem:[%s11156_s1 + $0x348] ss:$16 sps:$4 sm:$0xff]  }
 0x1a3   :  { %5434 = vmatpush1.bf16.msra.mxu0 %v7822_v5 }
 0x1a4   :  { %5401 = vmatpush2.bf16.msra.mxu1 %v7819_v58  ;;  %5435 = vmatprep.subr.bf16.mxu0 %v7830_v11 }
 0x1a5   :  { %5402 = vmatprep.subr.bf16.mxu1 %v7827_v8 }
 0x1a7   :  { %5436 = vmatpush1.bf16.msra.mxu0 %v7828_v13  ;;  %v7881_v13 = vld [vmem:[%s11156_s1 + $0x32c] ss:$16 sps:$4 sm:$0xff]  }
 0x1a8   :  { %5403 = vmatpush2.bf16.msra.mxu1 %v7825_v12  ;;  %5437 = vmatprep.subr.bf16.mxu0 %v7836_v15 }
 0x1a9   :  { %5404 = vmatprep.subr.bf16.mxu1 %v7833_v14  ;;  %v7884_v14 = vld [vmem:[%s11156_s1 + $0x4ac] ss:$16 sps:$4 sm:$0xff]  }
 0x1ab   :  { %5438 = vmatpush1.bf16.msra.mxu0 %v7834_v18 }
 0x1ac   :  { %5405 = vmatpush2.bf16.msra.mxu1 %v7831_v26  ;;  %5439 = vmatprep.subr.bf16.mxu0 %v7842_v27  ;;  %v7882_v26 = vld [vmem:[%s11156_s1 + $0x4a8] ss:$16 sps:$4 sm:$0xff]  }
 0x1ad   :  { %5406 = vmatprep.subr.bf16.mxu1 %v7839_v20 }
 0x1af   :  { %5440 = vmatpush1.bf16.msra.mxu0 %v7840_v28 }
 0x1b0   :  { %5407 = vmatpush2.bf16.msra.mxu1 %v7837_v29  ;;  %5441 = vmatprep.subr.bf16.mxu0 %v7848_v32  ;;  %v7888_v32 = vld [vmem:[%s11156_s1 + $0x488] ss:$16 sps:$4 sm:$0xff]  }
 0x1b1   :  { %5408 = vmatprep.subr.bf16.mxu1 %v7845_v30  ;;  %v7890_v30 = vld [vmem:[%s11156_s1 + $0x48c] ss:$16 sps:$4 sm:$0xff]  }
 0x1b3   :  { %5442 = vmatpush2.bf16.msra.mxu0 %v7846_v47  ;;  %v7896_v47 = vld [vmem:[%s11156_s1 + $0x6ec] ss:$16 sps:$4 sm:$0xff]  }
 0x1b4   :  { %5409 = vmatpush2.bf16.msra.mxu1 %v7843_v33  ;;  %5443 = vmatprep.subr.bf16.mxu0 %v7854_v41  ;;  %v7893_v33 = vld [vmem:[%s11156_s1 + $0x46c] ss:$16 sps:$4 sm:$0xff]   ;;  %v7894_v41 = vld [vmem:[%s11156_s1 + $0x6e8] ss:$16 sps:$4 sm:$0xff]  }
 0x1b5   :  { %5410 = vmatprep.subr.bf16.mxu1 %v7851_v34  ;;  %v7891_v34 = vld [vmem:[%s11156_s1 + $0x468] ss:$16 sps:$4 sm:$0xff]  }
 0x1b7   :  { %5444 = vmatpush2.bf16.msra.mxu0 %v7852_v23  ;;  %v7902_v23 = vld [vmem:[%s11156_s1 + $0x6cc] ss:$16 sps:$4 sm:$0xff]  }
 0x1b8   :  { %5411 = vmatpush2.bf16.msra.mxu1 %v7849_v22  ;;  %5445 = vmatprep.subr.bf16.mxu0 %v7860_v45  ;;  %v7899_v22 = vld [vmem:[%s11156_s1 + $0x44c] ss:$16 sps:$4 sm:$0xff]   ;;  %v7900_v45 = vld [vmem:[%s11156_s1 + $0x6c8] ss:$16 sps:$4 sm:$0xff]  }
 0x1b9   :  { %5412 = vmatprep.subr.bf16.mxu1 %v7857_v44  ;;  %v7897_v44 = vld [vmem:[%s11156_s1 + $0x448] ss:$16 sps:$4 sm:$0xff]  }
 0x1bb   :  { %5446 = vmatpush2.bf16.msra.mxu0 %v7858_v48  ;;  %v7903_v48 = vld [vmem:[%s11156_s1 + $0x428] ss:$16 sps:$4 sm:$0xff]  }
 0x1bc   :  { %5413 = vmatpush2.bf16.msra.mxu1 %v7855_v46  ;;  %5447 = vmatprep.subr.bf16.mxu0 %v7866_v50  ;;  %v7905_v46 = vld [vmem:[%s11156_s1 + $0x42c] ss:$16 sps:$4 sm:$0xff]  }
 0x1bd   :  { %5414 = vmatprep.subr.bf16.mxu1 %v7863_v49  ;;  %v7906_v49 = vld [vmem:[%s11156_s1 + $0x6a8] ss:$16 sps:$4 sm:$0xff]   ;;  %v7911_v50 = vld [vmem:[%s11156_s1 + $0x40c] ss:$16 sps:$4 sm:$0xff]  }
 0x1bf   :  { %5448 = vmatpush2.bf16.msra.mxu0 %v7864_v53  ;;  %v7912_v53 = vld [vmem:[%s11156_s1 + $0x688] ss:$16 sps:$4 sm:$0xff]  }
 0x1c0   :  { %5415 = vmatpush2.bf16.msra.mxu1 %v7861_v52  ;;  %5449 = vmatprep.subr.bf16.mxu0 %v7869_v55  ;;  %v7909_v52 = vld [vmem:[%s11156_s1 + $0x408] ss:$16 sps:$4 sm:$0xff]   ;;  %v7917_v55 = vld [vmem:[%s11156_s1 + $0x5ec] ss:$16 sps:$4 sm:$0xff]  }
 0x1c1   :  { %5466 = vmatprep.subr.bf16.mxu1 %v7872_v56  ;;  %v7920_v56 = vld [vmem:[%s11156_s1 + $0x66c] ss:$16 sps:$4 sm:$0xff]  }
 0x1c2   :  { %v5131_v58 = vpop.f32.mrf.mxu0 }
 0x1c3   :  { %v5172_v5 = vpop.f32.mrf.mxu1  ;;  %5417 = vmatmul.mubr.bf16.vlgmr.msra.gmra.mxu1 %v8646_v6  ;;  %v5132_v8 = vadd.f32 %v5131_v58, %v9804_v19  ;;  %5450 = vmatpush2.bf16.msra.mxu0 %v7867_v59  ;;  %v7879_v19 = vld [vmem:[%s11156_s1 + $0x328] ss:$16 sps:$4 sm:$0xff]   ;;  %v7929_v58 = vld [vmem:[%s11156_s1 + $0x5ac] ss:$16 sps:$4 sm:$0xff]  }
 0x1c4   :  { %5467 = vmatpush1.bf16.msra.mxu1 %v7870_v51  ;;  %v5133_v11 = vpop.f32.mrf.mxu0  ;;  %5451 = vmatprep.subr.bf16.mxu0 %v7875_v60  ;;  %v7915_v59 = vld [vmem:[%s11156_s1 + $0x5e8] ss:$16 sps:$4 sm:$0xff]   ;;  %v7923_v60 = vld [vmem:[%s11156_s1 + $0x5cc] ss:$16 sps:$4 sm:$0xff]  }
 0x1c5   :  { %v5174_v12 = vpop.f32.mrf.mxu1  ;;  %5468 = vmatprep.subr.bf16.mxu1 %v7878_v2  ;;  %v10010_v15 = vadd.f32 %v5172_v5, %v5132_v8  ;;  %v5134_v6 = vadd.f32 %v5133_v11, %v9815_v31  ;;  %5498 = vmatprep.mubr.bf16.mxu1 %v8742_v36  ;;  %v7887_v31 = vld [vmem:[%s11156_s1 + $0x30c] ss:$16 sps:$4 sm:$0xff]   ;;  %v7885_v36 = vld [vmem:[%s11156_s1 + $0x308] ss:$16 sps:$4 sm:$0xff]  }
 0x1c6   :  { %v5135_v18 = vpop.f32.mrf.mxu0  ;;  %v7918_v51 = vld [vmem:[%s11156_s1 + $0x668] ss:$16 sps:$4 sm:$0xff]   ;;  %v7926_v2 = vld [vmem:[%s11156_s1 + $0x64c] ss:$16 sps:$4 sm:$0xff]  }
 0x1c7   :  { %v5176_v20 = vpop.f32.mrf.mxu1  ;;  %v10020_v27 = vadd.f32 %v5174_v12, %v5134_v6  ;;  %5452 = vmatpush2.bf16.msra.mxu0 %v7873_v3  ;;  %v7921_v3 = vld [vmem:[%s11156_s1 + $0x5c8] ss:$16 sps:$4 sm:$0xff]   ;;  %v7932_v5 = vld [vmem:[%s11156_s1 + $0x62c] ss:$16 sps:$4 sm:$0xff]  }
 0x1c8   :  { %5469 = vmatpush1.bf16.msra.mxu1 %v7876_v57  ;;  %v5136_v29 = vpop.f32.mrf.mxu0  ;;  %5453 = vmatprep.subr.bf16.mxu0 %v7881_v13  ;;  %v7924_v57 = vld [vmem:[%s11156_s1 + $0x648] ss:$16 sps:$4 sm:$0xff]   ;;  %v7935_v12 = vld [vmem:[%s11156_s1 + $0x58c] ss:$16 sps:$4 sm:$0xff]  }
 0x1c9   :  { %v5177_v28 = vpop.f32.mrf.mxu1  ;;  %5470 = vmatprep.subr.bf16.mxu1 %v7884_v14  ;;  %v7927_v8 = vld [vmem:[%s11156_s1 + $0x5a8] ss:$16 sps:$4 sm:$0xff]   ;;  %v7938_v13 = vld [vmem:[%s11156_s1 + $0x60c] ss:$16 sps:$4 sm:$0xff]  }
 0x1ca   :  { %v7930_v11 = vld [vmem:[%s11156_s1 + $0x628] ss:$16 sps:$4 sm:$0xff]   ;;  %v7947_v29 = vld [vmem:[%s11156_s1 + $0x54c] ss:$16 sps:$4 sm:$0xff]  }
 0x1cb   :  { %5454 = vmatpush2.bf16.msra.mxu0 %v7879_v19  ;;  %v7933_v14 = vld [vmem:[%s11156_s1 + $0x588] ss:$16 sps:$4 sm:$0xff]   ;;  %v7941_v19 = vld [vmem:[%s11156_s1 + $0x56c] ss:$16 sps:$4 sm:$0xff]  }
 0x1cc   :  { %5471 = vmatpush1.bf16.msra.mxu1 %v7882_v26  ;;  %5455 = vmatprep.subr.bf16.mxu0 %v7887_v31  ;;  %v7936_v6 = vld [vmem:[%s11156_s1 + $0x608] ss:$16 sps:$4 sm:$0xff]   ;;  %v7944_v26 = vld [vmem:[%s11156_s1 + $0x7ec] ss:$16 sps:$4 sm:$0xff]  }
 0x1cd   :  { %5472 = vmatprep.subr.bf16.mxu1 %v7890_v30  ;;  %v7939_v18 = vld [vmem:[%s11156_s1 + $0x568] ss:$16 sps:$4 sm:$0xff]   ;;  %v7950_v28 = vld [vmem:[%s11156_s1 + $0x7cc] ss:$16 sps:$4 sm:$0xff]  }
 0x1ce   :  { %v7942_v20 = vld [vmem:[%s11156_s1 + $0x7e8] ss:$16 sps:$4 sm:$0xff]  }
 0x1cf   :  { %5456 = vmatpush2.bf16.msra.mxu0 %v7885_v36  ;;  %v7945_v31 = vld [vmem:[%s11156_s1 + $0x548] ss:$16 sps:$4 sm:$0xff]   ;;  %v7953_v36 = vld [vmem:[%s11156_s1 + $0x52c] ss:$16 sps:$4 sm:$0xff]  }
 0x1d0   :  { %5473 = vmatpush1.bf16.msra.mxu1 %v7888_v32  ;;  %5507 = vmatprep.subr.bf16.mxu0 %v7896_v47  ;;  %v7948_v30 = vld [vmem:[%s11156_s1 + $0x7c8] ss:$16 sps:$4 sm:$0xff]   ;;  %v7956_v32 = vld [vmem:[%s11156_s1 + $0x7ac] ss:$16 sps:$4 sm:$0xff]  }
 0x1d1   :  { %5474 = vmatprep.subr.bf16.mxu1 %v7893_v33  ;;  %v7951_v33 = vld [vmem:[%s11156_s1 + $0x528] ss:$16 sps:$4 sm:$0xff]  }
 0x1d2   :  { %5458 = vmatmul.mubr.bf16.vlgmr.msra.gmra.mxu0 %v8648_v7  ;;  %v7908_v7 = vld [vmem:[%s11156_s1 + $0x6ac] ss:$16 sps:$4 sm:$0xff]   ;;  %v7954_v47 = vld [vmem:[%s11156_s1 + $0x7a8] ss:$16 sps:$4 sm:$0xff]  }
 0x1d3   :  { %5508 = vmatpush1.bf16.msra.mxu0 %v7894_v41  ;;  %5539 = vmatprep.mubr.bf16.mxu0 %v8746_v37  ;;  %v7914_v37 = vld [vmem:[%s11156_s1 + $0x68c] ss:$16 sps:$4 sm:$0xff]  }
 0x1d4   :  { %5475 = vmatpush1.bf16.msra.mxu1 %v7891_v34  ;;  %5509 = vmatprep.subr.bf16.mxu0 %v7902_v23  ;;  %v7959_v34 = vld [vmem:[%s11156_s1 + $0x50c] ss:$16 sps:$4 sm:$0xff]   ;;  %v7960_v23 = vld [vmem:[%s11156_s1 + $0x788] ss:$16 sps:$4 sm:$0xff]  }
 0x1d5   :  { %5476 = vmatprep.subr.bf16.mxu1 %v7899_v22  ;;  %v7962_v41 = vld [vmem:[%s11156_s1 + $0x78c] ss:$16 sps:$4 sm:$0xff]   ;;  %v7957_v22 = vld [vmem:[%s11156_s1 + $0x508] ss:$16 sps:$4 sm:$0xff]  }
 0x1d7   :  { %5510 = vmatpush1.bf16.msra.mxu0 %v7900_v45  ;;  %v7968_v45 = vld [vmem:[%s11156_s1 + $0x8ec] ss:$16 sps:$4 sm:$0xff]  }
 0x1d8   :  { %5477 = vmatpush1.bf16.msra.mxu1 %v7897_v44  ;;  %5511 = vmatprep.subr.bf16.mxu0 %v7908_v7  ;;  %v7965_v44 = vld [vmem:[%s11156_s1 + $0x76c] ss:$16 sps:$4 sm:$0xff]   ;;  %v7966_v7 = vld [vmem:[%s11156_s1 + $0x8e8] ss:$16 sps:$4 sm:$0xff]  }
 0x1d9   :  { %5478 = vmatprep.subr.bf16.mxu1 %v7905_v46  ;;  %v7963_v46 = vld [vmem:[%s11156_s1 + $0x768] ss:$16 sps:$4 sm:$0xff]  }
 0x1db   :  { %5512 = vmatpush1.bf16.msra.mxu0 %v7906_v49  ;;  %v7974_v49 = vld [vmem:[%s11156_s1 + $0x8cc] ss:$16 sps:$4 sm:$0xff]  }
 0x1dc   :  { %5479 = vmatpush1.bf16.msra.mxu1 %v7903_v48  ;;  %5513 = vmatprep.subr.bf16.mxu0 %v7914_v37  ;;  %v7971_v48 = vld [vmem:[%s11156_s1 + $0x74c] ss:$16 sps:$4 sm:$0xff]  }
 0x1dd   :  { %5480 = vmatprep.subr.bf16.mxu1 %v7911_v50 }
 0x1df   :  { %5514 = vmatpush1.bf16.msra.mxu0 %v7912_v53  ;;  %v7969_v53 = vld [vmem:[%s11156_s1 + $0x748] ss:$16 sps:$4 sm:$0xff]  }
 0x1e0   :  { %5481 = vmatpush1.bf16.msra.mxu1 %v7909_v52  ;;  %5515 = vmatprep.subr.bf16.mxu0 %v7920_v56 }
 0x1e1   :  { %5482 = vmatprep.subr.bf16.mxu1 %v7917_v55  ;;  %v7972_v55 = vld [vmem:[%s11156_s1 + $0x8c8] ss:$16 sps:$4 sm:$0xff]  }
 0x1e3   :  { %5516 = vmatpush1.bf16.msra.mxu0 %v7918_v51 }
 0x1e4   :  { %5483 = vmatpush2.bf16.msra.mxu1 %v7915_v59  ;;  %5517 = vmatprep.subr.bf16.mxu0 %v7926_v2 }
 0x1e5   :  { %5484 = vmatprep.subr.bf16.mxu1 %v7923_v60 }
 0x1e7   :  { %5518 = vmatpush1.bf16.msra.mxu0 %v7924_v57 }
 0x1e8   :  { %5485 = vmatpush2.bf16.msra.mxu1 %v7921_v3  ;;  %5519 = vmatprep.subr.bf16.mxu0 %v7932_v5  ;;  %v7978_v5 = vld [vmem:[%s11156_s1 + $0x8a8] ss:$16 sps:$4 sm:$0xff]  }
 0x1e9   :  { %5486 = vmatprep.subr.bf16.mxu1 %v7929_v58  ;;  %v7975_v58 = vld [vmem:[%s11156_s1 + $0x728] ss:$16 sps:$4 sm:$0xff]  }
 0x1eb   :  { %5520 = vmatpush1.bf16.msra.mxu0 %v7930_v11 }
 0x1ec   :  { %5487 = vmatpush2.bf16.msra.mxu1 %v7927_v8  ;;  %5521 = vmatprep.subr.bf16.mxu0 %v7938_v13  ;;  %v7984_v13 = vld [vmem:[%s11156_s1 + $0x888] ss:$16 sps:$4 sm:$0xff]  }
 0x1ed   :  { %5488 = vmatprep.subr.bf16.mxu1 %v7935_v12  ;;  %v7981_v12 = vld [vmem:[%s11156_s1 + $0x708] ss:$16 sps:$4 sm:$0xff]  }
 0x1ef   :  { %5522 = vmatpush1.bf16.msra.mxu0 %v7936_v6  ;;  %v7992_v6 = vld [vmem:[%s11156_s1 + $0xaec] ss:$16 sps:$4 sm:$0xff]  }
 0x1f0   :  { %5489 = vmatpush2.bf16.msra.mxu1 %v7933_v14  ;;  %5523 = vmatprep.subr.bf16.mxu0 %v7944_v26  ;;  %v7989_v14 = vld [vmem:[%s11156_s1 + $0x86c] ss:$16 sps:$4 sm:$0xff]   ;;  %v7990_v26 = vld [vmem:[%s11156_s1 + $0xae8] ss:$16 sps:$4 sm:$0xff]  }
 0x1f1   :  { %5490 = vmatprep.subr.bf16.mxu1 %v7941_v19  ;;  %v7987_v19 = vld [vmem:[%s11156_s1 + $0x868] ss:$16 sps:$4 sm:$0xff]  }
 0x1f3   :  { %5524 = vmatpush2.bf16.msra.mxu0 %v7942_v20  ;;  %v7998_v20 = vld [vmem:[%s11156_s1 + $0xacc] ss:$16 sps:$4 sm:$0xff]  }
 0x1f4   :  { %5491 = vmatpush2.bf16.msra.mxu1 %v7939_v18  ;;  %5525 = vmatprep.subr.bf16.mxu0 %v7950_v28  ;;  %v7995_v18 = vld [vmem:[%s11156_s1 + $0x84c] ss:$16 sps:$4 sm:$0xff]   ;;  %v7996_v28 = vld [vmem:[%s11156_s1 + $0xac8] ss:$16 sps:$4 sm:$0xff]  }
 0x1f5   :  { %5492 = vmatprep.subr.bf16.mxu1 %v7947_v29  ;;  %v7993_v29 = vld [vmem:[%s11156_s1 + $0x848] ss:$16 sps:$4 sm:$0xff]  }
 0x1f7   :  { %5526 = vmatpush2.bf16.msra.mxu0 %v7948_v30  ;;  %v7999_v30 = vld [vmem:[%s11156_s1 + $0x828] ss:$16 sps:$4 sm:$0xff]  }
 0x1f8   :  { %5493 = vmatpush2.bf16.msra.mxu1 %v7945_v31  ;;  %5527 = vmatprep.subr.bf16.mxu0 %v7956_v32  ;;  %v8001_v31 = vld [vmem:[%s11156_s1 + $0x82c] ss:$16 sps:$4 sm:$0xff]  }
 0x1f9   :  { %5494 = vmatprep.subr.bf16.mxu1 %v7953_v36  ;;  %v8002_v36 = vld [vmem:[%s11156_s1 + $0xaa8] ss:$16 sps:$4 sm:$0xff]   ;;  %v8007_v32 = vld [vmem:[%s11156_s1 + $0x80c] ss:$16 sps:$4 sm:$0xff]  }
 0x1fb   :  { %5528 = vmatpush2.bf16.msra.mxu0 %v7954_v47  ;;  %v8008_v47 = vld [vmem:[%s11156_s1 + $0xa88] ss:$16 sps:$4 sm:$0xff]  }
 0x1fc   :  { %5495 = vmatpush2.bf16.msra.mxu1 %v7951_v33  ;;  %5529 = vmatprep.subr.bf16.mxu0 %v7962_v41  ;;  %v8005_v33 = vld [vmem:[%s11156_s1 + $0x808] ss:$16 sps:$4 sm:$0xff]   ;;  %v8016_v41 = vld [vmem:[%s11156_s1 + $0xa6c] ss:$16 sps:$4 sm:$0xff]  }
 0x1fd   :  { %5496 = vmatprep.subr.bf16.mxu1 %v7959_v34  ;;  %v8013_v34 = vld [vmem:[%s11156_s1 + $0x9ec] ss:$16 sps:$4 sm:$0xff]  }
 0x1ff   :  { %5530 = vmatpush2.bf16.msra.mxu0 %v7960_v23  ;;  %v8014_v23 = vld [vmem:[%s11156_s1 + $0xa68] ss:$16 sps:$4 sm:$0xff]  }
 0x200   :  { %5497 = vmatpush2.bf16.msra.mxu1 %v7957_v22  ;;  %5531 = vmatprep.subr.bf16.mxu0 %v7965_v44  ;;  %v8011_v22 = vld [vmem:[%s11156_s1 + $0x9e8] ss:$16 sps:$4 sm:$0xff]   ;;  %v8019_v44 = vld [vmem:[%s11156_s1 + $0x9cc] ss:$16 sps:$4 sm:$0xff]  }
 0x201   :  { %5548 = vmatprep.subr.bf16.mxu1 %v7968_v45  ;;  %v8022_v45 = vld [vmem:[%s11156_s1 + $0xa4c] ss:$16 sps:$4 sm:$0xff]  }
 0x202   :  { %v5213_v50 = vpop.f32.mrf.mxu0 }
 0x203   :  { %v5254_v37 = vpop.f32.mrf.mxu1  ;;  %5499 = vmatmul.mubr.bf16.vlgmr.msra.gmra.mxu1 %v8866_v16  ;;  %v5214_v52 = vadd.f32 %v5213_v50, %v10010_v15  ;;  %5532 = vmatpush2.bf16.msra.mxu0 %v7963_v46  ;;  %v7977_v16 = vld [vmem:[%s11156_s1 + $0x72c] ss:$16 sps:$4 sm:$0xff]   ;;  %v8017_v46 = vld [vmem:[%s11156_s1 + $0x9c8] ss:$16 sps:$4 sm:$0xff]  }
 0x204   :  { %5549 = vmatpush1.bf16.msra.mxu1 %v7966_v7  ;;  %v5215_v56 = vpop.f32.mrf.mxu0  ;;  %5533 = vmatprep.subr.bf16.mxu0 %v7971_v48  ;;  %v7980_v15 = vld [vmem:[%s11156_s1 + $0x8ac] ss:$16 sps:$4 sm:$0xff]   ;;  %v8020_v7 = vld [vmem:[%s11156_s1 + $0xa48] ss:$16 sps:$4 sm:$0xff]  }
 0x205   :  { %v5256_v59 = vpop.f32.mrf.mxu1  ;;  %5550 = vmatprep.subr.bf16.mxu1 %v7974_v49  ;;  %v10212_v51 = vadd.f32 %v5254_v37, %v5214_v52  ;;  %v5216_v60 = vadd.f32 %v5215_v56, %v10020_v27  ;;  %5580 = vmatprep.mubr.bf16.mxu1 %v8896_v24  ;;  %v7983_v24 = vld [vmem:[%s11156_s1 + $0x70c] ss:$16 sps:$4 sm:$0xff]   ;;  %v8023_v50 = vld [vmem:[%s11156_s1 + $0x9a8] ss:$16 sps:$4 sm:$0xff]  }
 0x206   :  { %v5217_v2 = vpop.f32.mrf.mxu0  ;;  %v7986_v27 = vld [vmem:[%s11156_s1 + $0x88c] ss:$16 sps:$4 sm:$0xff]   ;;  %v8026_v37 = vld [vmem:[%s11156_s1 + $0xa28] ss:$16 sps:$4 sm:$0xff]  }
 0x207   :  { %v5258_v3 = vpop.f32.mrf.mxu1  ;;  %v10216_v57 = vadd.f32 %v5256_v59, %v5216_v60  ;;  %5534 = vmatpush2.bf16.msra.mxu0 %v7969_v53  ;;  %v8025_v48 = vld [vmem:[%s11156_s1 + $0x9ac] ss:$16 sps:$4 sm:$0xff]   ;;  %v8032_v56 = vld [vmem:[%s11156_s1 + $0xa08] ss:$16 sps:$4 sm:$0xff]  }
 0x208   :  { %5551 = vmatpush1.bf16.msra.mxu1 %v7972_v55  ;;  %v5218_v8 = vpop.f32.mrf.mxu0  ;;  %5535 = vmatprep.subr.bf16.mxu0 %v7977_v16  ;;  %v8028_v49 = vld [vmem:[%s11156_s1 + $0xa2c] ss:$16 sps:$4 sm:$0xff]   ;;  %v8029_v55 = vld [vmem:[%s11156_s1 + $0x988] ss:$16 sps:$4 sm:$0xff]  }
 0x209   :  { %v5259_v11 = vpop.f32.mrf.mxu1  ;;  %5552 = vmatprep.subr.bf16.mxu1 %v7980_v15  ;;  %v8031_v52 = vld [vmem:[%s11156_s1 + $0x98c] ss:$16 sps:$4 sm:$0xff]   ;;  %v8035_v15 = vld [vmem:[%s11156_s1 + $0x968] ss:$16 sps:$4 sm:$0xff]  }
 0x20a   :  { %v8034_v53 = vld [vmem:[%s11156_s1 + $0xa0c] ss:$16 sps:$4 sm:$0xff]   ;;  %v8038_v60 = vld [vmem:[%s11156_s1 + $0xbe8] ss:$16 sps:$4 sm:$0xff]  }
 0x20b   :  { %5536 = vmatpush2.bf16.msra.mxu0 %v7975_v58  ;;  %v8037_v59 = vld [vmem:[%s11156_s1 + $0x96c] ss:$16 sps:$4 sm:$0xff]   ;;  %v8041_v58 = vld [vmem:[%s11156_s1 + $0x948] ss:$16 sps:$4 sm:$0xff]  }
 0x20c   :  { %5553 = vmatpush1.bf16.msra.mxu1 %v7978_v5  ;;  %5537 = vmatprep.subr.bf16.mxu0 %v7983_v24  ;;  %v8040_v16 = vld [vmem:[%s11156_s1 + $0xbec] ss:$16 sps:$4 sm:$0xff]   ;;  %v8044_v5 = vld [vmem:[%s11156_s1 + $0xbc8] ss:$16 sps:$4 sm:$0xff]  }
 0x20d   :  { %5554 = vmatprep.subr.bf16.mxu1 %v7986_v27  ;;  %v8043_v2 = vld [vmem:[%s11156_s1 + $0x94c] ss:$16 sps:$4 sm:$0xff]   ;;  %v8047_v24 = vld [vmem:[%s11156_s1 + $0x928] ss:$16 sps:$4 sm:$0xff]  }
 0x20e   :  { %v8046_v3 = vld [vmem:[%s11156_s1 + $0xbcc] ss:$16 sps:$4 sm:$0xff]   ;;  %v8050_v27 = vld [vmem:[%s11156_s1 + $0xba8] ss:$16 sps:$4 sm:$0xff]  }
 0x20f   :  { %5538 = vmatpush2.bf16.msra.mxu0 %v7981_v12  ;;  %v8049_v8 = vld [vmem:[%s11156_s1 + $0x92c] ss:$16 sps:$4 sm:$0xff]  }
 0x210   :  { %5555 = vmatpush1.bf16.msra.mxu1 %v7984_v13  ;;  %5589 = vmatprep.subr.bf16.mxu0 %v7992_v6  ;;  %v8052_v11 = vld [vmem:[%s11156_s1 + $0xbac] ss:$16 sps:$4 sm:$0xff]   ;;  %v8056_v6 = vld [vmem:[%s11156_s1 + $0xb88] ss:$16 sps:$4 sm:$0xff]  }
 0x211   :  { %5556 = vmatprep.subr.bf16.mxu1 %v7989_v14  ;;  %v8055_v12 = vld [vmem:[%s11156_s1 + $0x90c] ss:$16 sps:$4 sm:$0xff]   ;;  %v8053_v14 = vld [vmem:[%s11156_s1 + $0x908] ss:$16 sps:$4 sm:$0xff]  }
 0x212   :  { %5540 = vmatmul.mubr.bf16.vlgmr.msra.gmra.mxu0 %v8870_v17  ;;  %v8004_v17 = vld [vmem:[%s11156_s1 + $0xaac] ss:$16 sps:$4 sm:$0xff]  }
 0x213   :  { %5590 = vmatpush1.bf16.msra.mxu0 %v7990_v26  ;;  %5621 = vmatprep.mubr.bf16.mxu0 %v8900_v25  ;;  %v8010_v25 = vld [vmem:[%s11156_s1 + $0xa8c] ss:$16 sps:$4 sm:$0xff]  }
 0x214   :  { %5557 = vmatpush1.bf16.msra.mxu1 %v7987_v19  ;;  %5591 = vmatprep.subr.bf16.mxu0 %v7998_v20  ;;  %v8058_v13 = vld [vmem:[%s11156_s1 + $0xb8c] ss:$16 sps:$4 sm:$0xff]   ;;  %v8062_v20 = vld [vmem:[%s11156_s1 + $0xce8] ss:$16 sps:$4 sm:$0xff]  }
 0x215   :  { %5558 = vmatprep.subr.bf16.mxu1 %v7995_v18  ;;  %v8061_v19 = vld [vmem:[%s11156_s1 + $0xb6c] ss:$16 sps:$4 sm:$0xff]   ;;  %v8059_v18 = vld [vmem:[%s11156_s1 + $0xb68] ss:$16 sps:$4 sm:$0xff]  }
 0x216   :  { %v8064_v26 = vld [vmem:[%s11156_s1 + $0xcec] ss:$16 sps:$4 sm:$0xff]  }
 0x217   :  { %5592 = vmatpush1.bf16.msra.mxu0 %v7996_v28  ;;  %v8070_v28 = vld [vmem:[%s11156_s1 + $0xccc] ss:$16 sps:$4 sm:$0xff]  }
 0x218   :  { %5559 = vmatpush1.bf16.msra.mxu1 %v7993_v29  ;;  %5593 = vmatprep.subr.bf16.mxu0 %v8004_v17  ;;  %v8067_v29 = vld [vmem:[%s11156_s1 + $0xb4c] ss:$16 sps:$4 sm:$0xff]  }
 0x219   :  { %5560 = vmatprep.subr.bf16.mxu1 %v8001_v31 }
 0x21b   :  { %5594 = vmatpush1.bf16.msra.mxu0 %v8002_v36  ;;  %v8065_v36 = vld [vmem:[%s11156_s1 + $0xb48] ss:$16 sps:$4 sm:$0xff]  }
 0x21c   :  { %5561 = vmatpush1.bf16.msra.mxu1 %v7999_v30  ;;  %5595 = vmatprep.subr.bf16.mxu0 %v8010_v25 }
 0x21d   :  { %5562 = vmatprep.subr.bf16.mxu1 %v8007_v32  ;;  %v8068_v32 = vld [vmem:[%s11156_s1 + $0xcc8] ss:$16 sps:$4 sm:$0xff]  }
 0x21f   :  { %5596 = vmatpush1.bf16.msra.mxu0 %v8008_v47 }
 0x220   :  { %5563 = vmatpush1.bf16.msra.mxu1 %v8005_v33  ;;  %5597 = vmatprep.subr.bf16.mxu0 %v8016_v41 }
 0x221   :  { %5564 = vmatprep.subr.bf16.mxu1 %v8013_v34 }
 0x223   :  { %5598 = vmatpush1.bf16.msra.mxu0 %v8014_v23 }
 0x224   :  { %5565 = vmatpush2.bf16.msra.mxu1 %v8011_v22  ;;  %5599 = vmatprep.subr.bf16.mxu0 %v8022_v45  ;;  %v8074_v45 = vld [vmem:[%s11156_s1 + $0xca8] ss:$16 sps:$4 sm:$0xff]  }
 0x225   :  { %5566 = vmatprep.subr.bf16.mxu1 %v8019_v44  ;;  %v8071_v44 = vld [vmem:[%s11156_s1 + $0xb28] ss:$16 sps:$4 sm:$0xff]  }
 0x227   :  { %5600 = vmatpush1.bf16.msra.mxu0 %v8020_v7 }
 0x228   :  { %5567 = vmatpush2.bf16.msra.mxu1 %v8017_v46  ;;  %5601 = vmatprep.subr.bf16.mxu0 %v8028_v49  ;;  %v8080_v49 = vld [vmem:[%s11156_s1 + $0xc88] ss:$16 sps:$4 sm:$0xff]  }
 0x229   :  { %5568 = vmatprep.subr.bf16.mxu1 %v8025_v48  ;;  %v8077_v48 = vld [vmem:[%s11156_s1 + $0xb08] ss:$16 sps:$4 sm:$0xff]  }
 0x22b   :  { %5602 = vmatpush1.bf16.msra.mxu0 %v8026_v37  ;;  %v8088_v37 = vld [vmem:[%s11156_s1 + $0xeec] ss:$16 sps:$4 sm:$0xff]  }
 0x22c   :  { %5569 = vmatpush2.bf16.msra.mxu1 %v8023_v50  ;;  %5603 = vmatprep.subr.bf16.mxu0 %v8034_v53  ;;  %v8085_v50 = vld [vmem:[%s11156_s1 + $0xc6c] ss:$16 sps:$4 sm:$0xff]   ;;  %v8086_v53 = vld [vmem:[%s11156_s1 + $0xee8] ss:$16 sps:$4 sm:$0xff]  }
 0x22d   :  { %5570 = vmatprep.subr.bf16.mxu1 %v8031_v52  ;;  %v8083_v52 = vld [vmem:[%s11156_s1 + $0xc68] ss:$16 sps:$4 sm:$0xff]  }
 0x22f   :  { %5604 = vmatpush1.bf16.msra.mxu0 %v8032_v56  ;;  %v8094_v56 = vld [vmem:[%s11156_s1 + $0xecc] ss:$16 sps:$4 sm:$0xff]  }
 0x230   :  { %5571 = vmatpush2.bf16.msra.mxu1 %v8029_v55  ;;  %5605 = vmatprep.subr.bf16.mxu0 %v8040_v16  ;;  %v8091_v55 = vld [vmem:[%s11156_s1 + $0xc4c] ss:$16 sps:$4 sm:$0xff]  }
 0x231   :  { %5572 = vmatprep.subr.bf16.mxu1 %v8037_v59 }
 0x233   :  { %5606 = vmatpush2.bf16.msra.mxu0 %v8038_v60  ;;  %v8092_v60 = vld [vmem:[%s11156_s1 + $0xec8] ss:$16 sps:$4 sm:$0xff]  }
 0x234   :  { %5573 = vmatpush2.bf16.msra.mxu1 %v8035_v15  ;;  %5607 = vmatprep.subr.bf16.mxu0 %v8046_v3  ;;  %v8089_v15 = vld [vmem:[%s11156_s1 + $0xc48] ss:$16 sps:$4 sm:$0xff]   ;;  %v8097_v3 = vld [vmem:[%s11156_s1 + $0xc2c] ss:$16 sps:$4 sm:$0xff]  }
 0x235   :  { %5574 = vmatprep.subr.bf16.mxu1 %v8043_v2 }
 0x237   :  { %5608 = vmatpush2.bf16.msra.mxu0 %v8044_v5 }
 0x238   :  { %5575 = vmatpush2.bf16.msra.mxu1 %v8041_v58  ;;  %5609 = vmatprep.subr.bf16.mxu0 %v8052_v11  ;;  %v8098_v11 = vld [vmem:[%s11156_s1 + $0xea8] ss:$16 sps:$4 sm:$0xff]  }
 0x239   :  { %5576 = vmatprep.subr.bf16.mxu1 %v8049_v8  ;;  %v8095_v8 = vld [vmem:[%s11156_s1 + $0xc28] ss:$16 sps:$4 sm:$0xff]  }
 0x23b   :  { %5610 = vmatpush2.bf16.msra.mxu0 %v8050_v27  ;;  %v8103_v27 = vld [vmem:[%s11156_s1 + $0xc0c] ss:$16 sps:$4 sm:$0xff]  }
 0x23c   :  { %5577 = vmatpush2.bf16.msra.mxu1 %v8047_v24  ;;  %5611 = vmatprep.subr.bf16.mxu0 %v8058_v13  ;;  %v8104_v13 = vld [vmem:[%s11156_s1 + $0xe88] ss:$16 sps:$4 sm:$0xff]  }
 0x23d   :  { %5578 = vmatprep.subr.bf16.mxu1 %v8055_v12  ;;  %v8101_v12 = vld [vmem:[%s11156_s1 + $0xc08] ss:$16 sps:$4 sm:$0xff]  }
 0x23f   :  { %5612 = vmatpush2.bf16.msra.mxu0 %v8056_v6  ;;  %v8112_v6 = vld [vmem:[%s11156_s1 + $0xe6c] ss:$16 sps:$4 sm:$0xff]  }
 0x240   :  { %5579 = vmatpush2.bf16.msra.mxu1 %v8053_v14  ;;  %5613 = vmatprep.subr.bf16.mxu0 %v8061_v19  ;;  %v8109_v14 = vld [vmem:[%s11156_s1 + $0xdec] ss:$16 sps:$4 sm:$0xff]   ;;  %v8107_v19 = vld [vmem:[%s11156_s1 + $0xde8] ss:$16 sps:$4 sm:$0xff]  }
 0x241   :  { %5630 = vmatprep.subr.bf16.mxu1 %v8064_v26  ;;  %v8110_v26 = vld [vmem:[%s11156_s1 + $0xe68] ss:$16 sps:$4 sm:$0xff]  }
 0x242   :  { %v5295_v31 = vpop.f32.mrf.mxu0 }
 0x243   :  { %v5336_v17 = vpop.f32.mrf.mxu1  ;;  %5581 = vmatmul.mubr.bf16.vlgmr.msra.gmra.mxu1 %v9096_v38  ;;  %v5296_v30 = vadd.f32 %v5295_v31, %v10212_v51  ;;  %5614 = vmatpush2.bf16.msra.mxu0 %v8059_v18  ;;  %v8073_v38 = vld [vmem:[%s11156_s1 + $0xb2c] ss:$16 sps:$4 sm:$0xff]  }
 0x244   :  { %5631 = vmatpush1.bf16.msra.mxu1 %v8062_v20  ;;  %v5297_v25 = vpop.f32.mrf.mxu0  ;;  %5615 = vmatprep.subr.bf16.mxu0 %v8067_v29  ;;  %v8076_v51 = vld [vmem:[%s11156_s1 + $0xcac] ss:$16 sps:$4 sm:$0xff]   ;;  %v8113_v29 = vld [vmem:[%s11156_s1 + $0xdc8] ss:$16 sps:$4 sm:$0xff]  }
 0x245   :  { %v5338_v33 = vpop.f32.mrf.mxu1  ;;  %5632 = vmatprep.subr.bf16.mxu1 %v8070_v28  ;;  %v5337_v47 = vadd.f32 %v5336_v17, %v5296_v30  ;;  %v5298_v34 = vadd.f32 %v5297_v25, %v10216_v57  ;;  %5662 = vmatprep.mubr.bf16.mxu1 %v9118_v42  ;;  %v8079_v42 = vld [vmem:[%s11156_s1 + $0xb0c] ss:$16 sps:$4 sm:$0xff]   ;;  %v8116_v28 = vld [vmem:[%s11156_s1 + $0xe48] ss:$16 sps:$4 sm:$0xff]  }
 0x246   :  { %v5299_v41 = vpop.f32.mrf.mxu0  ;;  %v8082_v57 = vld [vmem:[%s11156_s1 + $0xc8c] ss:$16 sps:$4 sm:$0xff]   ;;  %v8119_v30 = vld [vmem:[%s11156_s1 + $0xda8] ss:$16 sps:$4 sm:$0xff]  }
 0x247   :  { %v5340_v22 = vpop.f32.mrf.mxu1  ;;  %v5339_v23 = vadd.f32 %v5338_v33, %v5298_v34  ;;  %5616 = vmatpush2.bf16.msra.mxu0 %v8065_v36  ;;  %v8115_v18 = vld [vmem:[%s11156_s1 + $0xdcc] ss:$16 sps:$4 sm:$0xff]   ;;  %v8122_v36 = vld [vmem:[%s11156_s1 + $0xe28] ss:$16 sps:$4 sm:$0xff]  }
 0x248   :  { %5633 = vmatpush1.bf16.msra.mxu1 %v8068_v32  ;;  %v5300_v46 = vpop.f32.mrf.mxu0  ;;  %5617 = vmatprep.subr.bf16.mxu0 %v8073_v38  ;;  %v8118_v20 = vld [vmem:[%s11156_s1 + $0xe4c] ss:$16 sps:$4 sm:$0xff]   ;;  %v8125_v33 = vld [vmem:[%s11156_s1 + $0xd88] ss:$16 sps:$4 sm:$0xff]  }
 0x249   :  { %v5341_v7 = vpop.f32.mrf.mxu1  ;;  %5634 = vmatprep.subr.bf16.mxu1 %v8076_v51  ;;  %v8121_v31 = vld [vmem:[%s11156_s1 + $0xdac] ss:$16 sps:$4 sm:$0xff]   ;;  %v8128_v38 = vld [vmem:[%s11156_s1 + $0xe08] ss:$16 sps:$4 sm:$0xff]  }
 0x24a   :  { %v8124_v17 = vld [vmem:[%s11156_s1 + $0xe2c] ss:$16 sps:$4 sm:$0xff]   ;;  %v8131_v34 = vld [vmem:[%s11156_s1 + $0xd68] ss:$16 sps:$4 sm:$0xff]  }
 0x24b   :  { %5618 = vmatpush2.bf16.msra.mxu0 %v8071_v44  ;;  %v8127_v32 = vld [vmem:[%s11156_s1 + $0xd8c] ss:$16 sps:$4 sm:$0xff]   ;;  %v8134_v41 = vld [vmem:[%s11156_s1 + $0xfe8] ss:$16 sps:$4 sm:$0xff]  }
 0x24c   :  { %5635 = vmatpush1.bf16.msra.mxu1 %v8074_v45  ;;  %5619 = vmatprep.subr.bf16.mxu0 %v8079_v42  ;;  %v8130_v25 = vld [vmem:[%s11156_s1 + $0xe0c] ss:$16 sps:$4 sm:$0xff]   ;;  %v8137_v44 = vld [vmem:[%s11156_s1 + $0xd48] ss:$16 sps:$4 sm:$0xff]  }
 0x24d   :  { %5636 = vmatprep.subr.bf16.mxu1 %v8082_v57  ;;  %v8133_v51 = vld [vmem:[%s11156_s1 + $0xd6c] ss:$16 sps:$4 sm:$0xff]   ;;  %v8140_v45 = vld [vmem:[%s11156_s1 + $0xfc8] ss:$16 sps:$4 sm:$0xff]  }
 0x24e   :  { %v8139_v22 = vld [vmem:[%s11156_s1 + $0xd4c] ss:$16 sps:$4 sm:$0xff]   ;;  %v8143_v42 = vld [vmem:[%s11156_s1 + $0xd28] ss:$16 sps:$4 sm:$0xff]  }
 0x24f   :  { %5620 = vmatpush2.bf16.msra.mxu0 %v8077_v48  ;;  %v8145_v46 = vld [vmem:[%s11156_s1 + $0xd2c] ss:$16 sps:$4 sm:$0xff]   ;;  %v8146_v57 = vld [vmem:[%s11156_s1 + $0xfa8] ss:$16 sps:$4 sm:$0xff]  }
 0x250   :  { %5637 = vmatpush1.bf16.msra.mxu1 %v8080_v49  ;;  %5671 = vmatprep.subr.bf16.mxu0 %v8088_v37  ;;  %v8148_v7 = vld [vmem:[%s11156_s1 + $0xfac] ss:$16 sps:$4 sm:$0xff]   ;;  %v8152_v37 = vld [vmem:[%s11156_s1 + $0xf88] ss:$16 sps:$4 sm:$0xff]  }
 0x251   :  { %5638 = vmatprep.subr.bf16.mxu1 %v8085_v50  ;;  %v8151_v48 = vld [vmem:[%s11156_s1 + $0xd0c] ss:$16 sps:$4 sm:$0xff]   ;;  %v8149_v50 = vld [vmem:[%s11156_s1 + $0xd08] ss:$16 sps:$4 sm:$0xff]  }
 0x252   :  { %v5377_v59 = vpop.f32.mrf.mxu0  ;;  %5622 = vmatmul.mubr.bf16.vlgmr.msra.gmra.mxu0 %v9100_v39  ;;  %v8100_v39 = vld [vmem:[%s11156_s1 + $0xeac] ss:$16 sps:$4 sm:$0xff]  }
 0x253   :  { %v10453_v16 = vadd.f32 %v5377_v59, %v5337_v47  ;;  %5672 = vmatpush1.bf16.msra.mxu0 %v8086_v53  ;;  %5703 = vmatprep.mubr.bf16.mxu0 %v9122_v43  ;;  %v8106_v43 = vld [vmem:[%s11156_s1 + $0xe8c] ss:$16 sps:$4 sm:$0xff]  }
 0x254   :  { %5639 = vmatpush1.bf16.msra.mxu1 %v8083_v52  ;;  %v5379_v2 = vpop.f32.mrf.mxu0  ;;  %5673 = vmatprep.subr.bf16.mxu0 %v8094_v56  ;;  %v8136_v47 = vld [vmem:[%s11156_s1 + $0xfec] ss:$16 sps:$4 sm:$0xff]   ;;  %v8158_v56 = vld [vmem:[%s11156_s1 + $0x10e8] ss:$16 sps:$4 sm:$0xff]  }
 0x255   :  { %5640 = vmatprep.subr.bf16.mxu1 %v8091_v55  ;;  %v10467_v58 = vadd.f32 %v5379_v2, %v5339_v23  ;;  %v8142_v23 = vld [vmem:[%s11156_s1 + $0xfcc] ss:$16 sps:$4 sm:$0xff]   ;;  %v8155_v55 = vld [vmem:[%s11156_s1 + $0xf68] ss:$16 sps:$4 sm:$0xff]   ;;  %vm5917_vm2 = vcmp.ge.f32.partialorder %v10453_v16, 0.0 }
 0x256   :  { %v5381_v5 = vpop.f32.mrf.mxu0  ;;  %v8154_v49 = vld [vmem:[%s11156_s1 + $0xf8c] ss:$16 sps:$4 sm:$0xff]   ;;  %v8161_v2 = vld [vmem:[%s11156_s1 + $0xf48] ss:$16 sps:$4 sm:$0xff]  }
 0x257   :  { %5674 = vmatpush1.bf16.msra.mxu0 %v8092_v60  ;;  %v8157_v52 = vld [vmem:[%s11156_s1 + $0xf6c] ss:$16 sps:$4 sm:$0xff]   ;;  %vm5918_vm1 = vcmp.ge.f32.partialorder %v10467_v58, 0.0 }
 0x258   :  { %5641 = vmatpush1.bf16.msra.mxu1 %v8089_v15  ;;  %v5382_v24 = vpop.f32.mrf.mxu0  ;;  %5675 = vmatprep.subr.bf16.mxu0 %v8100_v39  ;;  %v8160_v53 = vld [vmem:[%s11156_s1 + $0x10ec] ss:$16 sps:$4 sm:$0xff]  }
 0x259   :  { %5642 = vmatprep.subr.bf16.mxu1 %v8097_v3  ;;  %v8163_v59 = vld [vmem:[%s11156_s1 + $0xf4c] ss:$16 sps:$4 sm:$0xff]   ;;  %v8164_v3 = vld [vmem:[%s11156_s1 + $0x10c8] ss:$16 sps:$4 sm:$0xff]  }
 0x25a   :  { %v8166_v15 = vld [vmem:[%s11156_s1 + $0x10cc] ss:$16 sps:$4 sm:$0xff]   ;;  %v8170_v24 = vld [vmem:[%s11156_s1 + $0x10a8] ss:$16 sps:$4 sm:$0xff]  }
 0x25b   :  { %5676 = vmatpush1.bf16.msra.mxu0 %v8098_v11  ;;  %v8169_v5 = vld [vmem:[%s11156_s1 + $0xf2c] ss:$16 sps:$4 sm:$0xff]   ;;  %v8167_v11 = vld [vmem:[%s11156_s1 + $0xf28] ss:$16 sps:$4 sm:$0xff]  }
 0x25c   :  { %5643 = vmatpush1.bf16.msra.mxu1 %v8095_v8  ;;  %5677 = vmatprep.subr.bf16.mxu0 %v8106_v43  ;;  %v8175_v43 = vld [vmem:[%s11156_s1 + $0xf0c] ss:$16 sps:$4 sm:$0xff]  }
 0x25d   :  { %5644 = vmatprep.subr.bf16.mxu1 %v8103_v27 }
 0x25f   :  { %5678 = vmatpush1.bf16.msra.mxu0 %v8104_v13  ;;  %v834_v13 = vsub.s32 3, %v9293_v54 }
 0x260   :  { %5645 = vmatpush1.bf16.msra.mxu1 %v8101_v12  ;;  %5679 = vmatprep.subr.bf16.mxu0 %v8112_v6  ;;  %v830_v12 = vsub.s32 2, %v9293_v54  ;;  %v8176_v6 = vld [vmem:[%s11156_s1 + $0x1088] ss:$16 sps:$4 sm:$0xff]   ;;  %v8184_v54 = vld [vmem:[%s11156_s1 + $0x12ec] ss:$16 sps:$4 sm:$0xff]  }
 0x261   :  { %5646 = vmatprep.subr.bf16.mxu1 %v8109_v14  ;;  %v8173_v14 = vld [vmem:[%s11156_s1 + $0xf08] ss:$16 sps:$4 sm:$0xff]  }
 0x263   :  { %5680 = vmatpush1.bf16.msra.mxu0 %v8110_v26  ;;  %v8403_v26 = vld [vmem:[%s11158_s2] sm:$0xf] }
 0x264   :  { %5647 = vmatpush2.bf16.msra.mxu1 %v8107_v19  ;;  %5681 = vmatprep.subr.bf16.mxu0 %v8118_v20  ;;  %v8181_v19 = vld [vmem:[%s11156_s1 + $0x106c] ss:$16 sps:$4 sm:$0xff]   ;;  %v835_v20 = vrot.slane %v8403_v26, %v834_v13 }
 0x265   :  { %5648 = vmatprep.subr.bf16.mxu1 %v8115_v18  ;;  %v831_v18 = vrot.slane %v8403_v26, %v830_v12  ;;  %v8241_v12 = vld [vmem:[%s11156_s1 + $0x112c] ss:$16 sps:$4 sm:$0xff]   ;;  %v8245_v26 = vld [vmem:[%s11156_s1 + $0x1108] ss:$16 sps:$4 sm:$0xff]  }
 0x266   :  { %v8244_v13 = vld [vmem:[%s11156_s1 + $0x13ac] ss:$16 sps:$4 sm:$0xff]  }
 0x267   :  { %5682 = vmatpush1.bf16.msra.mxu0 %v8116_v28  ;;  %v8182_v28 = vld [vmem:[%s11156_s1 + $0x12e8] ss:$16 sps:$4 sm:$0xff]  }
 0x268   :  { %5649 = vmatpush2.bf16.msra.mxu1 %v8113_v29  ;;  %5683 = vmatprep.subr.bf16.mxu0 %v8124_v17  ;;  %v8179_v29 = vld [vmem:[%s11156_s1 + $0x1068] ss:$16 sps:$4 sm:$0xff]   ;;  %v8190_v17 = vld [vmem:[%s11156_s1 + $0x12cc] ss:$16 sps:$4 sm:$0xff]  }
 0x269   :  { %5650 = vmatprep.subr.bf16.mxu1 %v8121_v31  ;;  %v8187_v31 = vld [vmem:[%s11156_s1 + $0x104c] ss:$16 sps:$4 sm:$0xff]  }
 0x26b   :  { %5684 = vmatpush1.bf16.msra.mxu0 %v8122_v36  ;;  %v8185_v36 = vld [vmem:[%s11156_s1 + $0x1048] ss:$16 sps:$4 sm:$0xff]  }
 0x26c   :  { %5651 = vmatpush2.bf16.msra.mxu1 %v8119_v30  ;;  %5685 = vmatprep.subr.bf16.mxu0 %v8130_v25 }
 0x26d   :  { %5652 = vmatprep.subr.bf16.mxu1 %v8127_v32  ;;  %v8188_v32 = vld [vmem:[%s11156_s1 + $0x12c8] ss:$16 sps:$4 sm:$0xff]  }
 0x26f   :  { %5686 = vmatpush1.bf16.msra.mxu0 %v8128_v38 }
 0x270   :  { %5653 = vmatpush2.bf16.msra.mxu1 %v8125_v33  ;;  %5687 = vmatprep.subr.bf16.mxu0 %v8136_v47  ;;  %v8193_v33 = vld [vmem:[%s11156_s1 + $0x102c] ss:$16 sps:$4 sm:$0xff]  }
 0x271   :  { %5654 = vmatprep.subr.bf16.mxu1 %v8133_v51 }
 0x273   :  { %5688 = vmatpush2.bf16.msra.mxu0 %v8134_v41 }
 0x274   :  { %5655 = vmatpush2.bf16.msra.mxu1 %v8131_v34  ;;  %5689 = vmatprep.subr.bf16.mxu0 %v8142_v23  ;;  %v8196_v34 = vld [vmem:[%s11156_s1 + $0x12ac] ss:$16 sps:$4 sm:$0xff]  }
 0x275   :  { %5656 = vmatprep.subr.bf16.mxu1 %v8139_v22  ;;  %v8194_v22 = vld [vmem:[%s11156_s1 + $0x12a8] ss:$16 sps:$4 sm:$0xff]  }
 0x277   :  { %5690 = vmatpush2.bf16.msra.mxu0 %v8140_v45  ;;  %v8199_v45 = vld [vmem:[%s11156_s1 + $0x100c] ss:$16 sps:$4 sm:$0xff]  }
 0x278   :  { %5657 = vmatpush2.bf16.msra.mxu1 %v8137_v44  ;;  %5691 = vmatprep.subr.bf16.mxu0 %v8148_v7  ;;  %v8197_v7 = vld [vmem:[%s11156_s1 + $0x1008] ss:$16 sps:$4 sm:$0xff]  }
 0x279   :  { %5658 = vmatprep.subr.bf16.mxu1 %v8145_v46  ;;  %v8202_v46 = vld [vmem:[%s11156_s1 + $0x128c] ss:$16 sps:$4 sm:$0xff]  }
 0x27b   :  { %5692 = vmatpush2.bf16.msra.mxu0 %v8146_v57  ;;  %v8208_v57 = vld [vmem:[%s11156_s1 + $0x126c] ss:$16 sps:$4 sm:$0xff]  }
 0x27c   :  { %5659 = vmatpush2.bf16.msra.mxu1 %v8143_v42  ;;  %5693 = vmatprep.subr.bf16.mxu0 %v8154_v49  ;;  %v8205_v42 = vld [vmem:[%s11156_s1 + $0x11ec] ss:$16 sps:$4 sm:$0xff]   ;;  %v8206_v49 = vld [vmem:[%s11156_s1 + $0x1268] ss:$16 sps:$4 sm:$0xff]  }
 0x27d   :  { %5660 = vmatprep.subr.bf16.mxu1 %v8151_v48  ;;  %v8203_v48 = vld [vmem:[%s11156_s1 + $0x11e8] ss:$16 sps:$4 sm:$0xff]  }
 0x27f   :  { %5694 = vmatpush2.bf16.msra.mxu0 %v8152_v37  ;;  %v8214_v37 = vld [vmem:[%s11156_s1 + $0x124c] ss:$16 sps:$4 sm:$0xff]  }
 0x280   :  { %5661 = vmatpush2.bf16.msra.mxu1 %v8149_v50  ;;  %5695 = vmatprep.subr.bf16.mxu0 %v8157_v52  ;;  %v8211_v50 = vld [vmem:[%s11156_s1 + $0x11cc] ss:$16 sps:$4 sm:$0xff]   ;;  %v8209_v52 = vld [vmem:[%s11156_s1 + $0x11c8] ss:$16 sps:$4 sm:$0xff]  }
 0x281   :  { %5712 = vmatprep.subr.bf16.mxu1 %v8160_v53  ;;  %v8212_v53 = vld [vmem:[%s11156_s1 + $0x1248] ss:$16 sps:$4 sm:$0xff]  }
 0x283   :  { %v5418_v60 = vpop.f32.mrf.mxu1  ;;  %5663 = vmatmul.mubr.bf16.vlgmr.msra.gmra.mxu1 %v9320_v0  ;;  %5696 = vmatpush2.bf16.msra.mxu0 %v8155_v55  ;;  %v8172_v0 = vld [vmem:[%s11156_s1 + $0x10ac] ss:$16 sps:$4 sm:$0xff]  }
 0x284   :  { %5713 = vmatpush1.bf16.msra.mxu1 %v8158_v56  ;;  %5697 = vmatprep.subr.bf16.mxu0 %v8163_v59  ;;  %v5419_v30 = vadd.f32 %v5418_v60, %v831_v18  ;;  %v8217_v55 = vld [vmem:[%s11156_s1 + $0x11ac] ss:$16 sps:$4 sm:$0xff]   ;;  %v8215_v59 = vld [vmem:[%s11156_s1 + $0x11a8] ss:$16 sps:$4 sm:$0xff]  }
 0x285   :  { %v5420_v39 = vpop.f32.mrf.mxu1  ;;  %5714 = vmatprep.subr.bf16.mxu1 %v8166_v15  ;;  %5744 = vmatprep.mubr.bf16.mxu1 %v9347_v9  ;;  %v8178_v9 = vld [vmem:[%s11156_s1 + $0x108c] ss:$16 sps:$4 sm:$0xff]   ;;  %v8218_v15 = vld [vmem:[%s11156_s1 + $0x1228] ss:$16 sps:$4 sm:$0xff]  }
 0x286   :  { %v5421_v38 = vadd.f32 %v5420_v39, %v835_v20  ;;  %v8220_v56 = vld [vmem:[%s11156_s1 + $0x122c] ss:$16 sps:$4 sm:$0xff]   ;;  %v8224_v39 = vld [vmem:[%s11156_s1 + $0x1208] ss:$16 sps:$4 sm:$0xff]  }
 0x287   :  { %v5422_v8 = vpop.f32.mrf.mxu1  ;;  %5698 = vmatpush2.bf16.msra.mxu0 %v8161_v2  ;;  %v8223_v60 = vld [vmem:[%s11156_s1 + $0x118c] ss:$16 sps:$4 sm:$0xff]   ;;  %v8248_v18 = vld [vmem:[%s11156_s1 + $0x1388] ss:$16 sps:$4 sm:$0xff]  }
 0x288   :  { %5715 = vmatpush1.bf16.msra.mxu1 %v8164_v3  ;;  %5699 = vmatprep.subr.bf16.mxu0 %v8169_v5  ;;  %v8226_v2 = vld [vmem:[%s11156_s1 + $0x120c] ss:$16 sps:$4 sm:$0xff]   ;;  %v8221_v3 = vld [vmem:[%s11156_s1 + $0x1188] ss:$16 sps:$4 sm:$0xff]  }
 0x289   :  { %v5423_v27 = vpop.f32.mrf.mxu1  ;;  %5716 = vmatprep.subr.bf16.mxu1 %v8172_v0  ;;  %v8229_v5 = vld [vmem:[%s11156_s1 + $0x116c] ss:$16 sps:$4 sm:$0xff]   ;;  %v8227_v8 = vld [vmem:[%s11156_s1 + $0x1168] ss:$16 sps:$4 sm:$0xff]  }
 0x28a   :  { %v8232_v0 = vld [vmem:[%s11156_s1 + $0x13ec] ss:$16 sps:$4 sm:$0xff]  }
 0x28b   :  { %5700 = vmatpush2.bf16.msra.mxu0 %v8167_v11  ;;  %v8230_v11 = vld [vmem:[%s11156_s1 + $0x13e8] ss:$16 sps:$4 sm:$0xff]   ;;  %v8238_v27 = vld [vmem:[%s11156_s1 + $0x13cc] ss:$16 sps:$4 sm:$0xff]  }
 0x28c   :  { %5717 = vmatpush1.bf16.msra.mxu1 %v8170_v24  ;;  %5701 = vmatprep.subr.bf16.mxu0 %v8175_v43  ;;  %v8235_v24 = vld [vmem:[%s11156_s1 + $0x114c] ss:$16 sps:$4 sm:$0xff]   ;;  %v8233_v43 = vld [vmem:[%s11156_s1 + $0x1148] ss:$16 sps:$4 sm:$0xff]  }
 0x28d   :  { %5718 = vmatprep.subr.bf16.mxu1 %v8178_v9  ;;  %v8236_v9 = vld [vmem:[%s11156_s1 + $0x13c8] ss:$16 sps:$4 sm:$0xff]   ;;  %v8253_v20 = vld [vmem:[%s11156_s1 + $0x136c] ss:$16 sps:$4 sm:$0xff]  }
 0x28f   :  { %5702 = vmatpush2.bf16.msra.mxu0 %v8173_v14  ;;  %v8239_v14 = vld [vmem:[%s11156_s1 + $0x1128] ss:$16 sps:$4 sm:$0xff]  }
 0x290   :  { %5719 = vmatpush1.bf16.msra.mxu1 %v8176_v6  ;;  %5753 = vmatprep.subr.bf16.mxu0 %v8184_v54  ;;  %v8242_v6 = vld [vmem:[%s11156_s1 + $0x13a8] ss:$16 sps:$4 sm:$0xff]   ;;  %v8250_v54 = vld [vmem:[%s11156_s1 + $0x138c] ss:$16 sps:$4 sm:$0xff]  }
 0x291   :  { %5720 = vmatprep.subr.bf16.mxu1 %v8181_v19  ;;  %v8247_v19 = vld [vmem:[%s11156_s1 + $0x110c] ss:$16 sps:$4 sm:$0xff]  }
 0x292   :  { %v5459_v25 = vpop.f32.mrf.mxu0  ;;  %5704 = vmatmul.mubr.bf16.vlgmr.msra.gmra.mxu0 %v9324_v1  ;;  %v8191_v1 = vld [vmem:[%s11156_s1 + $0x1028] ss:$16 sps:$4 sm:$0xff]  }
 0x293   :  { %v10667_v51 = vadd.f32 %v5459_v25, %v5419_v30  ;;  %5754 = vmatpush1.bf16.msra.mxu0 %v8182_v28  ;;  %5785 = vmatprep.mubr.bf16.mxu0 %v9351_v10  ;;  %v8200_v10 = vld [vmem:[%s11156_s1 + $0x1288] ss:$16 sps:$4 sm:$0xff]   ;;  %v8262_v30 = vld [vmem:[%s11156_s1 + $0x14cc] ss:$16 sps:$4 sm:$0xff]  }
 0x294   :  { %5721 = vmatpush1.bf16.msra.mxu1 %v8179_v29  ;;  %v5461_v47 = vpop.f32.mrf.mxu0  ;;  %5755 = vmatprep.subr.bf16.mxu0 %v8190_v17  ;;  %v8256_v29 = vld [vmem:[%s11156_s1 + $0x14ec] ss:$16 sps:$4 sm:$0xff]   ;;  %v8251_v28 = vld [vmem:[%s11156_s1 + $0x1368] ss:$16 sps:$4 sm:$0xff]  }
 0x295   :  { %5722 = vmatprep.subr.bf16.mxu1 %v8187_v31  ;;  %v10672_v41 = vadd.f32 %v5461_v47, %v5421_v38  ;;  %v8254_v31 = vld [vmem:[%s11156_s1 + $0x14e8] ss:$16 sps:$4 sm:$0xff]   ;;  %v8259_v17 = vld [vmem:[%s11156_s1 + $0x134c] ss:$16 sps:$4 sm:$0xff]  }
 0x296   :  { %v5463_v23 = vpop.f32.mrf.mxu0  ;;  %v8257_v25 = vld [vmem:[%s11156_s1 + $0x1348] ss:$16 sps:$4 sm:$0xff]   ;;  %v8265_v47 = vld [vmem:[%s11156_s1 + $0x132c] ss:$16 sps:$4 sm:$0xff]  }
 0x297   :  { %5756 = vmatpush1.bf16.msra.mxu0 %v8188_v32 }
 0x298   :  { %5723 = vmatpush1.bf16.msra.mxu1 %v8185_v36  ;;  %v5464_v44 = vpop.f32.mrf.mxu0  ;;  %5757 = vmatprep.subr.bf16.mxu0 %v8196_v34 }
 0x299   :  { %5724 = vmatprep.subr.bf16.mxu1 %v8193_v33  ;;  %v8260_v33 = vld [vmem:[%s11156_s1 + $0x14c8] ss:$16 sps:$4 sm:$0xff]  }
 0x29a   :  { %v8269_v44 = vld [vmem:[%s11156_s1 + $0x1308] ss:$16 sps:$4 sm:$0xff]  }
 0x29b   :  { %5758 = vmatpush1.bf16.msra.mxu0 %v8194_v22  ;;  %v8266_v22 = vld [vmem:[%s11156_s1 + $0x14a8] ss:$16 sps:$4 sm:$0xff]  }
 0x29c   :  { %5725 = vmatpush1.bf16.msra.mxu1 %v8191_v1  ;;  %5759 = vmatprep.subr.bf16.mxu0 %v8202_v46  ;;  %v8263_v1 = vld [vmem:[%s11156_s1 + $0x1328] ss:$16 sps:$4 sm:$0xff]   ;;  %v8277_v46 = vld [vmem:[%s11156_s1 + $0x146c] ss:$16 sps:$4 sm:$0xff]  }
 0x29d   :  { %5726 = vmatprep.subr.bf16.mxu1 %v8199_v45  ;;  %v8272_v45 = vld [vmem:[%s11156_s1 + $0x1488] ss:$16 sps:$4 sm:$0xff]  }
 0x29f   :  { %5760 = vmatpush1.bf16.msra.mxu0 %v8200_v10  ;;  %v8275_v10 = vld [vmem:[%s11156_s1 + $0x1468] ss:$16 sps:$4 sm:$0xff]  }
 0x2a0   :  { %5727 = vmatpush1.bf16.msra.mxu1 %v8197_v7  ;;  %5761 = vmatprep.subr.bf16.mxu0 %v8208_v57  ;;  %v8280_v7 = vld [vmem:[%s11156_s1 + $0x16ec] ss:$16 sps:$4 sm:$0xff]  }
 0x2a1   :  { %5728 = vmatprep.subr.bf16.mxu1 %v8205_v42  ;;  %v8278_v42 = vld [vmem:[%s11156_s1 + $0x16e8] ss:$16 sps:$4 sm:$0xff]   ;;  %v8283_v57 = vld [vmem:[%s11156_s1 + $0x144c] ss:$16 sps:$4 sm:$0xff]  }
 0x2a3   :  { %5762 = vmatpush1.bf16.msra.mxu0 %v8206_v49 }
 0x2a4   :  { %5729 = vmatpush2.bf16.msra.mxu1 %v8203_v48  ;;  %5763 = vmatprep.subr.bf16.mxu0 %v8214_v37  ;;  %v8286_v48 = vld [vmem:[%s11156_s1 + $0x16cc] ss:$16 sps:$4 sm:$0xff]   ;;  %v8281_v37 = vld [vmem:[%s11156_s1 + $0x1448] ss:$16 sps:$4 sm:$0xff]  }
 0x2a5   :  { %5730 = vmatprep.subr.bf16.mxu1 %v8211_v50 }
 0x2a7   :  { %5764 = vmatpush1.bf16.msra.mxu0 %v8212_v53 }
 0x2a8   :  { %5731 = vmatpush2.bf16.msra.mxu1 %v8209_v52  ;;  %5765 = vmatprep.subr.bf16.mxu0 %v8220_v56  ;;  %v8284_v52 = vld [vmem:[%s11156_s1 + $0x16c8] ss:$16 sps:$4 sm:$0xff]  }
 0x2a9   :  { %5732 = vmatprep.subr.bf16.mxu1 %v8217_v55  ;;  %v8289_v55 = vld [vmem:[%s11156_s1 + $0x142c] ss:$16 sps:$4 sm:$0xff]  }
 0x2ab   :  { %5766 = vmatpush1.bf16.msra.mxu0 %v8218_v15  ;;  %v8287_v15 = vld [vmem:[%s11156_s1 + $0x1428] ss:$16 sps:$4 sm:$0xff]  }
 0x2ac   :  { %5733 = vmatpush2.bf16.msra.mxu1 %v8215_v59  ;;  %5767 = vmatprep.subr.bf16.mxu0 %v8226_v2 }
 0x2ad   :  { %5734 = vmatprep.subr.bf16.mxu1 %v8223_v60  ;;  %v8290_v60 = vld [vmem:[%s11156_s1 + $0x16a8] ss:$16 sps:$4 sm:$0xff]  }
 0x2af   :  { %5768 = vmatpush1.bf16.msra.mxu0 %v8224_v39  ;;  %v8293_v39 = vld [vmem:[%s11156_s1 + $0x1408] ss:$16 sps:$4 sm:$0xff]  }
 0x2b0   :  { %5735 = vmatpush2.bf16.msra.mxu1 %v8221_v3  ;;  %5769 = vmatprep.subr.bf16.mxu0 %v8232_v0  ;;  %v8295_v3 = vld [vmem:[%s11156_s1 + $0x140c] ss:$16 sps:$4 sm:$0xff]  }
 0x2b1   :  { %5736 = vmatprep.subr.bf16.mxu1 %v8229_v5  ;;  %v8296_v5 = vld [vmem:[%s11156_s1 + $0x1688] ss:$16 sps:$4 sm:$0xff]   ;;  %v8301_v0 = vld [vmem:[%s11156_s1 + $0x15ec] ss:$16 sps:$4 sm:$0xff]  }
 0x2b3   :  { %5770 = vmatpush2.bf16.msra.mxu0 %v8230_v11  ;;  %v8299_v11 = vld [vmem:[%s11156_s1 + $0x15e8] ss:$16 sps:$4 sm:$0xff]  }
 0x2b4   :  { %5737 = vmatpush2.bf16.msra.mxu1 %v8227_v8  ;;  %5771 = vmatprep.subr.bf16.mxu0 %v8238_v27  ;;  %v8304_v8 = vld [vmem:[%s11156_s1 + $0x166c] ss:$16 sps:$4 sm:$0xff]  }
 0x2b5   :  { %5738 = vmatprep.subr.bf16.mxu1 %v8235_v24  ;;  %v8302_v24 = vld [vmem:[%s11156_s1 + $0x1668] ss:$16 sps:$4 sm:$0xff]   ;;  %v8307_v27 = vld [vmem:[%s11156_s1 + $0x15cc] ss:$16 sps:$4 sm:$0xff]  }
 0x2b7   :  { %5772 = vmatpush2.bf16.msra.mxu0 %v8236_v9  ;;  %v8305_v9 = vld [vmem:[%s11156_s1 + $0x15c8] ss:$16 sps:$4 sm:$0xff]  }
 0x2b8   :  { %5739 = vmatpush2.bf16.msra.mxu1 %v8233_v43  ;;  %5773 = vmatprep.subr.bf16.mxu0 %v8244_v13  ;;  %v8310_v43 = vld [vmem:[%s11156_s1 + $0x164c] ss:$16 sps:$4 sm:$0xff]  }
 0x2b9   :  { %5740 = vmatprep.subr.bf16.mxu1 %v8241_v12  ;;  %v8308_v12 = vld [vmem:[%s11156_s1 + $0x1648] ss:$16 sps:$4 sm:$0xff]   ;;  %v8313_v13 = vld [vmem:[%s11156_s1 + $0x15ac] ss:$16 sps:$4 sm:$0xff]  }
 0x2bb   :  { %5774 = vmatpush2.bf16.msra.mxu0 %v8242_v6  ;;  %v8311_v6 = vld [vmem:[%s11156_s1 + $0x15a8] ss:$16 sps:$4 sm:$0xff]  }
 0x2bc   :  { %5741 = vmatpush2.bf16.msra.mxu1 %v8239_v14  ;;  %5775 = vmatprep.subr.bf16.mxu0 %v8250_v54  ;;  %v8316_v14 = vld [vmem:[%s11156_s1 + $0x162c] ss:$16 sps:$4 sm:$0xff]  }
 0x2bd   :  { %5742 = vmatprep.subr.bf16.mxu1 %v8247_v19  ;;  %v8314_v19 = vld [vmem:[%s11156_s1 + $0x1628] ss:$16 sps:$4 sm:$0xff]   ;;  %v8319_v54 = vld [vmem:[%s11156_s1 + $0x158c] ss:$16 sps:$4 sm:$0xff]  }
 0x2bf   :  { %5776 = vmatpush2.bf16.msra.mxu0 %v8248_v18  ;;  %v8317_v18 = vld [vmem:[%s11156_s1 + $0x1588] ss:$16 sps:$4 sm:$0xff]  }
 0x2c0   :  { %5743 = vmatpush2.bf16.msra.mxu1 %v8245_v26  ;;  %5777 = vmatprep.subr.bf16.mxu0 %v8253_v20  ;;  %v8322_v26 = vld [vmem:[%s11156_s1 + $0x160c] ss:$16 sps:$4 sm:$0xff]   ;;  %v8320_v20 = vld [vmem:[%s11156_s1 + $0x1608] ss:$16 sps:$4 sm:$0xff]  }
 0x2c1   :  { %5794 = vmatprep.subr.bf16.mxu1 %v8256_v29  ;;  %v8325_v29 = vld [vmem:[%s11156_s1 + $0x156c] ss:$16 sps:$4 sm:$0xff]  }
 0x2c3   :  { %v5500_v36 = vpop.f32.mrf.mxu1  ;;  %5745 = vmatmul.mubr.bf16.vlgmr.msra.gmra.mxu1 %v9559_v61  ;;  %5778 = vmatpush2.bf16.msra.mxu0 %v8251_v28  ;;  %v8268_v61 = vld [vmem:[%s11156_s1 + $0x14ac] ss:$16 sps:$4 sm:$0xff]  }
 0x2c4   :  { %v5501_v32 = vadd.f32 %v5500_v36, %v10667_v51  ;;  %5795 = vmatpush1.bf16.msra.mxu1 %v8254_v31  ;;  %5779 = vmatprep.subr.bf16.mxu0 %v8259_v17  ;;  %v8328_v28 = vld [vmem:[%s11156_s1 + $0x17ec] ss:$16 sps:$4 sm:$0xff]   ;;  %v8323_v31 = vld [vmem:[%s11156_s1 + $0x1568] ss:$16 sps:$4 sm:$0xff]  }
 0x2c5   :  { %v5502_v38 = vpop.f32.mrf.mxu1  ;;  %5796 = vmatprep.subr.bf16.mxu1 %v8262_v30  ;;  %5826 = vmatprep.mubr.bf16.mxu1 %v9579_v35  ;;  %v8274_v35 = vld [vmem:[%s11156_s1 + $0x148c] ss:$16 sps:$4 sm:$0xff]   ;;  %v8326_v17 = vld [vmem:[%s11156_s1 + $0x17e8] ss:$16 sps:$4 sm:$0xff]  }
 0x2c6   :  { %v5503_v51 = vadd.f32 %v5502_v38, %v10672_v41  ;;  %v8271_v41 = vld [vmem:[%s11156_s1 + $0x130c] ss:$16 sps:$4 sm:$0xff]  }
 0x2c7   :  { %v5504_v34 = vpop.f32.mrf.mxu1  ;;  %5780 = vmatpush2.bf16.msra.mxu0 %v8257_v25  ;;  %v8331_v30 = vld [vmem:[%s11156_s1 + $0x154c] ss:$16 sps:$4 sm:$0xff]   ;;  %v8332_v25 = vld [vmem:[%s11156_s1 + $0x17c8] ss:$16 sps:$4 sm:$0xff]  }
 0x2c8   :  { %5797 = vmatpush1.bf16.msra.mxu1 %v8260_v33  ;;  %5781 = vmatprep.subr.bf16.mxu0 %v8265_v47  ;;  %v8334_v36 = vld [vmem:[%s11156_s1 + $0x17cc] ss:$16 sps:$4 sm:$0xff]   ;;  %v8335_v47 = vld [vmem:[%s11156_s1 + $0x1528] ss:$16 sps:$4 sm:$0xff]  }
 0x2c9   :  { %v5505_v23 = vpop.f32.mrf.mxu1  ;;  %5798 = vmatprep.subr.bf16.mxu1 %v8268_v61  ;;  %v8337_v33 = vld [vmem:[%s11156_s1 + $0x152c] ss:$16 sps:$4 sm:$0xff]   ;;  %v8338_v61 = vld [vmem:[%s11156_s1 + $0x17a8] ss:$16 sps:$4 sm:$0xff]  }
 0x2ca   :  { %v8340_v38 = vld [vmem:[%s11156_s1 + $0x17ac] ss:$16 sps:$4 sm:$0xff]  }
 0x2cb   :  { %5782 = vmatpush2.bf16.msra.mxu0 %v8263_v1  ;;  %v8346_v34 = vld [vmem:[%s11156_s1 + $0x178c] ss:$16 sps:$4 sm:$0xff]   ;;  %v8341_v1 = vld [vmem:[%s11156_s1 + $0x1508] ss:$16 sps:$4 sm:$0xff]  }
 0x2cc   :  { %5799 = vmatpush1.bf16.msra.mxu1 %v8266_v22  ;;  %5783 = vmatprep.subr.bf16.mxu0 %v8271_v41  ;;  %v8344_v22 = vld [vmem:[%s11156_s1 + $0x1788] ss:$16 sps:$4 sm:$0xff]   ;;  %v8349_v23 = vld [vmem:[%s11156_s1 + $0x176c] ss:$16 sps:$4 sm:$0xff]  }
 0x2cd   :  { %5800 = vmatprep.subr.bf16.mxu1 %v8274_v35  ;;  %v8352_v41 = vld [vmem:[%s11156_s1 + $0x186c] ss:$16 sps:$4 sm:$0xff]   ;;  %v8347_v35 = vld [vmem:[%s11156_s1 + $0x1768] ss:$16 sps:$4 sm:$0xff]  }
 0x2cf   :  { %5784 = vmatpush2.bf16.msra.mxu0 %v8269_v44  ;;  %v8350_v44 = vld [vmem:[%s11156_s1 + $0x1868] ss:$16 sps:$4 sm:$0xff]  }
 0x2d0   :  { %5801 = vmatpush1.bf16.msra.mxu1 %v8272_v45  ;;  %5835 = vmatprep.subr.bf16.mxu0 %v8280_v7  ;;  %v8355_v45 = vld [vmem:[%s11156_s1 + $0x174c] ss:$16 sps:$4 sm:$0xff]  }
 0x2d1   :  { %5802 = vmatprep.subr.bf16.mxu1 %v8277_v46  ;;  %v8358_v46 = vld [vmem:[%s11156_s1 + $0x184c] ss:$16 sps:$4 sm:$0xff]  }
 0x2d2   :  { %v5541_v49 = vpop.f32.mrf.mxu0  ;;  %5786 = vmatmul.mubr.bf16.vlgmr.msra.gmra.mxu0 %v9563_v62  ;;  %v8292_v62 = vld [vmem:[%s11156_s1 + $0x16ac] ss:$16 sps:$4 sm:$0xff]  }
 0x2d3   :  { %v10860_v50 = vadd.f32 %v5541_v49, %v5501_v32  ;;  %5836 = vmatpush1.bf16.msra.mxu0 %v8278_v42  ;;  %5867 = vmatprep.mubr.bf16.mxu0 %v9583_v40  ;;  %v8298_v40 = vld [vmem:[%s11156_s1 + $0x168c] ss:$16 sps:$4 sm:$0xff]   ;;  %v8329_v32 = vld [vmem:[%s11156_s1 + $0x1548] ss:$16 sps:$4 sm:$0xff]  }
 0x2d4   :  { %5803 = vmatpush1.bf16.msra.mxu1 %v8275_v10  ;;  %v5543_v53 = vpop.f32.mrf.mxu0  ;;  %5837 = vmatprep.subr.bf16.mxu0 %v8286_v48  ;;  %v8353_v42 = vld [vmem:[%s11156_s1 + $0x1748] ss:$16 sps:$4 sm:$0xff]   ;;  %v8361_v49 = vld [vmem:[%s11156_s1 + $0x172c] ss:$16 sps:$4 sm:$0xff]  }
 0x2d5   :  { %5804 = vmatprep.subr.bf16.mxu1 %v8283_v57  ;;  %v10874_v56 = vadd.f32 %v5543_v53, %v5503_v51  ;;  %v8343_v51 = vld [vmem:[%s11156_s1 + $0x150c] ss:$16 sps:$4 sm:$0xff]   ;;  %v8356_v57 = vld [vmem:[%s11156_s1 + $0x1848] ss:$16 sps:$4 sm:$0xff]  }
 0x2d6   :  { %v5545_v59 = vpop.f32.mrf.mxu0  ;;  %v8362_v53 = vld [vmem:[%s11156_s1 + $0x1828] ss:$16 sps:$4 sm:$0xff]  }
 0x2d7   :  { %5838 = vmatpush1.bf16.msra.mxu0 %v8284_v52  ;;  %v8359_v52 = vld [vmem:[%s11156_s1 + $0x1728] ss:$16 sps:$4 sm:$0xff]  }
 0x2d8   :  { %5805 = vmatpush1.bf16.msra.mxu1 %v8281_v37  ;;  %v5546_v2 = vpop.f32.mrf.mxu0  ;;  %5839 = vmatprep.subr.bf16.mxu0 %v8292_v62  ;;  %v8367_v62 = vld [vmem:[%s11156_s1 + $0x170c] ss:$16 sps:$4 sm:$0xff]   ;;  %v8365_v59 = vld [vmem:[%s11156_s1 + $0x1708] ss:$16 sps:$4 sm:$0xff]  }
 0x2d9   :  { %5806 = vmatprep.subr.bf16.mxu1 %v8289_v55 }
 0x2db   :  { %5840 = vmatpush1.bf16.msra.mxu0 %v8290_v60  ;;  %v8371_v60 = vld [vmem:[%s11159_s3 + $0x78] sm:$0xff]  }
 0x2dc   :  { %5807 = vmatpush1.bf16.msra.mxu1 %v8287_v15  ;;  %5841 = vmatprep.subr.bf16.mxu0 %v8298_v40  ;;  %v8368_v15 = vld [vmem:[%s11156_s1 + $0x1808] ss:$16 sps:$4 sm:$0xff]   ;;  %v8373_v40 = vld [vmem:[%s11159_s3 + $0x70] sm:$0xff]  }
 0x2dd   :  { %5808 = vmatprep.subr.bf16.mxu1 %v8295_v3  ;;  %v8372_v3 = vld [vmem:[%s11159_s3 + $0x38] sm:$0xff]  }
 0x2df   :  { %5842 = vmatpush1.bf16.msra.mxu0 %v8296_v5 }
 0x2e0   :  { %5809 = vmatpush1.bf16.msra.mxu1 %v8293_v39  ;;  %5843 = vmatprep.subr.bf16.mxu0 %v8304_v8  ;;  %v8374_v8 = vld [vmem:[%s11159_s3 + $0x30] sm:$0xff]  }
 0x2e1   :  { %5810 = vmatprep.subr.bf16.mxu1 %v8301_v0  ;;  %v8404_v0 = vld [vmem:[%s11157_s0 + $0x60] ss:$0 sps:$4 sm:$0xff]  }
 0x2e3   :  { %5844 = vmatpush1.bf16.msra.mxu0 %v8302_v24  ;;  %v8375_v24 = vld [vmem:[%s11159_s3 + $0x68] sm:$0xff]  }
 0x2e4   :  { %5811 = vmatpush2.bf16.msra.mxu1 %v8299_v11  ;;  %5845 = vmatprep.subr.bf16.mxu0 %v8310_v43  ;;  %v8376_v43 = vld [vmem:[%s11159_s3 + $0x28] sm:$0xff]  }
 0x2e5   :  { %5812 = vmatprep.subr.bf16.mxu1 %v8307_v27 }
 0x2e7   :  { %5846 = vmatpush1.bf16.msra.mxu0 %v8308_v12  ;;  %v8377_v12 = vld [vmem:[%s11159_s3 + $0x60] sm:$0xff]  }
 0x2e8   :  { %5813 = vmatpush2.bf16.msra.mxu1 %v8305_v9  ;;  %5847 = vmatprep.subr.bf16.mxu0 %v8316_v14  ;;  %v8388_v14 = vld [vmem:[%s11159_s3 + $0xb8] sm:$0xff]  }
 0x2e9   :  { %5814 = vmatprep.subr.bf16.mxu1 %v8313_v13  ;;  %v8387_v13 = vld [vmem:[%s11159_s3 + $0xf8] sm:$0xff]  }
 0x2eb   :  { %5848 = vmatpush1.bf16.msra.mxu0 %v8314_v19  ;;  %v8379_v19 = vld [vmem:[%s11159_s3 + $0x58] sm:$0xff]  }
 0x2ec   :  { %5815 = vmatpush2.bf16.msra.mxu1 %v8311_v6  ;;  %5849 = vmatprep.subr.bf16.mxu0 %v8322_v26  ;;  %v8378_v6 = vld [vmem:[%s11159_s3 + $0x20] sm:$0xff]   ;;  %v8381_v26 = vld [vmem:[%s11159_s3 + $0x50] sm:$0xff]  }
 0x2ed   :  { %5816 = vmatprep.subr.bf16.mxu1 %v8319_v54  ;;  %v8380_v54 = vld [vmem:[%s11159_s3 + $0x18] sm:$0xff]  }
 0x2ef   :  { %5850 = vmatpush1.bf16.msra.mxu0 %v8320_v20  ;;  %v8383_v20 = vld [vmem:[%s11159_s3 + $0x48] sm:$0xff]  }
 0x2f0   :  { %5817 = vmatpush2.bf16.msra.mxu1 %v8317_v18  ;;  %5851 = vmatprep.subr.bf16.mxu0 %v8328_v28  ;;  %v8382_v18 = vld [vmem:[%s11159_s3 + $0x10] sm:$0xff]   ;;  %v8385_v28 = vld [vmem:[%s11159_s3 + $0x40] sm:$0xff]  }
 0x2f1   :  { %5818 = vmatprep.subr.bf16.mxu1 %v8325_v29  ;;  %v8384_v29 = vld [vmem:[%s11159_s3 + $0x8] sm:$0xff]  }
 0x2f3   :  { %5852 = vmatpush2.bf16.msra.mxu0 %v8326_v17  ;;  %v8386_v17 = vld [vmem:[%s11159_s3] sm:$0xff]  }
 0x2f4   :  { %5819 = vmatpush2.bf16.msra.mxu1 %v8323_v31  ;;  %5853 = vmatprep.subr.bf16.mxu0 %v8334_v36  ;;  %v5921_v31 = vmul.f32 0.01, %v10453_v16 }
 0x2f5   :  { %5820 = vmatprep.subr.bf16.mxu1 %v8331_v30 }
 0x2f6   :  { %v5925_v30 = vsel %vm5917_vm2, %v10453_v16, %v5921_v31  ;;  %v8391_v16 = vld [vmem:[%s11159_s3 + $0xe8] sm:$0xff]  }
 0x2f7   :  { %5854 = vmatpush2.bf16.msra.mxu0 %v8332_v25  ;;  %v5929_v36 = vpack.c.bf16 %v5925_v30, %v5925_v30 }
 0x2f8   :  { %5821 = vmatpush2.bf16.msra.mxu1 %v8329_v32  ;;  %5855 = vmatprep.subr.bf16.mxu0 %v8340_v38  ;;  %v8389_v32 = vld [vmem:[%s11159_s3 + $0xf0] sm:$0xff]  }
 0x2f9   :  { %5822 = vmatprep.subr.bf16.mxu1 %v8337_v33  ;;  %v8390_v33 = vld [vmem:[%s11159_s3 + $0xb0] sm:$0xff]  }
 0x2fb   :  { %5856 = vmatpush2.bf16.msra.mxu0 %v8338_v61 }
 0x2fc   :  { %5823 = vmatpush2.bf16.msra.mxu1 %v8335_v47  ;;  %5857 = vmatprep.subr.bf16.mxu0 %v8346_v34  ;;  %v8392_v34 = vld [vmem:[%s11159_s3 + $0xa8] sm:$0xff]  }
 0x2fd   :  { %5824 = vmatprep.subr.bf16.mxu1 %v8343_v51 }
 0x2ff   :  { %5858 = vmatpush2.bf16.msra.mxu0 %v8344_v22  ;;  %v8393_v22 = vld [vmem:[%s11159_s3 + $0xe0] sm:$0xff]  }
 0x300   :  { %5825 = vmatpush2.bf16.msra.mxu1 %v8341_v1  ;;  %5859 = vmatprep.subr.bf16.mxu0 %v8349_v23  ;;  %v8394_v23 = vld [vmem:[%s11159_s3 + $0xa0] sm:$0xff]  }
 0x301   :  { %5884 = vmatprep.subr.bf16.mxu1 %v8352_v41  ;;  %v8395_v41 = vld [vmem:[%s11159_s3 + $0xd8] sm:$0xff]  }
 0x303   :  { %v5582_v7 = vpop.f32.mrf.mxu1  ;;  %5827 = vmatmul.mubr.bf16.vlgmr.msra.gmra.mxu1 %v9777_v63  ;;  %5860 = vmatpush2.bf16.msra.mxu0 %v8347_v35  ;;  %v8364_v63 = vld [vmem:[%s11156_s1 + $0x182c] ss:$16 sps:$4 sm:$0xff]  }
 0x304   :  { %v5583_v10 = vadd.f32 %v5582_v7, %v10860_v50  ;;  %5885 = vmatpush1.bf16.msra.mxu1 %v8350_v44  ;;  %5861 = vmatprep.subr.bf16.mxu0 %v8355_v45  ;;  %v8396_v35 = vld [vmem:[%s11159_s3 + $0x98] sm:$0xff]   ;;  %v8397_v44 = vld [vmem:[%s11159_s3 + $0xd0] sm:$0xff]  }
 0x305   :  { %v5584_v48 = vpop.f32.mrf.mxu1  ;;  %5886 = vmatprep.subr.bf16.mxu1 %v8358_v46  ;;  %5908 = vmatprep.mubr.bf16.mxu1 %v8405_v21  ;;  %v8370_v21 = vld [vmem:[%s11156_s1 + $0x180c] ss:$16 sps:$4 sm:$0xff]   ;;  %v8398_v46 = vld [vmem:[%s11159_s3 + $0x90] sm:$0xff]  }
 0x306   :  { %v5585_v50 = vadd.f32 %v5584_v48, %v10874_v56  ;;  %v5922_v56 = vmul.f32 0.01, %v10467_v58 }
 0x307   :  { %v5586_v37 = vpop.f32.mrf.mxu1  ;;  %5862 = vmatpush2.bf16.msra.mxu0 %v8353_v42 }
 0x308   :  { %5887 = vmatpush1.bf16.msra.mxu1 %v8356_v57  ;;  %5863 = vmatprep.subr.bf16.mxu0 %v8361_v49  ;;  %v5926_v2 = vsel %vm5918_vm1, %v10467_v58, %v5922_v56  ;;  %v8399_v57 = vld [vmem:[%s11159_s3 + $0xc8] sm:$0xff]   ;;  %v8402_v37 = vld [vmem:[%s11159_s3 + $0x80] sm:$0xff]  }
 0x309   :  { %v5587_v55 = vpop.f32.mrf.mxu1  ;;  %5888 = vmatprep.subr.bf16.mxu1 %v8364_v63  ;;  %v5930_v39 = vpack.c.bf16 %v5926_v2, %v5926_v2  ;;  %v8400_v49 = vld [vmem:[%s11159_s3 + $0x88] sm:$0xff]  }
 0x30b   :  { %5864 = vmatpush2.bf16.msra.mxu0 %v8359_v52 }
 0x30c   :  { %5889 = vmatpush1.bf16.msra.mxu1 %v8362_v53  ;;  %5865 = vmatprep.subr.bf16.mxu0 %v8367_v62 }
 0x30d   :  { %5890 = vmatprep.subr.bf16.mxu1 %v8370_v21 }
 0x30f   :  { %5866 = vmatpush2.bf16.msra.mxu0 %v8365_v59 }
 0x310   :  { %5891 = vmatpush1.bf16.msra.mxu1 %v8368_v15  ;;  %7125 = vmatprep.subr.bf16.mxu0 %v8371_v60 }
 0x311   :  { %7147 = vmatprep.subr.bf16.mxu1 %v8387_v13 }
 0x312   :  { %v5623_v5 = vpop.f32.mrf.mxu0  ;;  %5868 = vmatmul.mubr.bf16.vlgmr.msra.gmra.mxu0 %v9781_v4 }
 0x313   :  { %7091 = vmatmul.mubr.msk.bf16.vlgmr.msra.gmra.mxu1 %vm4847_vm0, %v8404_v0  ;;  %v5624_v58 = vadd.f32 %v5623_v5, %v5583_v10  ;;  %7126 = vmatpush3.bf16.msra.mxu0 %v8372_v3 }
 0x314   :  { %6228 = vmatprep.mubr.bf16.mxu0 %v5930_v39  ;;  %v5625_v11 = vpop.f32.mrf.mxu0  ;;  %7127 = vmatprep.subr.bf16.mxu0 %v8373_v40 }
 0x315   :  { %v5626_v4 = vadd.f32 %v5625_v11, %v5585_v50  ;;  %7148 = vmatpush3.bf16.msra.mxu1 %v8388_v14  ;;  %v8401_v50 = vld [vmem:[%s11159_s3 + $0xc0] sm:$0xff]  }
 0x316   :  { %v5627_v27 = vpop.f32.mrf.mxu0  ;;  %7149 = vmatprep.subr.bf16.mxu1 %v8389_v32 }
 0x317   :  { %7128 = vmatpush3.bf16.msra.mxu0 %v8374_v8 }
 0x318   :  { %v5628_v9 = vpop.f32.mrf.mxu0  ;;  %7129 = vmatprep.subr.bf16.mxu0 %v8375_v24 }
 0x319   :  { %7150 = vmatpush3.bf16.msra.mxu1 %v8390_v33 }
 0x31a   :  { %7151 = vmatprep.subr.bf16.mxu1 %v8391_v16 }
 0x31b   :  { %7130 = vmatpush3.bf16.msra.mxu0 %v8376_v43 }
 0x31c   :  { %7131 = vmatprep.subr.bf16.mxu0 %v8377_v12 }
 0x31d   :  { %7152 = vmatpush3.bf16.msra.mxu1 %v8392_v34 }
 0x31e   :  { %7153 = vmatprep.subr.bf16.mxu1 %v8393_v22 }
 0x31f   :  { %7132 = vmatpush3.bf16.msra.mxu0 %v8378_v6 }
 0x320   :  { %7133 = vmatprep.subr.bf16.mxu0 %v8379_v19 }
 0x321   :  { %7154 = vmatpush3.bf16.msra.mxu1 %v8394_v23 }
 0x322   :  { %7155 = vmatprep.subr.bf16.mxu1 %v8395_v41 }
 0x323   :  { %7134 = vmatpush3.bf16.msra.mxu0 %v8380_v54 }
 0x324   :  { %7135 = vmatprep.subr.bf16.mxu0 %v8381_v26 }
 0x325   :  { %7156 = vmatpush3.bf16.msra.mxu1 %v8396_v35 }
 0x326   :  { %7157 = vmatprep.subr.bf16.mxu1 %v8397_v44 }
 0x327   :  { %7136 = vmatpush3.bf16.msra.mxu0 %v8382_v18 }
 0x328   :  { %7137 = vmatprep.subr.bf16.mxu0 %v8383_v20 }
 0x329   :  { %7158 = vmatpush3.bf16.msra.mxu1 %v8398_v46 }
 0x32a   :  { %7159 = vmatprep.subr.bf16.mxu1 %v8399_v57 }
 0x32b   :  { %7138 = vmatpush3.bf16.msra.mxu0 %v8384_v29 }
 0x32c   :  { %7139 = vmatprep.subr.bf16.mxu0 %v8385_v28 }
 0x32d   :  { %7160 = vmatpush3.bf16.msra.mxu1 %v8400_v49 }
 0x32e   :  { %7161 = vmatprep.subr.bf16.mxu1 %v8401_v50 }
 0x32f   :  { %7140 = vmatpush3.bf16.msra.mxu0 %v8386_v17 }
 0x331   :  { %7162 = vmatpush3.bf16.msra.mxu1 %v8402_v37 }
 0x332   :  { %6229 = vmatmul.mubr.bf16.vlgmr.msra.gmra.mxu0 %v5929_v36 }
 0x343   :  { %v5664_v25 = vpop.f32.mrf.mxu1 }
 0x344   :  { %v5665_v38 = vadd.f32 %v5664_v25, %v5624_v58 }
 0x345   :  { %v5666_v47 = vpop.f32.mrf.mxu1 }
 0x346   :  { %v5667_v61 = vadd.f32 %v5666_v47, %v5626_v4 }
 0x347   :  { %v5668_v51 = vpop.f32.mrf.mxu1 }
 0x349   :  { %v5669_v1 = vpop.f32.mrf.mxu1 }
 0x352   :  { %v5705_v45 = vpop.f32.mrf.mxu0 }
 0x353   :  { %v5706_v7 = vadd.f32 %v5705_v45, %v5665_v38  ;;  %v7092_v38 = vld [vmem:[%s11160_s4] ss:$0 sm:$0xff] }
 0x354   :  { %v5707_v10 = vpop.f32.mrf.mxu0 }
 0x355   :  { %v5708_v42 = vadd.f32 %v5707_v10, %v5667_v61 }
 0x356   :  { %v5709_v48 = vpop.f32.mrf.mxu0 }
 0x358   :  { %v5710_v63 = vpop.f32.mrf.mxu0 }
 0x383   :  { %v5746_v52 = vpop.f32.mrf.mxu1 }
 0x384   :  { %v5747_v53 = vadd.f32 %v5746_v52, %v5706_v7 }
 0x385   :  { %v5748_v55 = vpop.f32.mrf.mxu1 }
 0x386   :  { %v5749_v62 = vadd.f32 %v5748_v55, %v5708_v42 }
 0x387   :  { %v5750_v21 = vpop.f32.mrf.mxu1 }
 0x389   :  { %v5751_v56 = vpop.f32.mrf.mxu1 }
 0x392   :  { %v5787_v59 = vpop.f32.mrf.mxu0 }
 0x393   :  { %v5788_v0 = vadd.f32 %v5787_v59, %v5747_v53 }
 0x394   :  { %v5789_v15 = vpop.f32.mrf.mxu0 }
 0x395   :  { %v5790_v58 = vadd.f32 %v5789_v15, %v5749_v62 }
 0x396   :  { %v5791_v60 = vpop.f32.mrf.mxu0 }
 0x398   :  { %v5792_v2 = vpop.f32.mrf.mxu0 }
 0x3c3   :  { %v5828_v3 = vpop.f32.mrf.mxu1 }
 0x3c4   :  { %v5829_v8 = vadd.f32 %v5828_v3, %v5788_v0 }
 0x3c5   :  { %v5830_v40 = vpop.f32.mrf.mxu1 }
 0x3c6   :  { %v5831_v4 = vadd.f32 %v5830_v40, %v5790_v58 }
 0x3c7   :  { %v5832_v39 = vpop.f32.mrf.mxu1 }
 0x3c9   :  { %v5833_v5 = vpop.f32.mrf.mxu1 }
 0x3d2   :  { %v5869_v11 = vpop.f32.mrf.mxu0 }
 0x3d3   :  { %v5910_v24 = vpop.f32.mrf.mxu1  ;;  %v5870_v27 = vadd.f32 %v5869_v11, %v5829_v8 }
 0x3d4   :  { %v5871_v43 = vpop.f32.mrf.mxu0 }
 0x3d5   :  { %v5912_v9 = vpop.f32.mrf.mxu1  ;;  %v5911_v12 = vadd.f32 %v5910_v24, %v5870_v27  ;;  %v5872_v13 = vadd.f32 %v5871_v43, %v5831_v4 }
 0x3d6   :  { %v5873_v14 = vpop.f32.mrf.mxu0 }
 0x3d7   :  { %v5914_v6 = vpop.f32.mrf.mxu1  ;;  %vm5919_vm3 = vcmp.ge.f32.partialorder %v5911_v12, 0.0  ;;  %v5923_v19 = vmul.f32 0.01, %v5911_v12  ;;  %v5913_v54 = vadd.f32 %v5912_v9, %v5872_v13 }
 0x3d8   :  { %v5874_v26 = vpop.f32.mrf.mxu0 }
 0x3d9   :  { %v5915_v18 = vpop.f32.mrf.mxu1  ;;  %vm5920_vm4 = vcmp.ge.f32.partialorder %v5913_v54, 0.0  ;;  %v5924_v20 = vmul.f32 0.01, %v5913_v54  ;;  %v5927_v29 = vsel %vm5919_vm3, %v5911_v12, %v5923_v19 }
 0x3da   :  { %v5931_v17 = vpack.c.bf16 %v5927_v29, %v5927_v29 }
 0x3db   :  { %v5928_v28 = vsel %vm5920_vm4, %v5913_v54, %v5924_v20 }
 0x3dc   :  { %v5932_v31 = vpack.c.bf16 %v5928_v28, %v5928_v28 }
 0x3de   :  { %6268 = vmatprep.mubr.bf16.mxu1 %v5932_v31 }
 0x3df   :  { %6269 = vmatmul.mubr.bf16.vlgmr.msra.gmra.mxu1 %v5931_v17 }
 0x3f2   :  { %v7141_v30 = vpop.f32.mrf.mxu0 }
 0x3f4   :  { %v7142_v36 = vpop.f32.mrf.mxu0 }
 0x3f5   :  { %v7143_v32 = vadd.f32 %v7142_v36, %v7141_v30 }
 0x3f6   :  { %v7144_v25 = vpop.f32.mrf.mxu0 }
 0x3f7   :  { %v6231_v16 = vadd.f32 %v7143_v32, %v7092_v38 }
 0x3f8   :  { %v7145_v33 = vpop.f32.mrf.mxu0 }
 0x49f   :  { %v7163_v47 = vpop.f32.mrf.mxu1 }
 0x4a1   :  { %v7164_v61 = vpop.f32.mrf.mxu1 }
 0x4a2   :  { %v7165_v51 = vadd.f32 %v7164_v61, %v7163_v47 }
 0x4a3   :  { %v7166_v34 = vpop.f32.mrf.mxu1 }
 0x4a4   :  { %v6271_v1 = vadd.f32 %v7165_v51, %v6231_v16 }
 0x4a5   :  { %v7167_v22 = vpop.f32.mrf.mxu1 }
 0x4a6   :  { %6276 = vst [vmem:[%s11161_s5] sm:$0xff] %v6271_v1 }

</bundles_post_ra>
